<compile_context>
chip_gen: v7x
topology: tpu7x:2x2x1
jax: 0.10.0
libtpu: 0.0.40
codegen_flags: <defaults>
</compile_context>

<pallas_src>
import math
import functools

import jax
import jax.numpy as jnp
from jax import lax
from jax.experimental import pallas as pl
from jax.experimental.pallas import tpu as pltpu


def _round_up(v, m):
    return (v + m - 1) // m * m


def _lstm_kernel(x_ref, *refs, num_layers, hidden_size, seq_len, batch_tile,
                 matmul_dtype):
    H = hidden_size
    S = seq_len
    Bt = batch_tile

    layer_refs = refs[:3 * num_layers]
    w1_ref, b1_ref, w2_ref, b2_ref, out_ref, seq_ref = refs[3 * num_layers:]

    def mm(a, b):
        # Weights are pre-cast to matmul_dtype in the wrapper; only the activation
        # operand is cast here.  Accumulation is always f32.
        return jnp.dot(a.astype(matmul_dtype), b,
                       preferred_element_type=jnp.float32)

    h_finals = []
    for l in range(num_layers):
        wih_ref, whh_ref, b_ref = layer_refs[3 * l:3 * l + 3]
        if l == 0:
            # Bt % 8 == 0, so merging (S, Bt) -> S*Bt rows is tiling-aligned
            # (no sublane relayout copy).
            inp = x_ref[...].reshape(S * Bt, x_ref.shape[-1])
        else:
            inp = seq_ref[...]                      # layer l-1 outputs, time-major

        # Fused input projection for every timestep at once: one big-M, lane-dense
        # (S*Bt, in_l) @ (in_l, 4H) MXU call instead of S tiny ones.
        xp = mm(inp, wih_ref[...]) + b_ref[...]     # (S*Bt, 4H) f32

        whh = whh_ref[...]
        h = jnp.zeros((Bt, H), jnp.float32)
        c = jnp.zeros((Bt, H), jnp.float32)
        last_layer = l == num_layers - 1

        # TODO(synk): for long sequences, replace this static unroll with
        #   lax.fori_loop over a second VMEM scratch holding xp, writing h_t into
        #   seq_ref at dynamic pl.ds offsets, to keep code size / compile time flat.
        for t in range(S):
            gates = xp[t * Bt:(t + 1) * Bt, :] + mm(h, whh)      # (Bt, 4H)
            # Gate columns pre-ordered [i | f | o | g] in the wrapper:
            # 2 EUP calls per step (sigmoid over 3H lanes + tanh over H lanes)
            # instead of 4 -- the EUP sits on the serial recurrence critical path.
            sig = jax.nn.sigmoid(gates[:, :3 * H])
            g_g = jnp.tanh(gates[:, 3 * H:])
            i_g = sig[:, 0 * H:1 * H]
            f_g = sig[:, 1 * H:2 * H]
            o_g = sig[:, 2 * H:3 * H]
            c = f_g * c + i_g * g_g
            h = o_g * jnp.tanh(c)
            if not last_layer:
                # Store h_t immediately (bounds its live range; sublane-aligned
                # since Bt % 8 == 0).  This scratch feeds the next layer's
                # fused projection.
                seq_ref[pl.ds(t * Bt, Bt), :] = h
        h_finals.append(h)

    # h_n.permute(1, 0, 2).reshape(B, L*H): per batch row [h_layer0 | h_layer1 | ...]
    z = jnp.concatenate(h_finals, axis=-1)           # (Bt, L*H)
    z = jnp.maximum(z, 0.0)                           # relu
    z = mm(z, w1_ref[...]) + b1_ref[...]
    z = jnp.maximum(z, 0.0)                           # relu
    z = mm(z, w2_ref[...]) + b2_ref[...]              # (Bt, C_pad) lane-dense
    out_ref[...] = z.astype(out_ref.dtype)


def lstm_forward(x, params, *, num_layers, hidden_size, num_classes,
                 batch_tile=None, matmul_dtype=jnp.float32):
    """x: (B, S, input_size) f32. params: PyTorch-layout LSTM / Linear weights.

    matmul_dtype: MXU operand dtype.  float32 (default) tracks the reference closely
    at small H; jnp.bfloat16 (f32 accumulate) is the right choice for realistic
    hidden sizes (native MXU throughput, half the weight DMA/VMEM) while gate /
    elementwise math stays f32 (v5e has no bf16 VPU/EUP).
    """
    B, S, I = x.shape
    H = hidden_size
    fc1_dim = params["w_fc1"].shape[0]

    # ---- batch shaping: sublane-dense tiles ---------------------------------------
    B_pad = _round_up(max(B, 8), 8)
    if B_pad != B:
        x = jnp.pad(x, ((0, B_pad - B), (0, 0), (0, 0)))

    if batch_tile is None:
        # v7x has 2 TensorCores/chip: prefer >= 2 tiles on the "parallel" grid axis
        # so both TCs run concurrently.  Single-TC chips (v5e/v6e) keep one tile so
        # the serial time-loop latency is paid once.
        num_tc = getattr(jax.devices()[0], "num_cores", 1) or 1
        batch_tile = B_pad
        if num_tc >= 2 and B_pad >= 16 and (B_pad // 2) % 8 == 0:
            batch_tile = B_pad // 2
    assert batch_tile % 8 == 0, "batch_tile must be a multiple of 8"
    assert B_pad % batch_tile == 0, "padded batch must be divisible by batch_tile"

    C_pad = _round_up(num_classes, 128)   # lane-dense output slab (no masked stores)

    # ---- VMEM budgeting (v7x: 64 MiB total / ~32 MiB scoped by default) ------------
    def vmem_bytes(bt):
        w = sum(((I if l == 0 else H) + H + 1) * 4 * H for l in range(num_layers))
        w += num_layers * H * fc1_dim + fc1_dim + fc1_dim * C_pad + C_pad
        act = 2 * S * bt * I            # x block (pipelined, double-buffered)
        act += S * bt * (4 * H + H)     # xp value + layer-output scratch
        act += 2 * bt * C_pad           # output block
        return 4 * (w + act)

    budget = 24 << 20
    while vmem_bytes(batch_tile) > budget and batch_tile % 16 == 0 and batch_tile > 8:
        batch_tile //= 2
    vmem_limit = int(min(48 << 20, max(8 << 20, 2 * vmem_bytes(batch_tile))))

    # ---- weight prep: gate reorder [i,f,g,o]->[i,f,o,g], transpose, sum biases -----
    def reorder_gates(w):
        i, f, g, o = jnp.split(w, 4, axis=0)
        return jnp.concatenate([i, f, o, g], axis=0)

    xt = jnp.transpose(x, (1, 0, 2))                    # (S, B_pad, I) time-major

    inputs = [xt]
    x_spec = pl.BlockSpec((S, batch_tile, I), lambda b: (0, b, 0))

    const_shapes = []
    for l in range(num_layers):
        in_l = I if l == 0 else H
        inputs += [
            reorder_gates(params[f"w_ih_{l}"]).T.astype(matmul_dtype),    # (in_l, 4H)
            reorder_gates(params[f"w_hh_{l}"]).T.astype(matmul_dtype),    # (H, 4H)
            reorder_gates(params[f"b_ih_{l}"] + params[f"b_hh_{l}"]
                          ).reshape(1, 4 * H),                            # (1, 4H) f32
        ]
        const_shapes += [(in_l, 4 * H), (H, 4 * H), (1, 4 * H)]

    w_fc2_pad = jnp.zeros((C_pad, fc1_dim),
                          params["w_fc2"].dtype).at[:num_classes].set(params["w_fc2"])
    b_fc2_pad = jnp.zeros((C_pad,),
                          params["b_fc2"].dtype).at[:num_classes].set(params["b_fc2"])
    inputs += [
        params["w_fc1"].T.astype(matmul_dtype), params["b_fc1"].reshape(1, fc1_dim),
        w_fc2_pad.T.astype(matmul_dtype), b_fc2_pad.reshape(1, C_pad),
    ]
    const_shapes += [(num_layers * H, fc1_dim), (1, fc1_dim),
                     (fc1_dim, C_pad), (1, C_pad)]

    def const_spec(shape, single_buffer):
        # Grid-invariant operands (constant index_map): double-buffering them is pure
        # VMEM waste, so request a single buffer when supported.
        if single_buffer:
            return pl.BlockSpec(shape, lambda b: (0, 0), pipeline_mode=pl.Buffered(1))
        return pl.BlockSpec(shape, lambda b: (0, 0))

    kernel = functools.partial(
        _lstm_kernel, num_layers=num_layers, hidden_size=H, seq_len=S,
        batch_tile=batch_tile, matmul_dtype=matmul_dtype)

    def call(single_buffer_weights):
        return pl.pallas_call(
            kernel,
            out_shape=jax.ShapeDtypeStruct((B_pad, C_pad), x.dtype),
            grid=(B_pad // batch_tile,),
            in_specs=[x_spec] + [const_spec(s, single_buffer_weights)
                                 for s in const_shapes],
            out_specs=pl.BlockSpec((batch_tile, C_pad), lambda b: (b, 0)),
            scratch_shapes=[pltpu.VMEM((S * batch_tile, H), jnp.float32)],
            compiler_params=pltpu.CompilerParams(
                dimension_semantics=("parallel",),
                vmem_limit_bytes=vmem_limit),
        )(*inputs)

    try:
        out = call(single_buffer_weights=True)
    except Exception:
        # pl.Buffered(1) on the weight specs is a VMEM-only optimization; fall back
        # to default double-buffering if this JAX build rejects pipeline_mode here.
        out = call(single_buffer_weights=False)

    return out[:B, :num_classes]


def _reference(x, params, *, num_layers, hidden_size, num_classes):
    """Plain-JAX reference mirroring torch.nn.LSTM + the FC head exactly."""
    B, S, I = x.shape
    H = hidden_size
    hp = lax.Precision.HIGHEST

    layer_in = x
    h_finals = []
    for l in range(num_layers):
        wih = params[f"w_ih_{l}"]
        whh = params[f"w_hh_{l}"]
        b = params[f"b_ih_{l}"] + params[f"b_hh_{l}"]
        h = jnp.zeros((B, H), jnp.float32)
        c = jnp.zeros((B, H), jnp.float32)
        outs = []
        for t in range(S):
            g = (jnp.dot(layer_in[:, t, :], wih.T, precision=hp)
                 + jnp.dot(h, whh.T, precision=hp) + b)
            i_g = jax.nn.sigmoid(g[:, 0 * H:1 * H])
            f_g = jax.nn.sigmoid(g[:, 1 * H:2 * H])
            g_g = jnp.tanh(g[:, 2 * H:3 * H])
            o_g = jax.nn.sigmoid(g[:, 3 * H:4 * H])
            c = f_g * c + i_g * g_g
            h = o_g * jnp.tanh(c)
            outs.append(h)
        layer_in = jnp.stack(outs, axis=1)
        h_finals.append(h)

    z = jnp.concatenate(h_finals, axis=-1)
    z = jnp.maximum(z, 0.0)
    z = jnp.dot(z, params["w_fc1"].T, precision=hp) + params["b_fc1"]
    z = jnp.maximum(z, 0.0)
    z = jnp.dot(z, params["w_fc2"].T, precision=hp) + params["b_fc2"]
    return z


if __name__ == "__main__":
    NUM_LAYERS, INPUT, HIDDEN, SEQ, CLASSES = 2, 32, 32, 8, 2
    BATCH = 2
    FC1 = 128   # fixed by the module definition

    key = jax.random.PRNGKey(0)
    keys = jax.random.split(key, 4 * NUM_LAYERS + 5)
    ki = iter(range(len(keys)))

    bound = 1.0 / math.sqrt(HIDDEN)
    params = {}
    for l in range(NUM_LAYERS):
        in_l = INPUT if l == 0 else HIDDEN
        params[f"w_ih_{l}"] = jax.random.uniform(
            keys[next(ki)], (4 * HIDDEN, in_l), jnp.float32, -bound, bound)
        params[f"w_hh_{l}"] = jax.random.uniform(
            keys[next(ki)], (4 * HIDDEN, HIDDEN), jnp.float32, -bound, bound)
        params[f"b_ih_{l}"] = jax.random.uniform(
            keys[next(ki)], (4 * HIDDEN,), jnp.float32, -bound, bound)
        params[f"b_hh_{l}"] = jax.random.uniform(
            keys[next(ki)], (4 * HIDDEN,), jnp.float32, -bound, bound)

    b1 = 1.0 / math.sqrt(NUM_LAYERS * HIDDEN)
    params["w_fc1"] = jax.random.uniform(
        keys[next(ki)], (FC1, NUM_LAYERS * HIDDEN), jnp.float32, -b1, b1)
    params["b_fc1"] = jax.random.uniform(keys[next(ki)], (FC1,), jnp.float32, -b1, b1)
    b2 = 1.0 / math.sqrt(FC1)
    params["w_fc2"] = jax.random.uniform(
        keys[next(ki)], (CLASSES, FC1), jnp.float32, -b2, b2)
    params["b_fc2"] = jax.random.uniform(keys[next(ki)], (CLASSES,), jnp.float32, -b2, b2)

    x = jax.random.normal(keys[next(ki)], (BATCH, SEQ, INPUT), jnp.float32)

    out = lstm_forward(x, params, num_layers=NUM_LAYERS,
                       hidden_size=HIDDEN, num_classes=CLASSES)
    out = jax.block_until_ready(out)

    ref = _reference(x, params, num_layers=NUM_LAYERS,
                     hidden_size=HIDDEN, num_classes=CLASSES)
    assert out.shape == (BATCH, CLASSES)
    assert jnp.allclose(out, ref, atol=1e-3, rtol=1e-3), "mismatch vs reference"

    print("KERNEL_OK")
</pallas_src>

<mosaic_0001>
module attributes {stable_mosaic.version = 11 : i64} {
  func.func @_lstm_kernel(%arg0: i32, %arg1: memref<8x8x32xf32, #tpu.memory_space<vmem>>, %arg2: memref<32x128xf32, #tpu.memory_space<vmem>>, %arg3: memref<32x128xf32, #tpu.memory_space<vmem>>, %arg4: memref<1x128xf32, #tpu.memory_space<vmem>>, %arg5: memref<32x128xf32, #tpu.memory_space<vmem>>, %arg6: memref<32x128xf32, #tpu.memory_space<vmem>>, %arg7: memref<1x128xf32, #tpu.memory_space<vmem>>, %arg8: memref<64x128xf32, #tpu.memory_space<vmem>>, %arg9: memref<1x128xf32, #tpu.memory_space<vmem>>, %arg10: memref<128x128xf32, #tpu.memory_space<vmem>>, %arg11: memref<1x128xf32, #tpu.memory_space<vmem>>, %arg12: memref<8x128xf32, #tpu.memory_space<vmem>>, %arg13: memref<64x32xf32, #tpu.memory_space<vmem>>) attributes {dimension_semantics = [#tpu.dimension_semantics<parallel>], iteration_bounds = array<i64: 1>, scalar_prefetch = 0 : i64, scratch_operands = 1 : i64, tpu.core_type = #tpu.core_type<tc>, window_params = [{transform_indices = @transform_0, window_bounds = array<i64: 8, 8, 32>}, {pipeline_mode = #tpu.pipeline_mode<synchronous>, transform_indices = @transform_1, window_bounds = array<i64: 32, 128>}, {pipeline_mode = #tpu.pipeline_mode<synchronous>, transform_indices = @transform_2, window_bounds = array<i64: 32, 128>}, {pipeline_mode = #tpu.pipeline_mode<synchronous>, transform_indices = @transform_3, window_bounds = array<i64: 1, 128>}, {pipeline_mode = #tpu.pipeline_mode<synchronous>, transform_indices = @transform_4, window_bounds = array<i64: 32, 128>}, {pipeline_mode = #tpu.pipeline_mode<synchronous>, transform_indices = @transform_5, window_bounds = array<i64: 32, 128>}, {pipeline_mode = #tpu.pipeline_mode<synchronous>, transform_indices = @transform_6, window_bounds = array<i64: 1, 128>}, {pipeline_mode = #tpu.pipeline_mode<synchronous>, transform_indices = @transform_7, window_bounds = array<i64: 64, 128>}, {pipeline_mode = #tpu.pipeline_mode<synchronous>, transform_indices = @transform_8, window_bounds = array<i64: 1, 128>}, {pipeline_mode = #tpu.pipeline_mode<synchronous>, transform_indices = @transform_9, window_bounds = array<i64: 128, 128>}, {pipeline_mode = #tpu.pipeline_mode<synchronous>, transform_indices = @transform_10, window_bounds = array<i64: 1, 128>}, {transform_indices = @transform_11, window_bounds = array<i64: 8, 128>}]} {
    %c0 = arith.constant 0 : index
    %c0_0 = arith.constant 0 : index
    %c0_1 = arith.constant 0 : index
    %0 = vector.load %arg1[%c0, %c0_0, %c0_1] : memref<8x8x32xf32, #tpu.memory_space<vmem>>, vector<8x8x32xf32>
    %1 = vector.shape_cast %0 : vector<8x8x32xf32> to vector<64x32xf32>
    %c0_2 = arith.constant 0 : index
    %c0_3 = arith.constant 0 : index
    %2 = vector.load %arg2[%c0_2, %c0_3] : memref<32x128xf32, #tpu.memory_space<vmem>>, vector<32x128xf32>
    %cst = arith.constant dense<0.000000e+00> : vector<64x128xf32>
    %3 = tpu.matmul %1, %2, %cst {dimension_numbers = #tpu.dot_dimension_numbers<[1], [0], [0], [1], [0, 0, 1, 1], [], []>} : vector<64x32xf32>, vector<32x128xf32>, vector<64x128xf32> -> vector<64x128xf32>
    %c0_4 = arith.constant 0 : index
    %c0_5 = arith.constant 0 : index
    %4 = vector.load %arg4[%c0_4, %c0_5] : memref<1x128xf32, #tpu.memory_space<vmem>>, vector<1x128xf32>
    %5 = vector.broadcast %4 : vector<1x128xf32> to vector<64x128xf32>
    %6 = arith.addf %3, %5 : vector<64x128xf32>
    %c0_6 = arith.constant 0 : index
    %c0_7 = arith.constant 0 : index
    %7 = vector.load %arg3[%c0_6, %c0_7] : memref<32x128xf32, #tpu.memory_space<vmem>>, vector<32x128xf32>
    %cst_8 = arith.constant 0.000000e+00 : f32
    %8 = vector.broadcast %cst_8 : f32 to vector<8x32xf32>
    %cst_9 = arith.constant 0.000000e+00 : f32
    %9 = vector.broadcast %cst_9 : f32 to vector<8x32xf32>
    %10 = vector.extract_strided_slice %6 {offsets = [0, 0], sizes = [8, 128], strides = [1, 1]} : vector<64x128xf32> to vector<8x128xf32>
    %cst_10 = arith.constant dense<0.000000e+00> : vector<8x128xf32>
    %11 = tpu.matmul %8, %7, %cst_10 {dimension_numbers = #tpu.dot_dimension_numbers<[1], [0], [0], [1], [0, 0, 1, 1], [], []>} : vector<8x32xf32>, vector<32x128xf32>, vector<8x128xf32> -> vector<8x128xf32>
    %12 = arith.addf %10, %11 : vector<8x128xf32>
    %13 = vector.extract_strided_slice %12 {offsets = [0, 0], sizes = [8, 96], strides = [1, 1]} : vector<8x128xf32> to vector<8x96xf32>
    %14 = arith.negf %13 : vector<8x96xf32>
    %15 = math.exp %14 : vector<8x96xf32>
    %cst_11 = arith.constant 1.000000e+00 : f32
    %16 = vector.broadcast %cst_11 : f32 to vector<8x96xf32>
    %17 = arith.addf %16, %15 : vector<8x96xf32>
    %18 = arith.divf %16, %17 : vector<8x96xf32>
    %19 = vector.extract_strided_slice %12 {offsets = [0, 96], sizes = [8, 32], strides = [1, 1]} : vector<8x128xf32> to vector<8x32xf32>
    %20 = math.tanh %19 : vector<8x32xf32>
    %21 = vector.extract_strided_slice %18 {offsets = [0, 0], sizes = [8, 32], strides = [1, 1]} : vector<8x96xf32> to vector<8x32xf32>
    %22 = vector.extract_strided_slice %18 {offsets = [0, 32], sizes = [8, 32], strides = [1, 1]} : vector<8x96xf32> to vector<8x32xf32>
    %23 = vector.extract_strided_slice %18 {offsets = [0, 64], sizes = [8, 32], strides = [1, 1]} : vector<8x96xf32> to vector<8x32xf32>
    %24 = arith.mulf %22, %9 : vector<8x32xf32>
    %25 = arith.mulf %21, %20 : vector<8x32xf32>
    %26 = arith.addf %24, %25 : vector<8x32xf32>
    %27 = math.tanh %26 : vector<8x32xf32>
    %28 = arith.mulf %23, %27 : vector<8x32xf32>
    %c0_12 = arith.constant 0 : index
    %c0_13 = arith.constant 0 : index
    %29 = vector.load %arg13[%c0_12, %c0_13] : memref<64x32xf32, #tpu.memory_space<vmem>>, vector<8x32xf32>
    tpu.vector_store %arg13[%c0_12, %c0_13], %28 {strides = array<i32>} : memref<64x32xf32, #tpu.memory_space<vmem>>, vector<8x32xf32>,
    %30 = vector.extract_strided_slice %6 {offsets = [8, 0], sizes = [8, 128], strides = [1, 1]} : vector<64x128xf32> to vector<8x128xf32>
    %cst_14 = arith.constant dense<0.000000e+00> : vector<8x128xf32>
    %31 = tpu.matmul %28, %7, %cst_14 {dimension_numbers = #tpu.dot_dimension_numbers<[1], [0], [0], [1], [0, 0, 1, 1], [], []>} : vector<8x32xf32>, vector<32x128xf32>, vector<8x128xf32> -> vector<8x128xf32>
    %32 = arith.addf %30, %31 : vector<8x128xf32>
    %33 = vector.extract_strided_slice %32 {offsets = [0, 0], sizes = [8, 96], strides = [1, 1]} : vector<8x128xf32> to vector<8x96xf32>
    %34 = arith.negf %33 : vector<8x96xf32>
    %35 = math.exp %34 : vector<8x96xf32>
    %cst_15 = arith.constant 1.000000e+00 : f32
    %36 = vector.broadcast %cst_15 : f32 to vector<8x96xf32>
    %37 = arith.addf %36, %35 : vector<8x96xf32>
    %38 = arith.divf %36, %37 : vector<8x96xf32>
    %39 = vector.extract_strided_slice %32 {offsets = [0, 96], sizes = [8, 32], strides = [1, 1]} : vector<8x128xf32> to vector<8x32xf32>
    %40 = math.tanh %39 : vector<8x32xf32>
    %41 = vector.extract_strided_slice %38 {offsets = [0, 0], sizes = [8, 32], strides = [1, 1]} : vector<8x96xf32> to vector<8x32xf32>
    %42 = vector.extract_strided_slice %38 {offsets = [0, 32], sizes = [8, 32], strides = [1, 1]} : vector<8x96xf32> to vector<8x32xf32>
    %43 = vector.extract_strided_slice %38 {offsets = [0, 64], sizes = [8, 32], strides = [1, 1]} : vector<8x96xf32> to vector<8x32xf32>
    %44 = arith.mulf %42, %26 : vector<8x32xf32>
    %45 = arith.mulf %41, %40 : vector<8x32xf32>
    %46 = arith.addf %44, %45 : vector<8x32xf32>
    %47 = math.tanh %46 : vector<8x32xf32>
    %48 = arith.mulf %43, %47 : vector<8x32xf32>
    %c8 = arith.constant 8 : index
    %c0_16 = arith.constant 0 : index
    %49 = vector.load %arg13[%c8, %c0_16] : memref<64x32xf32, #tpu.memory_space<vmem>>, vector<8x32xf32>
    tpu.vector_store %arg13[%c8, %c0_16], %48 {strides = array<i32>} : memref<64x32xf32, #tpu.memory_space<vmem>>, vector<8x32xf32>,
    %50 = vector.extract_strided_slice %6 {offsets = [16, 0], sizes = [8, 128], strides = [1, 1]} : vector<64x128xf32> to vector<8x128xf32>
    %cst_17 = arith.constant dense<0.000000e+00> : vector<8x128xf32>
    %51 = tpu.matmul %48, %7, %cst_17 {dimension_numbers = #tpu.dot_dimension_numbers<[1], [0], [0], [1], [0, 0, 1, 1], [], []>} : vector<8x32xf32>, vector<32x128xf32>, vector<8x128xf32> -> vector<8x128xf32>
    %52 = arith.addf %50, %51 : vector<8x128xf32>
    %53 = vector.extract_strided_slice %52 {offsets = [0, 0], sizes = [8, 96], strides = [1, 1]} : vector<8x128xf32> to vector<8x96xf32>
    %54 = arith.negf %53 : vector<8x96xf32>
    %55 = math.exp %54 : vector<8x96xf32>
    %cst_18 = arith.constant 1.000000e+00 : f32
    %56 = vector.broadcast %cst_18 : f32 to vector<8x96xf32>
    %57 = arith.addf %56, %55 : vector<8x96xf32>
    %58 = arith.divf %56, %57 : vector<8x96xf32>
    %59 = vector.extract_strided_slice %52 {offsets = [0, 96], sizes = [8, 32], strides = [1, 1]} : vector<8x128xf32> to vector<8x32xf32>
    %60 = math.tanh %59 : vector<8x32xf32>
    %61 = vector.extract_strided_slice %58 {offsets = [0, 0], sizes = [8, 32], strides = [1, 1]} : vector<8x96xf32> to vector<8x32xf32>
    %62 = vector.extract_strided_slice %58 {offsets = [0, 32], sizes = [8, 32], strides = [1, 1]} : vector<8x96xf32> to vector<8x32xf32>
    %63 = vector.extract_strided_slice %58 {offsets = [0, 64], sizes = [8, 32], strides = [1, 1]} : vector<8x96xf32> to vector<8x32xf32>
    %64 = arith.mulf %62, %46 : vector<8x32xf32>
    %65 = arith.mulf %61, %60 : vector<8x32xf32>
    %66 = arith.addf %64, %65 : vector<8x32xf32>
    %67 = math.tanh %66 : vector<8x32xf32>
    %68 = arith.mulf %63, %67 : vector<8x32xf32>
    %c16 = arith.constant 16 : index
    %c0_19 = arith.constant 0 : index
    %69 = vector.load %arg13[%c16, %c0_19] : memref<64x32xf32, #tpu.memory_space<vmem>>, vector<8x32xf32>
    tpu.vector_store %arg13[%c16, %c0_19], %68 {strides = array<i32>} : memref<64x32xf32, #tpu.memory_space<vmem>>, vector<8x32xf32>,
    %70 = vector.extract_strided_slice %6 {offsets = [24, 0], sizes = [8, 128], strides = [1, 1]} : vector<64x128xf32> to vector<8x128xf32>
    %cst_20 = arith.constant dense<0.000000e+00> : vector<8x128xf32>
    %71 = tpu.matmul %68, %7, %cst_20 {dimension_numbers = #tpu.dot_dimension_numbers<[1], [0], [0], [1], [0, 0, 1, 1], [], []>} : vector<8x32xf32>, vector<32x128xf32>, vector<8x128xf32> -> vector<8x128xf32>
    %72 = arith.addf %70, %71 : vector<8x128xf32>
    %73 = vector.extract_strided_slice %72 {offsets = [0, 0], sizes = [8, 96], strides = [1, 1]} : vector<8x128xf32> to vector<8x96xf32>
    %74 = arith.negf %73 : vector<8x96xf32>
    %75 = math.exp %74 : vector<8x96xf32>
    %cst_21 = arith.constant 1.000000e+00 : f32
    %76 = vector.broadcast %cst_21 : f32 to vector<8x96xf32>
    %77 = arith.addf %76, %75 : vector<8x96xf32>
    %78 = arith.divf %76, %77 : vector<8x96xf32>
    %79 = vector.extract_strided_slice %72 {offsets = [0, 96], sizes = [8, 32], strides = [1, 1]} : vector<8x128xf32> to vector<8x32xf32>
    %80 = math.tanh %79 : vector<8x32xf32>
    %81 = vector.extract_strided_slice %78 {offsets = [0, 0], sizes = [8, 32], strides = [1, 1]} : vector<8x96xf32> to vector<8x32xf32>
    %82 = vector.extract_strided_slice %78 {offsets = [0, 32], sizes = [8, 32], strides = [1, 1]} : vector<8x96xf32> to vector<8x32xf32>
    %83 = vector.extract_strided_slice %78 {offsets = [0, 64], sizes = [8, 32], strides = [1, 1]} : vector<8x96xf32> to vector<8x32xf32>
    %84 = arith.mulf %82, %66 : vector<8x32xf32>
    %85 = arith.mulf %81, %80 : vector<8x32xf32>
    %86 = arith.addf %84, %85 : vector<8x32xf32>
    %87 = math.tanh %86 : vector<8x32xf32>
    %88 = arith.mulf %83, %87 : vector<8x32xf32>
    %c24 = arith.constant 24 : index
    %c0_22 = arith.constant 0 : index
    %89 = vector.load %arg13[%c24, %c0_22] : memref<64x32xf32, #tpu.memory_space<vmem>>, vector<8x32xf32>
    tpu.vector_store %arg13[%c24, %c0_22], %88 {strides = array<i32>} : memref<64x32xf32, #tpu.memory_space<vmem>>, vector<8x32xf32>,
    %90 = vector.extract_strided_slice %6 {offsets = [32, 0], sizes = [8, 128], strides = [1, 1]} : vector<64x128xf32> to vector<8x128xf32>
    %cst_23 = arith.constant dense<0.000000e+00> : vector<8x128xf32>
    %91 = tpu.matmul %88, %7, %cst_23 {dimension_numbers = #tpu.dot_dimension_numbers<[1], [0], [0], [1], [0, 0, 1, 1], [], []>} : vector<8x32xf32>, vector<32x128xf32>, vector<8x128xf32> -> vector<8x128xf32>
    %92 = arith.addf %90, %91 : vector<8x128xf32>
    %93 = vector.extract_strided_slice %92 {offsets = [0, 0], sizes = [8, 96], strides = [1, 1]} : vector<8x128xf32> to vector<8x96xf32>
    %94 = arith.negf %93 : vector<8x96xf32>
    %95 = math.exp %94 : vector<8x96xf32>
    %cst_24 = arith.constant 1.000000e+00 : f32
    %96 = vector.broadcast %cst_24 : f32 to vector<8x96xf32>
    %97 = arith.addf %96, %95 : vector<8x96xf32>
    %98 = arith.divf %96, %97 : vector<8x96xf32>
    %99 = vector.extract_strided_slice %92 {offsets = [0, 96], sizes = [8, 32], strides = [1, 1]} : vector<8x128xf32> to vector<8x32xf32>
    %100 = math.tanh %99 : vector<8x32xf32>
    %101 = vector.extract_strided_slice %98 {offsets = [0, 0], sizes = [8, 32], strides = [1, 1]} : vector<8x96xf32> to vector<8x32xf32>
    %102 = vector.extract_strided_slice %98 {offsets = [0, 32], sizes = [8, 32], strides = [1, 1]} : vector<8x96xf32> to vector<8x32xf32>
    %103 = vector.extract_strided_slice %98 {offsets = [0, 64], sizes = [8, 32], strides = [1, 1]} : vector<8x96xf32> to vector<8x32xf32>
    %104 = arith.mulf %102, %86 : vector<8x32xf32>
    %105 = arith.mulf %101, %100 : vector<8x32xf32>
    %106 = arith.addf %104, %105 : vector<8x32xf32>
    %107 = math.tanh %106 : vector<8x32xf32>
    %108 = arith.mulf %103, %107 : vector<8x32xf32>
    %c32 = arith.constant 32 : index
    %c0_25 = arith.constant 0 : index
    %109 = vector.load %arg13[%c32, %c0_25] : memref<64x32xf32, #tpu.memory_space<vmem>>, vector<8x32xf32>
    tpu.vector_store %arg13[%c32, %c0_25], %108 {strides = array<i32>} : memref<64x32xf32, #tpu.memory_space<vmem>>, vector<8x32xf32>,
    %110 = vector.extract_strided_slice %6 {offsets = [40, 0], sizes = [8, 128], strides = [1, 1]} : vector<64x128xf32> to vector<8x128xf32>
    %cst_26 = arith.constant dense<0.000000e+00> : vector<8x128xf32>
    %111 = tpu.matmul %108, %7, %cst_26 {dimension_numbers = #tpu.dot_dimension_numbers<[1], [0], [0], [1], [0, 0, 1, 1], [], []>} : vector<8x32xf32>, vector<32x128xf32>, vector<8x128xf32> -> vector<8x128xf32>
    %112 = arith.addf %110, %111 : vector<8x128xf32>
    %113 = vector.extract_strided_slice %112 {offsets = [0, 0], sizes = [8, 96], strides = [1, 1]} : vector<8x128xf32> to vector<8x96xf32>
    %114 = arith.negf %113 : vector<8x96xf32>
    %115 = math.exp %114 : vector<8x96xf32>
    %cst_27 = arith.constant 1.000000e+00 : f32
    %116 = vector.broadcast %cst_27 : f32 to vector<8x96xf32>
    %117 = arith.addf %116, %115 : vector<8x96xf32>
    %118 = arith.divf %116, %117 : vector<8x96xf32>
    %119 = vector.extract_strided_slice %112 {offsets = [0, 96], sizes = [8, 32], strides = [1, 1]} : vector<8x128xf32> to vector<8x32xf32>
    %120 = math.tanh %119 : vector<8x32xf32>
    %121 = vector.extract_strided_slice %118 {offsets = [0, 0], sizes = [8, 32], strides = [1, 1]} : vector<8x96xf32> to vector<8x32xf32>
    %122 = vector.extract_strided_slice %118 {offsets = [0, 32], sizes = [8, 32], strides = [1, 1]} : vector<8x96xf32> to vector<8x32xf32>
    %123 = vector.extract_strided_slice %118 {offsets = [0, 64], sizes = [8, 32], strides = [1, 1]} : vector<8x96xf32> to vector<8x32xf32>
    %124 = arith.mulf %122, %106 : vector<8x32xf32>
    %125 = arith.mulf %121, %120 : vector<8x32xf32>
    %126 = arith.addf %124, %125 : vector<8x32xf32>
    %127 = math.tanh %126 : vector<8x32xf32>
    %128 = arith.mulf %123, %127 : vector<8x32xf32>
    %c40 = arith.constant 40 : index
    %c0_28 = arith.constant 0 : index
    %129 = vector.load %arg13[%c40, %c0_28] : memref<64x32xf32, #tpu.memory_space<vmem>>, vector<8x32xf32>
    tpu.vector_store %arg13[%c40, %c0_28], %128 {strides = array<i32>} : memref<64x32xf32, #tpu.memory_space<vmem>>, vector<8x32xf32>,
    %130 = vector.extract_strided_slice %6 {offsets = [48, 0], sizes = [8, 128], strides = [1, 1]} : vector<64x128xf32> to vector<8x128xf32>
    %cst_29 = arith.constant dense<0.000000e+00> : vector<8x128xf32>
    %131 = tpu.matmul %128, %7, %cst_29 {dimension_numbers = #tpu.dot_dimension_numbers<[1], [0], [0], [1], [0, 0, 1, 1], [], []>} : vector<8x32xf32>, vector<32x128xf32>, vector<8x128xf32> -> vector<8x128xf32>
    %132 = arith.addf %130, %131 : vector<8x128xf32>
    %133 = vector.extract_strided_slice %132 {offsets = [0, 0], sizes = [8, 96], strides = [1, 1]} : vector<8x128xf32> to vector<8x96xf32>
    %134 = arith.negf %133 : vector<8x96xf32>
    %135 = math.exp %134 : vector<8x96xf32>
    %cst_30 = arith.constant 1.000000e+00 : f32
    %136 = vector.broadcast %cst_30 : f32 to vector<8x96xf32>
    %137 = arith.addf %136, %135 : vector<8x96xf32>
    %138 = arith.divf %136, %137 : vector<8x96xf32>
    %139 = vector.extract_strided_slice %132 {offsets = [0, 96], sizes = [8, 32], strides = [1, 1]} : vector<8x128xf32> to vector<8x32xf32>
    %140 = math.tanh %139 : vector<8x32xf32>
    %141 = vector.extract_strided_slice %138 {offsets = [0, 0], sizes = [8, 32], strides = [1, 1]} : vector<8x96xf32> to vector<8x32xf32>
    %142 = vector.extract_strided_slice %138 {offsets = [0, 32], sizes = [8, 32], strides = [1, 1]} : vector<8x96xf32> to vector<8x32xf32>
    %143 = vector.extract_strided_slice %138 {offsets = [0, 64], sizes = [8, 32], strides = [1, 1]} : vector<8x96xf32> to vector<8x32xf32>
    %144 = arith.mulf %142, %126 : vector<8x32xf32>
    %145 = arith.mulf %141, %140 : vector<8x32xf32>
    %146 = arith.addf %144, %145 : vector<8x32xf32>
    %147 = math.tanh %146 : vector<8x32xf32>
    %148 = arith.mulf %143, %147 : vector<8x32xf32>
    %c48 = arith.constant 48 : index
    %c0_31 = arith.constant 0 : index
    %149 = vector.load %arg13[%c48, %c0_31] : memref<64x32xf32, #tpu.memory_space<vmem>>, vector<8x32xf32>
    tpu.vector_store %arg13[%c48, %c0_31], %148 {strides = array<i32>} : memref<64x32xf32, #tpu.memory_space<vmem>>, vector<8x32xf32>,
    %150 = vector.extract_strided_slice %6 {offsets = [56, 0], sizes = [8, 128], strides = [1, 1]} : vector<64x128xf32> to vector<8x128xf32>
    %cst_32 = arith.constant dense<0.000000e+00> : vector<8x128xf32>
    %151 = tpu.matmul %148, %7, %cst_32 {dimension_numbers = #tpu.dot_dimension_numbers<[1], [0], [0], [1], [0, 0, 1, 1], [], []>} : vector<8x32xf32>, vector<32x128xf32>, vector<8x128xf32> -> vector<8x128xf32>
    %152 = arith.addf %150, %151 : vector<8x128xf32>
    %153 = vector.extract_strided_slice %152 {offsets = [0, 0], sizes = [8, 96], strides = [1, 1]} : vector<8x128xf32> to vector<8x96xf32>
    %154 = arith.negf %153 : vector<8x96xf32>
    %155 = math.exp %154 : vector<8x96xf32>
    %cst_33 = arith.constant 1.000000e+00 : f32
    %156 = vector.broadcast %cst_33 : f32 to vector<8x96xf32>
    %157 = arith.addf %156, %155 : vector<8x96xf32>
    %158 = arith.divf %156, %157 : vector<8x96xf32>
    %159 = vector.extract_strided_slice %152 {offsets = [0, 96], sizes = [8, 32], strides = [1, 1]} : vector<8x128xf32> to vector<8x32xf32>
    %160 = math.tanh %159 : vector<8x32xf32>
    %161 = vector.extract_strided_slice %158 {offsets = [0, 0], sizes = [8, 32], strides = [1, 1]} : vector<8x96xf32> to vector<8x32xf32>
    %162 = vector.extract_strided_slice %158 {offsets = [0, 32], sizes = [8, 32], strides = [1, 1]} : vector<8x96xf32> to vector<8x32xf32>
    %163 = vector.extract_strided_slice %158 {offsets = [0, 64], sizes = [8, 32], strides = [1, 1]} : vector<8x96xf32> to vector<8x32xf32>
    %164 = arith.mulf %162, %146 : vector<8x32xf32>
    %165 = arith.mulf %161, %160 : vector<8x32xf32>
    %166 = arith.addf %164, %165 : vector<8x32xf32>
    %167 = math.tanh %166 : vector<8x32xf32>
    %168 = arith.mulf %163, %167 : vector<8x32xf32>
    %c56 = arith.constant 56 : index
    %c0_34 = arith.constant 0 : index
    %169 = vector.load %arg13[%c56, %c0_34] : memref<64x32xf32, #tpu.memory_space<vmem>>, vector<8x32xf32>
    tpu.vector_store %arg13[%c56, %c0_34], %168 {strides = array<i32>} : memref<64x32xf32, #tpu.memory_space<vmem>>, vector<8x32xf32>,
    %c0_35 = arith.constant 0 : index
    %c0_36 = arith.constant 0 : index
    %170 = vector.load %arg13[%c0_35, %c0_36] : memref<64x32xf32, #tpu.memory_space<vmem>>, vector<64x32xf32>
    %c0_37 = arith.constant 0 : index
    %c0_38 = arith.constant 0 : index
    %171 = vector.load %arg5[%c0_37, %c0_38] : memref<32x128xf32, #tpu.memory_space<vmem>>, vector<32x128xf32>
    %cst_39 = arith.constant dense<0.000000e+00> : vector<64x128xf32>
    %172 = tpu.matmul %170, %171, %cst_39 {dimension_numbers = #tpu.dot_dimension_numbers<[1], [0], [0], [1], [0, 0, 1, 1], [], []>} : vector<64x32xf32>, vector<32x128xf32>, vector<64x128xf32> -> vector<64x128xf32>
    %c0_40 = arith.constant 0 : index
    %c0_41 = arith.constant 0 : index
    %173 = vector.load %arg7[%c0_40, %c0_41] : memref<1x128xf32, #tpu.memory_space<vmem>>, vector<1x128xf32>
    %174 = vector.broadcast %173 : vector<1x128xf32> to vector<64x128xf32>
    %175 = arith.addf %172, %174 : vector<64x128xf32>
    %c0_42 = arith.constant 0 : index
    %c0_43 = arith.constant 0 : index
    %176 = vector.load %arg6[%c0_42, %c0_43] : memref<32x128xf32, #tpu.memory_space<vmem>>, vector<32x128xf32>
    %cst_44 = arith.constant 0.000000e+00 : f32
    %177 = vector.broadcast %cst_44 : f32 to vector<8x32xf32>
    %cst_45 = arith.constant 0.000000e+00 : f32
    %178 = vector.broadcast %cst_45 : f32 to vector<8x32xf32>
    %179 = vector.extract_strided_slice %175 {offsets = [0, 0], sizes = [8, 128], strides = [1, 1]} : vector<64x128xf32> to vector<8x128xf32>
    %cst_46 = arith.constant dense<0.000000e+00> : vector<8x128xf32>
    %180 = tpu.matmul %177, %176, %cst_46 {dimension_numbers = #tpu.dot_dimension_numbers<[1], [0], [0], [1], [0, 0, 1, 1], [], []>} : vector<8x32xf32>, vector<32x128xf32>, vector<8x128xf32> -> vector<8x128xf32>
    %181 = arith.addf %179, %180 : vector<8x128xf32>
    %182 = vector.extract_strided_slice %181 {offsets = [0, 0], sizes = [8, 96], strides = [1, 1]} : vector<8x128xf32> to vector<8x96xf32>
    %183 = arith.negf %182 : vector<8x96xf32>
    %184 = math.exp %183 : vector<8x96xf32>
    %cst_47 = arith.constant 1.000000e+00 : f32
    %185 = vector.broadcast %cst_47 : f32 to vector<8x96xf32>
    %186 = arith.addf %185, %184 : vector<8x96xf32>
    %187 = arith.divf %185, %186 : vector<8x96xf32>
    %188 = vector.extract_strided_slice %181 {offsets = [0, 96], sizes = [8, 32], strides = [1, 1]} : vector<8x128xf32> to vector<8x32xf32>
    %189 = math.tanh %188 : vector<8x32xf32>
    %190 = vector.extract_strided_slice %187 {offsets = [0, 0], sizes = [8, 32], strides = [1, 1]} : vector<8x96xf32> to vector<8x32xf32>
    %191 = vector.extract_strided_slice %187 {offsets = [0, 32], sizes = [8, 32], strides = [1, 1]} : vector<8x96xf32> to vector<8x32xf32>
    %192 = vector.extract_strided_slice %187 {offsets = [0, 64], sizes = [8, 32], strides = [1, 1]} : vector<8x96xf32> to vector<8x32xf32>
    %193 = arith.mulf %191, %178 : vector<8x32xf32>
    %194 = arith.mulf %190, %189 : vector<8x32xf32>
    %195 = arith.addf %193, %194 : vector<8x32xf32>
    %196 = math.tanh %195 : vector<8x32xf32>
    %197 = arith.mulf %192, %196 : vector<8x32xf32>
    %198 = vector.extract_strided_slice %175 {offsets = [8, 0], sizes = [8, 128], strides = [1, 1]} : vector<64x128xf32> to vector<8x128xf32>
    %cst_48 = arith.constant dense<0.000000e+00> : vector<8x128xf32>
    %199 = tpu.matmul %197, %176, %cst_48 {dimension_numbers = #tpu.dot_dimension_numbers<[1], [0], [0], [1], [0, 0, 1, 1], [], []>} : vector<8x32xf32>, vector<32x128xf32>, vector<8x128xf32> -> vector<8x128xf32>
    %200 = arith.addf %198, %199 : vector<8x128xf32>
    %201 = vector.extract_strided_slice %200 {offsets = [0, 0], sizes = [8, 96], strides = [1, 1]} : vector<8x128xf32> to vector<8x96xf32>
    %202 = arith.negf %201 : vector<8x96xf32>
    %203 = math.exp %202 : vector<8x96xf32>
    %cst_49 = arith.constant 1.000000e+00 : f32
    %204 = vector.broadcast %cst_49 : f32 to vector<8x96xf32>
    %205 = arith.addf %204, %203 : vector<8x96xf32>
    %206 = arith.divf %204, %205 : vector<8x96xf32>
    %207 = vector.extract_strided_slice %200 {offsets = [0, 96], sizes = [8, 32], strides = [1, 1]} : vector<8x128xf32> to vector<8x32xf32>
    %208 = math.tanh %207 : vector<8x32xf32>
    %209 = vector.extract_strided_slice %206 {offsets = [0, 0], sizes = [8, 32], strides = [1, 1]} : vector<8x96xf32> to vector<8x32xf32>
    %210 = vector.extract_strided_slice %206 {offsets = [0, 32], sizes = [8, 32], strides = [1, 1]} : vector<8x96xf32> to vector<8x32xf32>
    %211 = vector.extract_strided_slice %206 {offsets = [0, 64], sizes = [8, 32], strides = [1, 1]} : vector<8x96xf32> to vector<8x32xf32>
    %212 = arith.mulf %210, %195 : vector<8x32xf32>
    %213 = arith.mulf %209, %208 : vector<8x32xf32>
    %214 = arith.addf %212, %213 : vector<8x32xf32>
    %215 = math.tanh %214 : vector<8x32xf32>
    %216 = arith.mulf %211, %215 : vector<8x32xf32>
    %217 = vector.extract_strided_slice %175 {offsets = [16, 0], sizes = [8, 128], strides = [1, 1]} : vector<64x128xf32> to vector<8x128xf32>
    %cst_50 = arith.constant dense<0.000000e+00> : vector<8x128xf32>
    %218 = tpu.matmul %216, %176, %cst_50 {dimension_numbers = #tpu.dot_dimension_numbers<[1], [0], [0], [1], [0, 0, 1, 1], [], []>} : vector<8x32xf32>, vector<32x128xf32>, vector<8x128xf32> -> vector<8x128xf32>
    %219 = arith.addf %217, %218 : vector<8x128xf32>
    %220 = vector.extract_strided_slice %219 {offsets = [0, 0], sizes = [8, 96], strides = [1, 1]} : vector<8x128xf32> to vector<8x96xf32>
    %221 = arith.negf %220 : vector<8x96xf32>
    %222 = math.exp %221 : vector<8x96xf32>
    %cst_51 = arith.constant 1.000000e+00 : f32
    %223 = vector.broadcast %cst_51 : f32 to vector<8x96xf32>
    %224 = arith.addf %223, %222 : vector<8x96xf32>
    %225 = arith.divf %223, %224 : vector<8x96xf32>
    %226 = vector.extract_strided_slice %219 {offsets = [0, 96], sizes = [8, 32], strides = [1, 1]} : vector<8x128xf32> to vector<8x32xf32>
    %227 = math.tanh %226 : vector<8x32xf32>
    %228 = vector.extract_strided_slice %225 {offsets = [0, 0], sizes = [8, 32], strides = [1, 1]} : vector<8x96xf32> to vector<8x32xf32>
    %229 = vector.extract_strided_slice %225 {offsets = [0, 32], sizes = [8, 32], strides = [1, 1]} : vector<8x96xf32> to vector<8x32xf32>
    %230 = vector.extract_strided_slice %225 {offsets = [0, 64], sizes = [8, 32], strides = [1, 1]} : vector<8x96xf32> to vector<8x32xf32>
    %231 = arith.mulf %229, %214 : vector<8x32xf32>
    %232 = arith.mulf %228, %227 : vector<8x32xf32>
    %233 = arith.addf %231, %232 : vector<8x32xf32>
    %234 = math.tanh %233 : vector<8x32xf32>
    %235 = arith.mulf %230, %234 : vector<8x32xf32>
    %236 = vector.extract_strided_slice %175 {offsets = [24, 0], sizes = [8, 128], strides = [1, 1]} : vector<64x128xf32> to vector<8x128xf32>
    %cst_52 = arith.constant dense<0.000000e+00> : vector<8x128xf32>
    %237 = tpu.matmul %235, %176, %cst_52 {dimension_numbers = #tpu.dot_dimension_numbers<[1], [0], [0], [1], [0, 0, 1, 1], [], []>} : vector<8x32xf32>, vector<32x128xf32>, vector<8x128xf32> -> vector<8x128xf32>
    %238 = arith.addf %236, %237 : vector<8x128xf32>
    %239 = vector.extract_strided_slice %238 {offsets = [0, 0], sizes = [8, 96], strides = [1, 1]} : vector<8x128xf32> to vector<8x96xf32>
    %240 = arith.negf %239 : vector<8x96xf32>
    %241 = math.exp %240 : vector<8x96xf32>
    %cst_53 = arith.constant 1.000000e+00 : f32
    %242 = vector.broadcast %cst_53 : f32 to vector<8x96xf32>
    %243 = arith.addf %242, %241 : vector<8x96xf32>
    %244 = arith.divf %242, %243 : vector<8x96xf32>
    %245 = vector.extract_strided_slice %238 {offsets = [0, 96], sizes = [8, 32], strides = [1, 1]} : vector<8x128xf32> to vector<8x32xf32>
    %246 = math.tanh %245 : vector<8x32xf32>
    %247 = vector.extract_strided_slice %244 {offsets = [0, 0], sizes = [8, 32], strides = [1, 1]} : vector<8x96xf32> to vector<8x32xf32>
    %248 = vector.extract_strided_slice %244 {offsets = [0, 32], sizes = [8, 32], strides = [1, 1]} : vector<8x96xf32> to vector<8x32xf32>
    %249 = vector.extract_strided_slice %244 {offsets = [0, 64], sizes = [8, 32], strides = [1, 1]} : vector<8x96xf32> to vector<8x32xf32>
    %250 = arith.mulf %248, %233 : vector<8x32xf32>
    %251 = arith.mulf %247, %246 : vector<8x32xf32>
    %252 = arith.addf %250, %251 : vector<8x32xf32>
    %253 = math.tanh %252 : vector<8x32xf32>
    %254 = arith.mulf %249, %253 : vector<8x32xf32>
    %255 = vector.extract_strided_slice %175 {offsets = [32, 0], sizes = [8, 128], strides = [1, 1]} : vector<64x128xf32> to vector<8x128xf32>
    %cst_54 = arith.constant dense<0.000000e+00> : vector<8x128xf32>
    %256 = tpu.matmul %254, %176, %cst_54 {dimension_numbers = #tpu.dot_dimension_numbers<[1], [0], [0], [1], [0, 0, 1, 1], [], []>} : vector<8x32xf32>, vector<32x128xf32>, vector<8x128xf32> -> vector<8x128xf32>
    %257 = arith.addf %255, %256 : vector<8x128xf32>
    %258 = vector.extract_strided_slice %257 {offsets = [0, 0], sizes = [8, 96], strides = [1, 1]} : vector<8x128xf32> to vector<8x96xf32>
    %259 = arith.negf %258 : vector<8x96xf32>
    %260 = math.exp %259 : vector<8x96xf32>
    %cst_55 = arith.constant 1.000000e+00 : f32
    %261 = vector.broadcast %cst_55 : f32 to vector<8x96xf32>
    %262 = arith.addf %261, %260 : vector<8x96xf32>
    %263 = arith.divf %261, %262 : vector<8x96xf32>
    %264 = vector.extract_strided_slice %257 {offsets = [0, 96], sizes = [8, 32], strides = [1, 1]} : vector<8x128xf32> to vector<8x32xf32>
    %265 = math.tanh %264 : vector<8x32xf32>
    %266 = vector.extract_strided_slice %263 {offsets = [0, 0], sizes = [8, 32], strides = [1, 1]} : vector<8x96xf32> to vector<8x32xf32>
    %267 = vector.extract_strided_slice %263 {offsets = [0, 32], sizes = [8, 32], strides = [1, 1]} : vector<8x96xf32> to vector<8x32xf32>
    %268 = vector.extract_strided_slice %263 {offsets = [0, 64], sizes = [8, 32], strides = [1, 1]} : vector<8x96xf32> to vector<8x32xf32>
    %269 = arith.mulf %267, %252 : vector<8x32xf32>
    %270 = arith.mulf %266, %265 : vector<8x32xf32>
    %271 = arith.addf %269, %270 : vector<8x32xf32>
    %272 = math.tanh %271 : vector<8x32xf32>
    %273 = arith.mulf %268, %272 : vector<8x32xf32>
    %274 = vector.extract_strided_slice %175 {offsets = [40, 0], sizes = [8, 128], strides = [1, 1]} : vector<64x128xf32> to vector<8x128xf32>
    %cst_56 = arith.constant dense<0.000000e+00> : vector<8x128xf32>
    %275 = tpu.matmul %273, %176, %cst_56 {dimension_numbers = #tpu.dot_dimension_numbers<[1], [0], [0], [1], [0, 0, 1, 1], [], []>} : vector<8x32xf32>, vector<32x128xf32>, vector<8x128xf32> -> vector<8x128xf32>
    %276 = arith.addf %274, %275 : vector<8x128xf32>
    %277 = vector.extract_strided_slice %276 {offsets = [0, 0], sizes = [8, 96], strides = [1, 1]} : vector<8x128xf32> to vector<8x96xf32>
    %278 = arith.negf %277 : vector<8x96xf32>
    %279 = math.exp %278 : vector<8x96xf32>
    %cst_57 = arith.constant 1.000000e+00 : f32
    %280 = vector.broadcast %cst_57 : f32 to vector<8x96xf32>
    %281 = arith.addf %280, %279 : vector<8x96xf32>
    %282 = arith.divf %280, %281 : vector<8x96xf32>
    %283 = vector.extract_strided_slice %276 {offsets = [0, 96], sizes = [8, 32], strides = [1, 1]} : vector<8x128xf32> to vector<8x32xf32>
    %284 = math.tanh %283 : vector<8x32xf32>
    %285 = vector.extract_strided_slice %282 {offsets = [0, 0], sizes = [8, 32], strides = [1, 1]} : vector<8x96xf32> to vector<8x32xf32>
    %286 = vector.extract_strided_slice %282 {offsets = [0, 32], sizes = [8, 32], strides = [1, 1]} : vector<8x96xf32> to vector<8x32xf32>
    %287 = vector.extract_strided_slice %282 {offsets = [0, 64], sizes = [8, 32], strides = [1, 1]} : vector<8x96xf32> to vector<8x32xf32>
    %288 = arith.mulf %286, %271 : vector<8x32xf32>
    %289 = arith.mulf %285, %284 : vector<8x32xf32>
    %290 = arith.addf %288, %289 : vector<8x32xf32>
    %291 = math.tanh %290 : vector<8x32xf32>
    %292 = arith.mulf %287, %291 : vector<8x32xf32>
    %293 = vector.extract_strided_slice %175 {offsets = [48, 0], sizes = [8, 128], strides = [1, 1]} : vector<64x128xf32> to vector<8x128xf32>
    %cst_58 = arith.constant dense<0.000000e+00> : vector<8x128xf32>
    %294 = tpu.matmul %292, %176, %cst_58 {dimension_numbers = #tpu.dot_dimension_numbers<[1], [0], [0], [1], [0, 0, 1, 1], [], []>} : vector<8x32xf32>, vector<32x128xf32>, vector<8x128xf32> -> vector<8x128xf32>
    %295 = arith.addf %293, %294 : vector<8x128xf32>
    %296 = vector.extract_strided_slice %295 {offsets = [0, 0], sizes = [8, 96], strides = [1, 1]} : vector<8x128xf32> to vector<8x96xf32>
    %297 = arith.negf %296 : vector<8x96xf32>
    %298 = math.exp %297 : vector<8x96xf32>
    %cst_59 = arith.constant 1.000000e+00 : f32
    %299 = vector.broadcast %cst_59 : f32 to vector<8x96xf32>
    %300 = arith.addf %299, %298 : vector<8x96xf32>
    %301 = arith.divf %299, %300 : vector<8x96xf32>
    %302 = vector.extract_strided_slice %295 {offsets = [0, 96], sizes = [8, 32], strides = [1, 1]} : vector<8x128xf32> to vector<8x32xf32>
    %303 = math.tanh %302 : vector<8x32xf32>
    %304 = vector.extract_strided_slice %301 {offsets = [0, 0], sizes = [8, 32], strides = [1, 1]} : vector<8x96xf32> to vector<8x32xf32>
    %305 = vector.extract_strided_slice %301 {offsets = [0, 32], sizes = [8, 32], strides = [1, 1]} : vector<8x96xf32> to vector<8x32xf32>
    %306 = vector.extract_strided_slice %301 {offsets = [0, 64], sizes = [8, 32], strides = [1, 1]} : vector<8x96xf32> to vector<8x32xf32>
    %307 = arith.mulf %305, %290 : vector<8x32xf32>
    %308 = arith.mulf %304, %303 : vector<8x32xf32>
    %309 = arith.addf %307, %308 : vector<8x32xf32>
    %310 = math.tanh %309 : vector<8x32xf32>
    %311 = arith.mulf %306, %310 : vector<8x32xf32>
    %312 = vector.extract_strided_slice %175 {offsets = [56, 0], sizes = [8, 128], strides = [1, 1]} : vector<64x128xf32> to vector<8x128xf32>
    %cst_60 = arith.constant dense<0.000000e+00> : vector<8x128xf32>
    %313 = tpu.matmul %311, %176, %cst_60 {dimension_numbers = #tpu.dot_dimension_numbers<[1], [0], [0], [1], [0, 0, 1, 1], [], []>} : vector<8x32xf32>, vector<32x128xf32>, vector<8x128xf32> -> vector<8x128xf32>
    %314 = arith.addf %312, %313 : vector<8x128xf32>
    %315 = vector.extract_strided_slice %314 {offsets = [0, 0], sizes = [8, 96], strides = [1, 1]} : vector<8x128xf32> to vector<8x96xf32>
    %316 = arith.negf %315 : vector<8x96xf32>
    %317 = math.exp %316 : vector<8x96xf32>
    %cst_61 = arith.constant 1.000000e+00 : f32
    %318 = vector.broadcast %cst_61 : f32 to vector<8x96xf32>
    %319 = arith.addf %318, %317 : vector<8x96xf32>
    %320 = arith.divf %318, %319 : vector<8x96xf32>
    %321 = vector.extract_strided_slice %314 {offsets = [0, 96], sizes = [8, 32], strides = [1, 1]} : vector<8x128xf32> to vector<8x32xf32>
    %322 = math.tanh %321 : vector<8x32xf32>
    %323 = vector.extract_strided_slice %320 {offsets = [0, 0], sizes = [8, 32], strides = [1, 1]} : vector<8x96xf32> to vector<8x32xf32>
    %324 = vector.extract_strided_slice %320 {offsets = [0, 32], sizes = [8, 32], strides = [1, 1]} : vector<8x96xf32> to vector<8x32xf32>
    %325 = vector.extract_strided_slice %320 {offsets = [0, 64], sizes = [8, 32], strides = [1, 1]} : vector<8x96xf32> to vector<8x32xf32>
    %326 = arith.mulf %324, %309 : vector<8x32xf32>
    %327 = arith.mulf %323, %322 : vector<8x32xf32>
    %328 = arith.addf %326, %327 : vector<8x32xf32>
    %329 = math.tanh %328 : vector<8x32xf32>
    %330 = arith.mulf %325, %329 : vector<8x32xf32>
    %331 = tpu.concatenate %168, %330 in 1 : vector<8x32xf32>, vector<8x32xf32> -> vector<8x64xf32>
    %cst_62 = arith.constant 0.000000e+00 : f32
    %332 = vector.broadcast %cst_62 : f32 to vector<8x64xf32>
    %333 = arith.maximumf %331, %332 : vector<8x64xf32>
    %c0_63 = arith.constant 0 : index
    %c0_64 = arith.constant 0 : index
    %334 = vector.load %arg8[%c0_63, %c0_64] : memref<64x128xf32, #tpu.memory_space<vmem>>, vector<64x128xf32>
    %cst_65 = arith.constant dense<0.000000e+00> : vector<8x128xf32>
    %335 = tpu.matmul %333, %334, %cst_65 {dimension_numbers = #tpu.dot_dimension_numbers<[1], [0], [0], [1], [0, 0, 1, 1], [], []>} : vector<8x64xf32>, vector<64x128xf32>, vector<8x128xf32> -> vector<8x128xf32>
    %c0_66 = arith.constant 0 : index
    %c0_67 = arith.constant 0 : index
    %336 = vector.load %arg9[%c0_66, %c0_67] : memref<1x128xf32, #tpu.memory_space<vmem>>, vector<1x128xf32>
    %337 = vector.broadcast %336 : vector<1x128xf32> to vector<8x128xf32>
    %338 = arith.addf %335, %337 : vector<8x128xf32>
    %cst_68 = arith.constant 0.000000e+00 : f32
    %339 = vector.broadcast %cst_68 : f32 to vector<8x128xf32>
    %340 = arith.maximumf %338, %339 : vector<8x128xf32>
    %c0_69 = arith.constant 0 : index
    %c0_70 = arith.constant 0 : index
    %341 = vector.load %arg10[%c0_69, %c0_70] : memref<128x128xf32, #tpu.memory_space<vmem>>, vector<128x128xf32>
    %cst_71 = arith.constant dense<0.000000e+00> : vector<8x128xf32>
    %342 = tpu.matmul %340, %341, %cst_71 {dimension_numbers = #tpu.dot_dimension_numbers<[1], [0], [0], [1], [0, 0, 1, 1], [], []>} : vector<8x128xf32>, vector<128x128xf32>, vector<8x128xf32> -> vector<8x128xf32>
    %c0_72 = arith.constant 0 : index
    %c0_73 = arith.constant 0 : index
    %343 = vector.load %arg11[%c0_72, %c0_73] : memref<1x128xf32, #tpu.memory_space<vmem>>, vector<1x128xf32>
    %344 = vector.broadcast %343 : vector<1x128xf32> to vector<8x128xf32>
    %345 = arith.addf %342, %344 : vector<8x128xf32>
    %c0_74 = arith.constant 0 : index
    %c0_75 = arith.constant 0 : index
    %346 = vector.load %arg12[%c0_74, %c0_75] : memref<8x128xf32, #tpu.memory_space<vmem>>, vector<8x128xf32>
    tpu.vector_store %arg12[%c0_74, %c0_75], %345 {strides = array<i32>} : memref<8x128xf32, #tpu.memory_space<vmem>>, vector<8x128xf32>,
    return
  }
  func.func @transform_0(%arg0: i32) -> (i32, i32, i32) {
    %c0_i32 = arith.constant 0 : i32
    %c0_i32_0 = arith.constant 0 : i32
    %c0_i32_1 = arith.constant 0 : i32
    return %c0_i32, %arg0, %c0_i32_0 : i32, i32, i32
  }
  func.func @transform_1(%arg0: i32) -> (i32, i32) {
    %c0_i32 = arith.constant 0 : i32
    %c0_i32_0 = arith.constant 0 : i32
    %c0_i32_1 = arith.constant 0 : i32
    return %c0_i32, %c0_i32_0 : i32, i32
  }
  func.func @transform_2(%arg0: i32) -> (i32, i32) {
    %c0_i32 = arith.constant 0 : i32
    %c0_i32_0 = arith.constant 0 : i32
    %c0_i32_1 = arith.constant 0 : i32
    return %c0_i32, %c0_i32_0 : i32, i32
  }
  func.func @transform_3(%arg0: i32) -> (i32, i32) {
    %c0_i32 = arith.constant 0 : i32
    %c0_i32_0 = arith.constant 0 : i32
    %c0_i32_1 = arith.constant 0 : i32
    return %c0_i32, %c0_i32_0 : i32, i32
  }
  func.func @transform_4(%arg0: i32) -> (i32, i32) {
    %c0_i32 = arith.constant 0 : i32
    %c0_i32_0 = arith.constant 0 : i32
    %c0_i32_1 = arith.constant 0 : i32
    return %c0_i32, %c0_i32_0 : i32, i32
  }
  func.func @transform_5(%arg0: i32) -> (i32, i32) {
    %c0_i32 = arith.constant 0 : i32
    %c0_i32_0 = arith.constant 0 : i32
    %c0_i32_1 = arith.constant 0 : i32
    return %c0_i32, %c0_i32_0 : i32, i32
  }
  func.func @transform_6(%arg0: i32) -> (i32, i32) {
    %c0_i32 = arith.constant 0 : i32
    %c0_i32_0 = arith.constant 0 : i32
    %c0_i32_1 = arith.constant 0 : i32
    return %c0_i32, %c0_i32_0 : i32, i32
  }
  func.func @transform_7(%arg0: i32) -> (i32, i32) {
    %c0_i32 = arith.constant 0 : i32
    %c0_i32_0 = arith.constant 0 : i32
    %c0_i32_1 = arith.constant 0 : i32
    return %c0_i32, %c0_i32_0 : i32, i32
  }
  func.func @transform_8(%arg0: i32) -> (i32, i32) {
    %c0_i32 = arith.constant 0 : i32
    %c0_i32_0 = arith.constant 0 : i32
    %c0_i32_1 = arith.constant 0 : i32
    return %c0_i32, %c0_i32_0 : i32, i32
  }
  func.func @transform_9(%arg0: i32) -> (i32, i32) {
    %c0_i32 = arith.constant 0 : i32
    %c0_i32_0 = arith.constant 0 : i32
    %c0_i32_1 = arith.constant 0 : i32
    return %c0_i32, %c0_i32_0 : i32, i32
  }
  func.func @transform_10(%arg0: i32) -> (i32, i32) {
    %c0_i32 = arith.constant 0 : i32
    %c0_i32_0 = arith.constant 0 : i32
    %c0_i32_1 = arith.constant 0 : i32
    return %c0_i32, %c0_i32_0 : i32, i32
  }
  func.func @transform_11(%arg0: i32) -> (i32, i32) {
    %c0_i32 = arith.constant 0 : i32
    %c0_i32_0 = arith.constant 0 : i32
    return %arg0, %c0_i32 : i32, i32
  }
}

module attributes {stable_mosaic.version = 11 : i64} {
  func.func @_lstm_kernel(%arg0: i32, %arg1: memref<8x8x32xf32, #tpu.memory_space<vmem>>, %arg2: memref<32x128xf32, #tpu.memory_space<vmem>>, %arg3: memref<32x128xf32, #tpu.memory_space<vmem>>, %arg4: memref<1x128xf32, #tpu.memory_space<vmem>>, %arg5: memref<32x128xf32, #tpu.memory_space<vmem>>, %arg6: memref<32x128xf32, #tpu.memory_space<vmem>>, %arg7: memref<1x128xf32, #tpu.memory_space<vmem>>, %arg8: memref<64x128xf32, #tpu.memory_space<vmem>>, %arg9: memref<1x128xf32, #tpu.memory_space<vmem>>, %arg10: memref<128x128xf32, #tpu.memory_space<vmem>>, %arg11: memref<1x128xf32, #tpu.memory_space<vmem>>, %arg12: memref<8x128xf32, #tpu.memory_space<vmem>>, %arg13: memref<64x32xf32, #tpu.memory_space<vmem>>) attributes {dimension_semantics = [#tpu.dimension_semantics<parallel>], iteration_bounds = array<i64: 1>, scalar_prefetch = 0 : i64, scratch_operands = 1 : i64, tpu.core_type = #tpu.core_type<tc>, window_params = [{transform_indices = @transform_0, window_bounds = array<i64: 8, 8, 32>}, {pipeline_mode = #tpu.pipeline_mode<synchronous>, transform_indices = @transform_1, window_bounds = array<i64: 32, 128>}, {pipeline_mode = #tpu.pipeline_mode<synchronous>, transform_indices = @transform_2, window_bounds = array<i64: 32, 128>}, {pipeline_mode = #tpu.pipeline_mode<synchronous>, transform_indices = @transform_3, window_bounds = array<i64: 1, 128>}, {pipeline_mode = #tpu.pipeline_mode<synchronous>, transform_indices = @transform_4, window_bounds = array<i64: 32, 128>}, {pipeline_mode = #tpu.pipeline_mode<synchronous>, transform_indices = @transform_5, window_bounds = array<i64: 32, 128>}, {pipeline_mode = #tpu.pipeline_mode<synchronous>, transform_indices = @transform_6, window_bounds = array<i64: 1, 128>}, {pipeline_mode = #tpu.pipeline_mode<synchronous>, transform_indices = @transform_7, window_bounds = array<i64: 64, 128>}, {pipeline_mode = #tpu.pipeline_mode<synchronous>, transform_indices = @transform_8, window_bounds = array<i64: 1, 128>}, {pipeline_mode = #tpu.pipeline_mode<synchronous>, transform_indices = @transform_9, window_bounds = array<i64: 128, 128>}, {pipeline_mode = #tpu.pipeline_mode<synchronous>, transform_indices = @transform_10, window_bounds = array<i64: 1, 128>}, {transform_indices = @transform_11, window_bounds = array<i64: 8, 128>}]} {
    %c0 = arith.constant 0 : index
    %c0_0 = arith.constant 0 : index
    %c0_1 = arith.constant 0 : index
    %0 = vector.load %arg1[%c0, %c0_0, %c0_1] : memref<8x8x32xf32, #tpu.memory_space<vmem>>, vector<8x8x32xf32>
    %1 = vector.shape_cast %0 : vector<8x8x32xf32> to vector<64x32xf32>
    %c0_2 = arith.constant 0 : index
    %c0_3 = arith.constant 0 : index
    %2 = vector.load %arg2[%c0_2, %c0_3] : memref<32x128xf32, #tpu.memory_space<vmem>>, vector<32x128xf32>
    %cst = arith.constant dense<0.000000e+00> : vector<64x128xf32>
    %3 = tpu.matmul %1, %2, %cst {dimension_numbers = #tpu.dot_dimension_numbers<[1], [0], [0], [1], [0, 0, 1, 1], [], []>} : vector<64x32xf32>, vector<32x128xf32>, vector<64x128xf32> -> vector<64x128xf32>
    %c0_4 = arith.constant 0 : index
    %c0_5 = arith.constant 0 : index
    %4 = vector.load %arg4[%c0_4, %c0_5] : memref<1x128xf32, #tpu.memory_space<vmem>>, vector<1x128xf32>
    %5 = vector.broadcast %4 : vector<1x128xf32> to vector<64x128xf32>
    %6 = arith.addf %3, %5 : vector<64x128xf32>
    %c0_6 = arith.constant 0 : index
    %c0_7 = arith.constant 0 : index
    %7 = vector.load %arg3[%c0_6, %c0_7] : memref<32x128xf32, #tpu.memory_space<vmem>>, vector<32x128xf32>
    %cst_8 = arith.constant 0.000000e+00 : f32
    %8 = vector.broadcast %cst_8 : f32 to vector<8x32xf32>
    %cst_9 = arith.constant 0.000000e+00 : f32
    %9 = vector.broadcast %cst_9 : f32 to vector<8x32xf32>
    %10 = vector.extract_strided_slice %6 {offsets = [0, 0], sizes = [8, 128], strides = [1, 1]} : vector<64x128xf32> to vector<8x128xf32>
    %cst_10 = arith.constant dense<0.000000e+00> : vector<8x128xf32>
    %11 = tpu.matmul %8, %7, %cst_10 {dimension_numbers = #tpu.dot_dimension_numbers<[1], [0], [0], [1], [0, 0, 1, 1], [], []>} : vector<8x32xf32>, vector<32x128xf32>, vector<8x128xf32> -> vector<8x128xf32>
    %12 = arith.addf %10, %11 : vector<8x128xf32>
    %13 = vector.extract_strided_slice %12 {offsets = [0, 0], sizes = [8, 96], strides = [1, 1]} : vector<8x128xf32> to vector<8x96xf32>
    %14 = arith.negf %13 : vector<8x96xf32>
    %15 = math.exp %14 : vector<8x96xf32>
    %cst_11 = arith.constant 1.000000e+00 : f32
    %16 = vector.broadcast %cst_11 : f32 to vector<8x96xf32>
    %17 = arith.addf %16, %15 : vector<8x96xf32>
    %18 = arith.divf %16, %17 : vector<8x96xf32>
    %19 = vector.extract_strided_slice %12 {offsets = [0, 96], sizes = [8, 32], strides = [1, 1]} : vector<8x128xf32> to vector<8x32xf32>
    %20 = math.tanh %19 : vector<8x32xf32>
    %21 = vector.extract_strided_slice %18 {offsets = [0, 0], sizes = [8, 32], strides = [1, 1]} : vector<8x96xf32> to vector<8x32xf32>
    %22 = vector.extract_strided_slice %18 {offsets = [0, 32], sizes = [8, 32], strides = [1, 1]} : vector<8x96xf32> to vector<8x32xf32>
    %23 = vector.extract_strided_slice %18 {offsets = [0, 64], sizes = [8, 32], strides = [1, 1]} : vector<8x96xf32> to vector<8x32xf32>
    %24 = arith.mulf %22, %9 : vector<8x32xf32>
    %25 = arith.mulf %21, %20 : vector<8x32xf32>
    %26 = arith.addf %24, %25 : vector<8x32xf32>
    %27 = math.tanh %26 : vector<8x32xf32>
    %28 = arith.mulf %23, %27 : vector<8x32xf32>
    %c0_12 = arith.constant 0 : index
    %c0_13 = arith.constant 0 : index
    %29 = vector.load %arg13[%c0_12, %c0_13] : memref<64x32xf32, #tpu.memory_space<vmem>>, vector<8x32xf32>
    tpu.vector_store %arg13[%c0_12, %c0_13], %28 {strides = array<i32>} : memref<64x32xf32, #tpu.memory_space<vmem>>, vector<8x32xf32>,
    %30 = vector.extract_strided_slice %6 {offsets = [8, 0], sizes = [8, 128], strides = [1, 1]} : vector<64x128xf32> to vector<8x128xf32>
    %cst_14 = arith.constant dense<0.000000e+00> : vector<8x128xf32>
    %31 = tpu.matmul %28, %7, %cst_14 {dimension_numbers = #tpu.dot_dimension_numbers<[1], [0], [0], [1], [0, 0, 1, 1], [], []>} : vector<8x32xf32>, vector<32x128xf32>, vector<8x128xf32> -> vector<8x128xf32>
    %32 = arith.addf %30, %31 : vector<8x128xf32>
    %33 = vector.extract_strided_slice %32 {offsets = [0, 0], sizes = [8, 96], strides = [1, 1]} : vector<8x128xf32> to vector<8x96xf32>
    %34 = arith.negf %33 : vector<8x96xf32>
    %35 = math.exp %34 : vector<8x96xf32>
    %cst_15 = arith.constant 1.000000e+00 : f32
    %36 = vector.broadcast %cst_15 : f32 to vector<8x96xf32>
    %37 = arith.addf %36, %35 : vector<8x96xf32>
    %38 = arith.divf %36, %37 : vector<8x96xf32>
    %39 = vector.extract_strided_slice %32 {offsets = [0, 96], sizes = [8, 32], strides = [1, 1]} : vector<8x128xf32> to vector<8x32xf32>
    %40 = math.tanh %39 : vector<8x32xf32>
    %41 = vector.extract_strided_slice %38 {offsets = [0, 0], sizes = [8, 32], strides = [1, 1]} : vector<8x96xf32> to vector<8x32xf32>
    %42 = vector.extract_strided_slice %38 {offsets = [0, 32], sizes = [8, 32], strides = [1, 1]} : vector<8x96xf32> to vector<8x32xf32>
    %43 = vector.extract_strided_slice %38 {offsets = [0, 64], sizes = [8, 32], strides = [1, 1]} : vector<8x96xf32> to vector<8x32xf32>
    %44 = arith.mulf %42, %26 : vector<8x32xf32>
    %45 = arith.mulf %41, %40 : vector<8x32xf32>
    %46 = arith.addf %44, %45 : vector<8x32xf32>
    %47 = math.tanh %46 : vector<8x32xf32>
    %48 = arith.mulf %43, %47 : vector<8x32xf32>
    %c8 = arith.constant 8 : index
    %c0_16 = arith.constant 0 : index
    %49 = vector.load %arg13[%c8, %c0_16] : memref<64x32xf32, #tpu.memory_space<vmem>>, vector<8x32xf32>
    tpu.vector_store %arg13[%c8, %c0_16], %48 {strides = array<i32>} : memref<64x32xf32, #tpu.memory_space<vmem>>, vector<8x32xf32>,
    %50 = vector.extract_strided_slice %6 {offsets = [16, 0], sizes = [8, 128], strides = [1, 1]} : vector<64x128xf32> to vector<8x128xf32>
    %cst_17 = arith.constant dense<0.000000e+00> : vector<8x128xf32>
    %51 = tpu.matmul %48, %7, %cst_17 {dimension_numbers = #tpu.dot_dimension_numbers<[1], [0], [0], [1], [0, 0, 1, 1], [], []>} : vector<8x32xf32>, vector<32x128xf32>, vector<8x128xf32> -> vector<8x128xf32>
    %52 = arith.addf %50, %51 : vector<8x128xf32>
    %53 = vector.extract_strided_slice %52 {offsets = [0, 0], sizes = [8, 96], strides = [1, 1]} : vector<8x128xf32> to vector<8x96xf32>
    %54 = arith.negf %53 : vector<8x96xf32>
    %55 = math.exp %54 : vector<8x96xf32>
    %cst_18 = arith.constant 1.000000e+00 : f32
    %56 = vector.broadcast %cst_18 : f32 to vector<8x96xf32>
    %57 = arith.addf %56, %55 : vector<8x96xf32>
    %58 = arith.divf %56, %57 : vector<8x96xf32>
    %59 = vector.extract_strided_slice %52 {offsets = [0, 96], sizes = [8, 32], strides = [1, 1]} : vector<8x128xf32> to vector<8x32xf32>
    %60 = math.tanh %59 : vector<8x32xf32>
    %61 = vector.extract_strided_slice %58 {offsets = [0, 0], sizes = [8, 32], strides = [1, 1]} : vector<8x96xf32> to vector<8x32xf32>
    %62 = vector.extract_strided_slice %58 {offsets = [0, 32], sizes = [8, 32], strides = [1, 1]} : vector<8x96xf32> to vector<8x32xf32>
    %63 = vector.extract_strided_slice %58 {offsets = [0, 64], sizes = [8, 32], strides = [1, 1]} : vector<8x96xf32> to vector<8x32xf32>
    %64 = arith.mulf %62, %46 : vector<8x32xf32>
    %65 = arith.mulf %61, %60 : vector<8x32xf32>
    %66 = arith.addf %64, %65 : vector<8x32xf32>
    %67 = math.tanh %66 : vector<8x32xf32>
    %68 = arith.mulf %63, %67 : vector<8x32xf32>
    %c16 = arith.constant 16 : index
    %c0_19 = arith.constant 0 : index
    %69 = vector.load %arg13[%c16, %c0_19] : memref<64x32xf32, #tpu.memory_space<vmem>>, vector<8x32xf32>
    tpu.vector_store %arg13[%c16, %c0_19], %68 {strides = array<i32>} : memref<64x32xf32, #tpu.memory_space<vmem>>, vector<8x32xf32>,
    %70 = vector.extract_strided_slice %6 {offsets = [24, 0], sizes = [8, 128], strides = [1, 1]} : vector<64x128xf32> to vector<8x128xf32>
    %cst_20 = arith.constant dense<0.000000e+00> : vector<8x128xf32>
    %71 = tpu.matmul %68, %7, %cst_20 {dimension_numbers = #tpu.dot_dimension_numbers<[1], [0], [0], [1], [0, 0, 1, 1], [], []>} : vector<8x32xf32>, vector<32x128xf32>, vector<8x128xf32> -> vector<8x128xf32>
    %72 = arith.addf %70, %71 : vector<8x128xf32>
    %73 = vector.extract_strided_slice %72 {offsets = [0, 0], sizes = [8, 96], strides = [1, 1]} : vector<8x128xf32> to vector<8x96xf32>
    %74 = arith.negf %73 : vector<8x96xf32>
    %75 = math.exp %74 : vector<8x96xf32>
    %cst_21 = arith.constant 1.000000e+00 : f32
    %76 = vector.broadcast %cst_21 : f32 to vector<8x96xf32>
    %77 = arith.addf %76, %75 : vector<8x96xf32>
    %78 = arith.divf %76, %77 : vector<8x96xf32>
    %79 = vector.extract_strided_slice %72 {offsets = [0, 96], sizes = [8, 32], strides = [1, 1]} : vector<8x128xf32> to vector<8x32xf32>
    %80 = math.tanh %79 : vector<8x32xf32>
    %81 = vector.extract_strided_slice %78 {offsets = [0, 0], sizes = [8, 32], strides = [1, 1]} : vector<8x96xf32> to vector<8x32xf32>
    %82 = vector.extract_strided_slice %78 {offsets = [0, 32], sizes = [8, 32], strides = [1, 1]} : vector<8x96xf32> to vector<8x32xf32>
    %83 = vector.extract_strided_slice %78 {offsets = [0, 64], sizes = [8, 32], strides = [1, 1]} : vector<8x96xf32> to vector<8x32xf32>
    %84 = arith.mulf %82, %66 : vector<8x32xf32>
    %85 = arith.mulf %81, %80 : vector<8x32xf32>
    %86 = arith.addf %84, %85 : vector<8x32xf32>
    %87 = math.tanh %86 : vector<8x32xf32>
    %88 = arith.mulf %83, %87 : vector<8x32xf32>
    %c24 = arith.constant 24 : index
    %c0_22 = arith.constant 0 : index
    %89 = vector.load %arg13[%c24, %c0_22] : memref<64x32xf32, #tpu.memory_space<vmem>>, vector<8x32xf32>
    tpu.vector_store %arg13[%c24, %c0_22], %88 {strides = array<i32>} : memref<64x32xf32, #tpu.memory_space<vmem>>, vector<8x32xf32>,
    %90 = vector.extract_strided_slice %6 {offsets = [32, 0], sizes = [8, 128], strides = [1, 1]} : vector<64x128xf32> to vector<8x128xf32>
    %cst_23 = arith.constant dense<0.000000e+00> : vector<8x128xf32>
    %91 = tpu.matmul %88, %7, %cst_23 {dimension_numbers = #tpu.dot_dimension_numbers<[1], [0], [0], [1], [0, 0, 1, 1], [], []>} : vector<8x32xf32>, vector<32x128xf32>, vector<8x128xf32> -> vector<8x128xf32>
    %92 = arith.addf %90, %91 : vector<8x128xf32>
    %93 = vector.extract_strided_slice %92 {offsets = [0, 0], sizes = [8, 96], strides = [1, 1]} : vector<8x128xf32> to vector<8x96xf32>
    %94 = arith.negf %93 : vector<8x96xf32>
    %95 = math.exp %94 : vector<8x96xf32>
    %cst_24 = arith.constant 1.000000e+00 : f32
    %96 = vector.broadcast %cst_24 : f32 to vector<8x96xf32>
    %97 = arith.addf %96, %95 : vector<8x96xf32>
    %98 = arith.divf %96, %97 : vector<8x96xf32>
    %99 = vector.extract_strided_slice %92 {offsets = [0, 96], sizes = [8, 32], strides = [1, 1]} : vector<8x128xf32> to vector<8x32xf32>
    %100 = math.tanh %99 : vector<8x32xf32>
    %101 = vector.extract_strided_slice %98 {offsets = [0, 0], sizes = [8, 32], strides = [1, 1]} : vector<8x96xf32> to vector<8x32xf32>
    %102 = vector.extract_strided_slice %98 {offsets = [0, 32], sizes = [8, 32], strides = [1, 1]} : vector<8x96xf32> to vector<8x32xf32>
    %103 = vector.extract_strided_slice %98 {offsets = [0, 64], sizes = [8, 32], strides = [1, 1]} : vector<8x96xf32> to vector<8x32xf32>
    %104 = arith.mulf %102, %86 : vector<8x32xf32>
    %105 = arith.mulf %101, %100 : vector<8x32xf32>
    %106 = arith.addf %104, %105 : vector<8x32xf32>
    %107 = math.tanh %106 : vector<8x32xf32>
    %108 = arith.mulf %103, %107 : vector<8x32xf32>
    %c32 = arith.constant 32 : index
    %c0_25 = arith.constant 0 : index
    %109 = vector.load %arg13[%c32, %c0_25] : memref<64x32xf32, #tpu.memory_space<vmem>>, vector<8x32xf32>
    tpu.vector_store %arg13[%c32, %c0_25], %108 {strides = array<i32>} : memref<64x32xf32, #tpu.memory_space<vmem>>, vector<8x32xf32>,
    %110 = vector.extract_strided_slice %6 {offsets = [40, 0], sizes = [8, 128], strides = [1, 1]} : vector<64x128xf32> to vector<8x128xf32>
    %cst_26 = arith.constant dense<0.000000e+00> : vector<8x128xf32>
    %111 = tpu.matmul %108, %7, %cst_26 {dimension_numbers = #tpu.dot_dimension_numbers<[1], [0], [0], [1], [0, 0, 1, 1], [], []>} : vector<8x32xf32>, vector<32x128xf32>, vector<8x128xf32> -> vector<8x128xf32>
    %112 = arith.addf %110, %111 : vector<8x128xf32>
    %113 = vector.extract_strided_slice %112 {offsets = [0, 0], sizes = [8, 96], strides = [1, 1]} : vector<8x128xf32> to vector<8x96xf32>
    %114 = arith.negf %113 : vector<8x96xf32>
    %115 = math.exp %114 : vector<8x96xf32>
    %cst_27 = arith.constant 1.000000e+00 : f32
    %116 = vector.broadcast %cst_27 : f32 to vector<8x96xf32>
    %117 = arith.addf %116, %115 : vector<8x96xf32>
    %118 = arith.divf %116, %117 : vector<8x96xf32>
    %119 = vector.extract_strided_slice %112 {offsets = [0, 96], sizes = [8, 32], strides = [1, 1]} : vector<8x128xf32> to vector<8x32xf32>
    %120 = math.tanh %119 : vector<8x32xf32>
    %121 = vector.extract_strided_slice %118 {offsets = [0, 0], sizes = [8, 32], strides = [1, 1]} : vector<8x96xf32> to vector<8x32xf32>
    %122 = vector.extract_strided_slice %118 {offsets = [0, 32], sizes = [8, 32], strides = [1, 1]} : vector<8x96xf32> to vector<8x32xf32>
    %123 = vector.extract_strided_slice %118 {offsets = [0, 64], sizes = [8, 32], strides = [1, 1]} : vector<8x96xf32> to vector<8x32xf32>
    %124 = arith.mulf %122, %106 : vector<8x32xf32>
    %125 = arith.mulf %121, %120 : vector<8x32xf32>
    %126 = arith.addf %124, %125 : vector<8x32xf32>
    %127 = math.tanh %126 : vector<8x32xf32>
    %128 = arith.mulf %123, %127 : vector<8x32xf32>
    %c40 = arith.constant 40 : index
    %c0_28 = arith.constant 0 : index
    %129 = vector.load %arg13[%c40, %c0_28] : memref<64x32xf32, #tpu.memory_space<vmem>>, vector<8x32xf32>
    tpu.vector_store %arg13[%c40, %c0_28], %128 {strides = array<i32>} : memref<64x32xf32, #tpu.memory_space<vmem>>, vector<8x32xf32>,
    %130 = vector.extract_strided_slice %6 {offsets = [48, 0], sizes = [8, 128], strides = [1, 1]} : vector<64x128xf32> to vector<8x128xf32>
    %cst_29 = arith.constant dense<0.000000e+00> : vector<8x128xf32>
    %131 = tpu.matmul %128, %7, %cst_29 {dimension_numbers = #tpu.dot_dimension_numbers<[1], [0], [0], [1], [0, 0, 1, 1], [], []>} : vector<8x32xf32>, vector<32x128xf32>, vector<8x128xf32> -> vector<8x128xf32>
    %132 = arith.addf %130, %131 : vector<8x128xf32>
    %133 = vector.extract_strided_slice %132 {offsets = [0, 0], sizes = [8, 96], strides = [1, 1]} : vector<8x128xf32> to vector<8x96xf32>
    %134 = arith.negf %133 : vector<8x96xf32>
    %135 = math.exp %134 : vector<8x96xf32>
    %cst_30 = arith.constant 1.000000e+00 : f32
    %136 = vector.broadcast %cst_30 : f32 to vector<8x96xf32>
    %137 = arith.addf %136, %135 : vector<8x96xf32>
    %138 = arith.divf %136, %137 : vector<8x96xf32>
    %139 = vector.extract_strided_slice %132 {offsets = [0, 96], sizes = [8, 32], strides = [1, 1]} : vector<8x128xf32> to vector<8x32xf32>
    %140 = math.tanh %139 : vector<8x32xf32>
    %141 = vector.extract_strided_slice %138 {offsets = [0, 0], sizes = [8, 32], strides = [1, 1]} : vector<8x96xf32> to vector<8x32xf32>
    %142 = vector.extract_strided_slice %138 {offsets = [0, 32], sizes = [8, 32], strides = [1, 1]} : vector<8x96xf32> to vector<8x32xf32>
    %143 = vector.extract_strided_slice %138 {offsets = [0, 64], sizes = [8, 32], strides = [1, 1]} : vector<8x96xf32> to vector<8x32xf32>
    %144 = arith.mulf %142, %126 : vector<8x32xf32>
    %145 = arith.mulf %141, %140 : vector<8x32xf32>
    %146 = arith.addf %144, %145 : vector<8x32xf32>
    %147 = math.tanh %146 : vector<8x32xf32>
    %148 = arith.mulf %143, %147 : vector<8x32xf32>
    %c48 = arith.constant 48 : index
    %c0_31 = arith.constant 0 : index
    %149 = vector.load %arg13[%c48, %c0_31] : memref<64x32xf32, #tpu.memory_space<vmem>>, vector<8x32xf32>
    tpu.vector_store %arg13[%c48, %c0_31], %148 {strides = array<i32>} : memref<64x32xf32, #tpu.memory_space<vmem>>, vector<8x32xf32>,
    %150 = vector.extract_strided_slice %6 {offsets = [56, 0], sizes = [8, 128], strides = [1, 1]} : vector<64x128xf32> to vector<8x128xf32>
    %cst_32 = arith.constant dense<0.000000e+00> : vector<8x128xf32>
    %151 = tpu.matmul %148, %7, %cst_32 {dimension_numbers = #tpu.dot_dimension_numbers<[1], [0], [0], [1], [0, 0, 1, 1], [], []>} : vector<8x32xf32>, vector<32x128xf32>, vector<8x128xf32> -> vector<8x128xf32>
    %152 = arith.addf %150, %151 : vector<8x128xf32>
    %153 = vector.extract_strided_slice %152 {offsets = [0, 0], sizes = [8, 96], strides = [1, 1]} : vector<8x128xf32> to vector<8x96xf32>
    %154 = arith.negf %153 : vector<8x96xf32>
    %155 = math.exp %154 : vector<8x96xf32>
    %cst_33 = arith.constant 1.000000e+00 : f32
    %156 = vector.broadcast %cst_33 : f32 to vector<8x96xf32>
    %157 = arith.addf %156, %155 : vector<8x96xf32>
    %158 = arith.divf %156, %157 : vector<8x96xf32>
    %159 = vector.extract_strided_slice %152 {offsets = [0, 96], sizes = [8, 32], strides = [1, 1]} : vector<8x128xf32> to vector<8x32xf32>
    %160 = math.tanh %159 : vector<8x32xf32>
    %161 = vector.extract_strided_slice %158 {offsets = [0, 0], sizes = [8, 32], strides = [1, 1]} : vector<8x96xf32> to vector<8x32xf32>
    %162 = vector.extract_strided_slice %158 {offsets = [0, 32], sizes = [8, 32], strides = [1, 1]} : vector<8x96xf32> to vector<8x32xf32>
    %163 = vector.extract_strided_slice %158 {offsets = [0, 64], sizes = [8, 32], strides = [1, 1]} : vector<8x96xf32> to vector<8x32xf32>
    %164 = arith.mulf %162, %146 : vector<8x32xf32>
    %165 = arith.mulf %161, %160 : vector<8x32xf32>
    %166 = arith.addf %164, %165 : vector<8x32xf32>
    %167 = math.tanh %166 : vector<8x32xf32>
    %168 = arith.mulf %163, %167 : vector<8x32xf32>
    %c56 = arith.constant 56 : index
    %c0_34 = arith.constant 0 : index
    %169 = vector.load %arg13[%c56, %c0_34] : memref<64x32xf32, #tpu.memory_space<vmem>>, vector<8x32xf32>
    tpu.vector_store %arg13[%c56, %c0_34], %168 {strides = array<i32>} : memref<64x32xf32, #tpu.memory_space<vmem>>, vector<8x32xf32>,
    %c0_35 = arith.constant 0 : index
    %c0_36 = arith.constant 0 : index
    %170 = vector.load %arg13[%c0_35, %c0_36] : memref<64x32xf32, #tpu.memory_space<vmem>>, vector<64x32xf32>
    %c0_37 = arith.constant 0 : index
    %c0_38 = arith.constant 0 : index
    %171 = vector.load %arg5[%c0_37, %c0_38] : memref<32x128xf32, #tpu.memory_space<vmem>>, vector<32x128xf32>
    %cst_39 = arith.constant dense<0.000000e+00> : vector<64x128xf32>
    %172 = tpu.matmul %170, %171, %cst_39 {dimension_numbers = #tpu.dot_dimension_numbers<[1], [0], [0], [1], [0, 0, 1, 1], [], []>} : vector<64x32xf32>, vector<32x128xf32>, vector<64x128xf32> -> vector<64x128xf32>
    %c0_40 = arith.constant 0 : index
    %c0_41 = arith.constant 0 : index
    %173 = vector.load %arg7[%c0_40, %c0_41] : memref<1x128xf32, #tpu.memory_space<vmem>>, vector<1x128xf32>
    %174 = vector.broadcast %173 : vector<1x128xf32> to vector<64x128xf32>
    %175 = arith.addf %172, %174 : vector<64x128xf32>
    %c0_42 = arith.constant 0 : index
    %c0_43 = arith.constant 0 : index
    %176 = vector.load %arg6[%c0_42, %c0_43] : memref<32x128xf32, #tpu.memory_space<vmem>>, vector<32x128xf32>
    %cst_44 = arith.constant 0.000000e+00 : f32
    %177 = vector.broadcast %cst_44 : f32 to vector<8x32xf32>
    %cst_45 = arith.constant 0.000000e+00 : f32
    %178 = vector.broadcast %cst_45 : f32 to vector<8x32xf32>
    %179 = vector.extract_strided_slice %175 {offsets = [0, 0], sizes = [8, 128], strides = [1, 1]} : vector<64x128xf32> to vector<8x128xf32>
    %cst_46 = arith.constant dense<0.000000e+00> : vector<8x128xf32>
    %180 = tpu.matmul %177, %176, %cst_46 {dimension_numbers = #tpu.dot_dimension_numbers<[1], [0], [0], [1], [0, 0, 1, 1], [], []>} : vector<8x32xf32>, vector<32x128xf32>, vector<8x128xf32> -> vector<8x128xf32>
    %181 = arith.addf %179, %180 : vector<8x128xf32>
    %182 = vector.extract_strided_slice %181 {offsets = [0, 0], sizes = [8, 96], strides = [1, 1]} : vector<8x128xf32> to vector<8x96xf32>
    %183 = arith.negf %182 : vector<8x96xf32>
    %184 = math.exp %183 : vector<8x96xf32>
    %cst_47 = arith.constant 1.000000e+00 : f32
    %185 = vector.broadcast %cst_47 : f32 to vector<8x96xf32>
    %186 = arith.addf %185, %184 : vector<8x96xf32>
    %187 = arith.divf %185, %186 : vector<8x96xf32>
    %188 = vector.extract_strided_slice %181 {offsets = [0, 96], sizes = [8, 32], strides = [1, 1]} : vector<8x128xf32> to vector<8x32xf32>
    %189 = math.tanh %188 : vector<8x32xf32>
    %190 = vector.extract_strided_slice %187 {offsets = [0, 0], sizes = [8, 32], strides = [1, 1]} : vector<8x96xf32> to vector<8x32xf32>
    %191 = vector.extract_strided_slice %187 {offsets = [0, 32], sizes = [8, 32], strides = [1, 1]} : vector<8x96xf32> to vector<8x32xf32>
    %192 = vector.extract_strided_slice %187 {offsets = [0, 64], sizes = [8, 32], strides = [1, 1]} : vector<8x96xf32> to vector<8x32xf32>
    %193 = arith.mulf %191, %178 : vector<8x32xf32>
    %194 = arith.mulf %190, %189 : vector<8x32xf32>
    %195 = arith.addf %193, %194 : vector<8x32xf32>
    %196 = math.tanh %195 : vector<8x32xf32>
    %197 = arith.mulf %192, %196 : vector<8x32xf32>
    %198 = vector.extract_strided_slice %175 {offsets = [8, 0], sizes = [8, 128], strides = [1, 1]} : vector<64x128xf32> to vector<8x128xf32>
    %cst_48 = arith.constant dense<0.000000e+00> : vector<8x128xf32>
    %199 = tpu.matmul %197, %176, %cst_48 {dimension_numbers = #tpu.dot_dimension_numbers<[1], [0], [0], [1], [0, 0, 1, 1], [], []>} : vector<8x32xf32>, vector<32x128xf32>, vector<8x128xf32> -> vector<8x128xf32>
    %200 = arith.addf %198, %199 : vector<8x128xf32>
    %201 = vector.extract_strided_slice %200 {offsets = [0, 0], sizes = [8, 96], strides = [1, 1]} : vector<8x128xf32> to vector<8x96xf32>
    %202 = arith.negf %201 : vector<8x96xf32>
    %203 = math.exp %202 : vector<8x96xf32>
    %cst_49 = arith.constant 1.000000e+00 : f32
    %204 = vector.broadcast %cst_49 : f32 to vector<8x96xf32>
    %205 = arith.addf %204, %203 : vector<8x96xf32>
    %206 = arith.divf %204, %205 : vector<8x96xf32>
    %207 = vector.extract_strided_slice %200 {offsets = [0, 96], sizes = [8, 32], strides = [1, 1]} : vector<8x128xf32> to vector<8x32xf32>
    %208 = math.tanh %207 : vector<8x32xf32>
    %209 = vector.extract_strided_slice %206 {offsets = [0, 0], sizes = [8, 32], strides = [1, 1]} : vector<8x96xf32> to vector<8x32xf32>
    %210 = vector.extract_strided_slice %206 {offsets = [0, 32], sizes = [8, 32], strides = [1, 1]} : vector<8x96xf32> to vector<8x32xf32>
    %211 = vector.extract_strided_slice %206 {offsets = [0, 64], sizes = [8, 32], strides = [1, 1]} : vector<8x96xf32> to vector<8x32xf32>
    %212 = arith.mulf %210, %195 : vector<8x32xf32>
    %213 = arith.mulf %209, %208 : vector<8x32xf32>
    %214 = arith.addf %212, %213 : vector<8x32xf32>
    %215 = math.tanh %214 : vector<8x32xf32>
    %216 = arith.mulf %211, %215 : vector<8x32xf32>
    %217 = vector.extract_strided_slice %175 {offsets = [16, 0], sizes = [8, 128], strides = [1, 1]} : vector<64x128xf32> to vector<8x128xf32>
    %cst_50 = arith.constant dense<0.000000e+00> : vector<8x128xf32>
    %218 = tpu.matmul %216, %176, %cst_50 {dimension_numbers = #tpu.dot_dimension_numbers<[1], [0], [0], [1], [0, 0, 1, 1], [], []>} : vector<8x32xf32>, vector<32x128xf32>, vector<8x128xf32> -> vector<8x128xf32>
    %219 = arith.addf %217, %218 : vector<8x128xf32>
    %220 = vector.extract_strided_slice %219 {offsets = [0, 0], sizes = [8, 96], strides = [1, 1]} : vector<8x128xf32> to vector<8x96xf32>
    %221 = arith.negf %220 : vector<8x96xf32>
    %222 = math.exp %221 : vector<8x96xf32>
    %cst_51 = arith.constant 1.000000e+00 : f32
    %223 = vector.broadcast %cst_51 : f32 to vector<8x96xf32>
    %224 = arith.addf %223, %222 : vector<8x96xf32>
    %225 = arith.divf %223, %224 : vector<8x96xf32>
    %226 = vector.extract_strided_slice %219 {offsets = [0, 96], sizes = [8, 32], strides = [1, 1]} : vector<8x128xf32> to vector<8x32xf32>
    %227 = math.tanh %226 : vector<8x32xf32>
    %228 = vector.extract_strided_slice %225 {offsets = [0, 0], sizes = [8, 32], strides = [1, 1]} : vector<8x96xf32> to vector<8x32xf32>
    %229 = vector.extract_strided_slice %225 {offsets = [0, 32], sizes = [8, 32], strides = [1, 1]} : vector<8x96xf32> to vector<8x32xf32>
    %230 = vector.extract_strided_slice %225 {offsets = [0, 64], sizes = [8, 32], strides = [1, 1]} : vector<8x96xf32> to vector<8x32xf32>
    %231 = arith.mulf %229, %214 : vector<8x32xf32>
    %232 = arith.mulf %228, %227 : vector<8x32xf32>
    %233 = arith.addf %231, %232 : vector<8x32xf32>
    %234 = math.tanh %233 : vector<8x32xf32>
    %235 = arith.mulf %230, %234 : vector<8x32xf32>
    %236 = vector.extract_strided_slice %175 {offsets = [24, 0], sizes = [8, 128], strides = [1, 1]} : vector<64x128xf32> to vector<8x128xf32>
    %cst_52 = arith.constant dense<0.000000e+00> : vector<8x128xf32>
    %237 = tpu.matmul %235, %176, %cst_52 {dimension_numbers = #tpu.dot_dimension_numbers<[1], [0], [0], [1], [0, 0, 1, 1], [], []>} : vector<8x32xf32>, vector<32x128xf32>, vector<8x128xf32> -> vector<8x128xf32>
    %238 = arith.addf %236, %237 : vector<8x128xf32>
    %239 = vector.extract_strided_slice %238 {offsets = [0, 0], sizes = [8, 96], strides = [1, 1]} : vector<8x128xf32> to vector<8x96xf32>
    %240 = arith.negf %239 : vector<8x96xf32>
    %241 = math.exp %240 : vector<8x96xf32>
    %cst_53 = arith.constant 1.000000e+00 : f32
    %242 = vector.broadcast %cst_53 : f32 to vector<8x96xf32>
    %243 = arith.addf %242, %241 : vector<8x96xf32>
    %244 = arith.divf %242, %243 : vector<8x96xf32>
    %245 = vector.extract_strided_slice %238 {offsets = [0, 96], sizes = [8, 32], strides = [1, 1]} : vector<8x128xf32> to vector<8x32xf32>
    %246 = math.tanh %245 : vector<8x32xf32>
    %247 = vector.extract_strided_slice %244 {offsets = [0, 0], sizes = [8, 32], strides = [1, 1]} : vector<8x96xf32> to vector<8x32xf32>
    %248 = vector.extract_strided_slice %244 {offsets = [0, 32], sizes = [8, 32], strides = [1, 1]} : vector<8x96xf32> to vector<8x32xf32>
    %249 = vector.extract_strided_slice %244 {offsets = [0, 64], sizes = [8, 32], strides = [1, 1]} : vector<8x96xf32> to vector<8x32xf32>
    %250 = arith.mulf %248, %233 : vector<8x32xf32>
    %251 = arith.mulf %247, %246 : vector<8x32xf32>
    %252 = arith.addf %250, %251 : vector<8x32xf32>
    %253 = math.tanh %252 : vector<8x32xf32>
    %254 = arith.mulf %249, %253 : vector<8x32xf32>
    %255 = vector.extract_strided_slice %175 {offsets = [32, 0], sizes = [8, 128], strides = [1, 1]} : vector<64x128xf32> to vector<8x128xf32>
    %cst_54 = arith.constant dense<0.000000e+00> : vector<8x128xf32>
    %256 = tpu.matmul %254, %176, %cst_54 {dimension_numbers = #tpu.dot_dimension_numbers<[1], [0], [0], [1], [0, 0, 1, 1], [], []>} : vector<8x32xf32>, vector<32x128xf32>, vector<8x128xf32> -> vector<8x128xf32>
    %257 = arith.addf %255, %256 : vector<8x128xf32>
    %258 = vector.extract_strided_slice %257 {offsets = [0, 0], sizes = [8, 96], strides = [1, 1]} : vector<8x128xf32> to vector<8x96xf32>
    %259 = arith.negf %258 : vector<8x96xf32>
    %260 = math.exp %259 : vector<8x96xf32>
    %cst_55 = arith.constant 1.000000e+00 : f32
    %261 = vector.broadcast %cst_55 : f32 to vector<8x96xf32>
    %262 = arith.addf %261, %260 : vector<8x96xf32>
    %263 = arith.divf %261, %262 : vector<8x96xf32>
    %264 = vector.extract_strided_slice %257 {offsets = [0, 96], sizes = [8, 32], strides = [1, 1]} : vector<8x128xf32> to vector<8x32xf32>
    %265 = math.tanh %264 : vector<8x32xf32>
    %266 = vector.extract_strided_slice %263 {offsets = [0, 0], sizes = [8, 32], strides = [1, 1]} : vector<8x96xf32> to vector<8x32xf32>
    %267 = vector.extract_strided_slice %263 {offsets = [0, 32], sizes = [8, 32], strides = [1, 1]} : vector<8x96xf32> to vector<8x32xf32>
    %268 = vector.extract_strided_slice %263 {offsets = [0, 64], sizes = [8, 32], strides = [1, 1]} : vector<8x96xf32> to vector<8x32xf32>
    %269 = arith.mulf %267, %252 : vector<8x32xf32>
    %270 = arith.mulf %266, %265 : vector<8x32xf32>
    %271 = arith.addf %269, %270 : vector<8x32xf32>
    %272 = math.tanh %271 : vector<8x32xf32>
    %273 = arith.mulf %268, %272 : vector<8x32xf32>
    %274 = vector.extract_strided_slice %175 {offsets = [40, 0], sizes = [8, 128], strides = [1, 1]} : vector<64x128xf32> to vector<8x128xf32>
    %cst_56 = arith.constant dense<0.000000e+00> : vector<8x128xf32>
    %275 = tpu.matmul %273, %176, %cst_56 {dimension_numbers = #tpu.dot_dimension_numbers<[1], [0], [0], [1], [0, 0, 1, 1], [], []>} : vector<8x32xf32>, vector<32x128xf32>, vector<8x128xf32> -> vector<8x128xf32>
    %276 = arith.addf %274, %275 : vector<8x128xf32>
    %277 = vector.extract_strided_slice %276 {offsets = [0, 0], sizes = [8, 96], strides = [1, 1]} : vector<8x128xf32> to vector<8x96xf32>
    %278 = arith.negf %277 : vector<8x96xf32>
    %279 = math.exp %278 : vector<8x96xf32>
    %cst_57 = arith.constant 1.000000e+00 : f32
    %280 = vector.broadcast %cst_57 : f32 to vector<8x96xf32>
    %281 = arith.addf %280, %279 : vector<8x96xf32>
    %282 = arith.divf %280, %281 : vector<8x96xf32>
    %283 = vector.extract_strided_slice %276 {offsets = [0, 96], sizes = [8, 32], strides = [1, 1]} : vector<8x128xf32> to vector<8x32xf32>
    %284 = math.tanh %283 : vector<8x32xf32>
    %285 = vector.extract_strided_slice %282 {offsets = [0, 0], sizes = [8, 32], strides = [1, 1]} : vector<8x96xf32> to vector<8x32xf32>
    %286 = vector.extract_strided_slice %282 {offsets = [0, 32], sizes = [8, 32], strides = [1, 1]} : vector<8x96xf32> to vector<8x32xf32>
    %287 = vector.extract_strided_slice %282 {offsets = [0, 64], sizes = [8, 32], strides = [1, 1]} : vector<8x96xf32> to vector<8x32xf32>
    %288 = arith.mulf %286, %271 : vector<8x32xf32>
    %289 = arith.mulf %285, %284 : vector<8x32xf32>
    %290 = arith.addf %288, %289 : vector<8x32xf32>
    %291 = math.tanh %290 : vector<8x32xf32>
    %292 = arith.mulf %287, %291 : vector<8x32xf32>
    %293 = vector.extract_strided_slice %175 {offsets = [48, 0], sizes = [8, 128], strides = [1, 1]} : vector<64x128xf32> to vector<8x128xf32>
    %cst_58 = arith.constant dense<0.000000e+00> : vector<8x128xf32>
    %294 = tpu.matmul %292, %176, %cst_58 {dimension_numbers = #tpu.dot_dimension_numbers<[1], [0], [0], [1], [0, 0, 1, 1], [], []>} : vector<8x32xf32>, vector<32x128xf32>, vector<8x128xf32> -> vector<8x128xf32>
    %295 = arith.addf %293, %294 : vector<8x128xf32>
    %296 = vector.extract_strided_slice %295 {offsets = [0, 0], sizes = [8, 96], strides = [1, 1]} : vector<8x128xf32> to vector<8x96xf32>
    %297 = arith.negf %296 : vector<8x96xf32>
    %298 = math.exp %297 : vector<8x96xf32>
    %cst_59 = arith.constant 1.000000e+00 : f32
    %299 = vector.broadcast %cst_59 : f32 to vector<8x96xf32>
    %300 = arith.addf %299, %298 : vector<8x96xf32>
    %301 = arith.divf %299, %300 : vector<8x96xf32>
    %302 = vector.extract_strided_slice %295 {offsets = [0, 96], sizes = [8, 32], strides = [1, 1]} : vector<8x128xf32> to vector<8x32xf32>
    %303 = math.tanh %302 : vector<8x32xf32>
    %304 = vector.extract_strided_slice %301 {offsets = [0, 0], sizes = [8, 32], strides = [1, 1]} : vector<8x96xf32> to vector<8x32xf32>
    %305 = vector.extract_strided_slice %301 {offsets = [0, 32], sizes = [8, 32], strides = [1, 1]} : vector<8x96xf32> to vector<8x32xf32>
    %306 = vector.extract_strided_slice %301 {offsets = [0, 64], sizes = [8, 32], strides = [1, 1]} : vector<8x96xf32> to vector<8x32xf32>
    %307 = arith.mulf %305, %290 : vector<8x32xf32>
    %308 = arith.mulf %304, %303 : vector<8x32xf32>
    %309 = arith.addf %307, %308 : vector<8x32xf32>
    %310 = math.tanh %309 : vector<8x32xf32>
    %311 = arith.mulf %306, %310 : vector<8x32xf32>
    %312 = vector.extract_strided_slice %175 {offsets = [56, 0], sizes = [8, 128], strides = [1, 1]} : vector<64x128xf32> to vector<8x128xf32>
    %cst_60 = arith.constant dense<0.000000e+00> : vector<8x128xf32>
    %313 = tpu.matmul %311, %176, %cst_60 {dimension_numbers = #tpu.dot_dimension_numbers<[1], [0], [0], [1], [0, 0, 1, 1], [], []>} : vector<8x32xf32>, vector<32x128xf32>, vector<8x128xf32> -> vector<8x128xf32>
    %314 = arith.addf %312, %313 : vector<8x128xf32>
    %315 = vector.extract_strided_slice %314 {offsets = [0, 0], sizes = [8, 96], strides = [1, 1]} : vector<8x128xf32> to vector<8x96xf32>
    %316 = arith.negf %315 : vector<8x96xf32>
    %317 = math.exp %316 : vector<8x96xf32>
    %cst_61 = arith.constant 1.000000e+00 : f32
    %318 = vector.broadcast %cst_61 : f32 to vector<8x96xf32>
    %319 = arith.addf %318, %317 : vector<8x96xf32>
    %320 = arith.divf %318, %319 : vector<8x96xf32>
    %321 = vector.extract_strided_slice %314 {offsets = [0, 96], sizes = [8, 32], strides = [1, 1]} : vector<8x128xf32> to vector<8x32xf32>
    %322 = math.tanh %321 : vector<8x32xf32>
    %323 = vector.extract_strided_slice %320 {offsets = [0, 0], sizes = [8, 32], strides = [1, 1]} : vector<8x96xf32> to vector<8x32xf32>
    %324 = vector.extract_strided_slice %320 {offsets = [0, 32], sizes = [8, 32], strides = [1, 1]} : vector<8x96xf32> to vector<8x32xf32>
    %325 = vector.extract_strided_slice %320 {offsets = [0, 64], sizes = [8, 32], strides = [1, 1]} : vector<8x96xf32> to vector<8x32xf32>
    %326 = arith.mulf %324, %309 : vector<8x32xf32>
    %327 = arith.mulf %323, %322 : vector<8x32xf32>
    %328 = arith.addf %326, %327 : vector<8x32xf32>
    %329 = math.tanh %328 : vector<8x32xf32>
    %330 = arith.mulf %325, %329 : vector<8x32xf32>
    %331 = tpu.concatenate %168, %330 in 1 : vector<8x32xf32>, vector<8x32xf32> -> vector<8x64xf32>
    %cst_62 = arith.constant 0.000000e+00 : f32
    %332 = vector.broadcast %cst_62 : f32 to vector<8x64xf32>
    %333 = arith.maximumf %331, %332 : vector<8x64xf32>
    %c0_63 = arith.constant 0 : index
    %c0_64 = arith.constant 0 : index
    %334 = vector.load %arg8[%c0_63, %c0_64] : memref<64x128xf32, #tpu.memory_space<vmem>>, vector<64x128xf32>
    %cst_65 = arith.constant dense<0.000000e+00> : vector<8x128xf32>
    %335 = tpu.matmul %333, %334, %cst_65 {dimension_numbers = #tpu.dot_dimension_numbers<[1], [0], [0], [1], [0, 0, 1, 1], [], []>} : vector<8x64xf32>, vector<64x128xf32>, vector<8x128xf32> -> vector<8x128xf32>
    %c0_66 = arith.constant 0 : index
    %c0_67 = arith.constant 0 : index
    %336 = vector.load %arg9[%c0_66, %c0_67] : memref<1x128xf32, #tpu.memory_space<vmem>>, vector<1x128xf32>
    %337 = vector.broadcast %336 : vector<1x128xf32> to vector<8x128xf32>
    %338 = arith.addf %335, %337 : vector<8x128xf32>
    %cst_68 = arith.constant 0.000000e+00 : f32
    %339 = vector.broadcast %cst_68 : f32 to vector<8x128xf32>
    %340 = arith.maximumf %338, %339 : vector<8x128xf32>
    %c0_69 = arith.constant 0 : index
    %c0_70 = arith.constant 0 : index
    %341 = vector.load %arg10[%c0_69, %c0_70] : memref<128x128xf32, #tpu.memory_space<vmem>>, vector<128x128xf32>
    %cst_71 = arith.constant dense<0.000000e+00> : vector<8x128xf32>
    %342 = tpu.matmul %340, %341, %cst_71 {dimension_numbers = #tpu.dot_dimension_numbers<[1], [0], [0], [1], [0, 0, 1, 1], [], []>} : vector<8x128xf32>, vector<128x128xf32>, vector<8x128xf32> -> vector<8x128xf32>
    %c0_72 = arith.constant 0 : index
    %c0_73 = arith.constant 0 : index
    %343 = vector.load %arg11[%c0_72, %c0_73] : memref<1x128xf32, #tpu.memory_space<vmem>>, vector<1x128xf32>
    %344 = vector.broadcast %343 : vector<1x128xf32> to vector<8x128xf32>
    %345 = arith.addf %342, %344 : vector<8x128xf32>
    %c0_74 = arith.constant 0 : index
    %c0_75 = arith.constant 0 : index
    %346 = vector.load %arg12[%c0_74, %c0_75] : memref<8x128xf32, #tpu.memory_space<vmem>>, vector<8x128xf32>
    tpu.vector_store %arg12[%c0_74, %c0_75], %345 {strides = array<i32>} : memref<8x128xf32, #tpu.memory_space<vmem>>, vector<8x128xf32>,
    return
  }
  func.func @transform_0(%arg0: i32) -> (i32, i32, i32) {
    %c0_i32 = arith.constant 0 : i32
    %c0_i32_0 = arith.constant 0 : i32
    %c0_i32_1 = arith.constant 0 : i32
    return %c0_i32, %arg0, %c0_i32_0 : i32, i32, i32
  }
  func.func @transform_1(%arg0: i32) -> (i32, i32) {
    %c0_i32 = arith.constant 0 : i32
    %c0_i32_0 = arith.constant 0 : i32
    %c0_i32_1 = arith.constant 0 : i32
    return %c0_i32, %c0_i32_0 : i32, i32
  }
  func.func @transform_2(%arg0: i32) -> (i32, i32) {
    %c0_i32 = arith.constant 0 : i32
    %c0_i32_0 = arith.constant 0 : i32
    %c0_i32_1 = arith.constant 0 : i32
    return %c0_i32, %c0_i32_0 : i32, i32
  }
  func.func @transform_3(%arg0: i32) -> (i32, i32) {
    %c0_i32 = arith.constant 0 : i32
    %c0_i32_0 = arith.constant 0 : i32
    %c0_i32_1 = arith.constant 0 : i32
    return %c0_i32, %c0_i32_0 : i32, i32
  }
  func.func @transform_4(%arg0: i32) -> (i32, i32) {
    %c0_i32 = arith.constant 0 : i32
    %c0_i32_0 = arith.constant 0 : i32
    %c0_i32_1 = arith.constant 0 : i32
    return %c0_i32, %c0_i32_0 : i32, i32
  }
  func.func @transform_5(%arg0: i32) -> (i32, i32) {
    %c0_i32 = arith.constant 0 : i32
    %c0_i32_0 = arith.constant 0 : i32
    %c0_i32_1 = arith.constant 0 : i32
    return %c0_i32, %c0_i32_0 : i32, i32
  }
  func.func @transform_6(%arg0: i32) -> (i32, i32) {
    %c0_i32 = arith.constant 0 : i32
    %c0_i32_0 = arith.constant 0 : i32
    %c0_i32_1 = arith.constant 0 : i32
    return %c0_i32, %c0_i32_0 : i32, i32
  }
  func.func @transform_7(%arg0: i32) -> (i32, i32) {
    %c0_i32 = arith.constant 0 : i32
    %c0_i32_0 = arith.constant 0 : i32
    %c0_i32_1 = arith.constant 0 : i32
    return %c0_i32, %c0_i32_0 : i32, i32
  }
  func.func @transform_8(%arg0: i32) -> (i32, i32) {
    %c0_i32 = arith.constant 0 : i32
    %c0_i32_0 = arith.constant 0 : i32
    %c0_i32_1 = arith.constant 0 : i32
    return %c0_i32, %c0_i32_0 : i32, i32
  }
  func.func @transform_9(%arg0: i32) -> (i32, i32) {
    %c0_i32 = arith.constant 0 : i32
    %c0_i32_0 = arith.constant 0 : i32
    %c0_i32_1 = arith.constant 0 : i32
    return %c0_i32, %c0_i32_0 : i32, i32
  }
  func.func @transform_10(%arg0: i32) -> (i32, i32) {
    %c0_i32 = arith.constant 0 : i32
    %c0_i32_0 = arith.constant 0 : i32
    %c0_i32_1 = arith.constant 0 : i32
    return %c0_i32, %c0_i32_0 : i32, i32
  }
  func.func @transform_11(%arg0: i32) -> (i32, i32) {
    %c0_i32 = arith.constant 0 : i32
    %c0_i32_0 = arith.constant 0 : i32
    return %arg0, %c0_i32 : i32, i32
  }
}

</mosaic_0001>

<bundles_post_ra>
// kernel: tpu_custom_call.1
= control target key start
LH: loop header
LB: loop body
LE: loop exit
PB: predicated region body
PF: predicated region fallthrough
CT: control target
= control target key end

     0   :  { %16 = vsyncpa [#allocation4], 0  ;;  %s3695_s0 = inlined_call_operand.hbm [shape: f32[8,8,32], index: 0, kind: input, shape index: {}]   ;;  %s3696_s1 = inlined_call_operand.hbm [shape: f32[32,128], index: 1, kind: input, shape index: {}]   ;;  %s3697_s2 = inlined_call_operand.hbm [shape: f32[32,128], index: 2, kind: input, shape index: {}]   ;;  %s3698_s3 = inlined_call_operand.vmem [shape: f32[1,128], index: 3, kind: input, shape index: {}]   ;;  %s3699_s4 = inlined_call_operand.hbm [shape: f32[32,128], index: 4, kind: input, shape index: {}]   ;;  %s3700_s5 = inlined_call_operand.hbm [shape: f32[32,128], index: 5, kind: input, shape index: {}]   ;;  %s3701_s6 = inlined_call_operand.vmem [shape: f32[1,128], index: 6, kind: input, shape index: {}]   ;;  %s3702_s7 = inlined_call_operand.hbm [shape: f32[64,128], index: 7, kind: input, shape index: {}]   ;;  %s3703_s8 = inlined_call_operand.vmem [shape: f32[1,128], index: 8, kind: input, shape index: {}]   ;;  %s3704_s9 = inlined_call_operand.hbm [shape: f32[128,128], index: 9, kind: input, shape index: {}]   ;;  %s3705_s10 = inlined_call_operand.vmem [shape: f32[1,128], index: 10, kind: input, shape index: {}]   ;;  %s3706_s11 = inlined_call_operand.hbm [shape: f32[8,128], index: 11, kind: output, shape index: {}]  }
   0x1   :  { %17 = vsyncpa [#allocation7], 0 }
   0x2   :  { %18 = vsyncpa [#allocation10], 0 }
   0x3   :  { %19 = vsyncpa [#allocation13], 0 }
   0x4   :  { %20 = vsyncpa [#allocation5], 0  ;;  %s3188_s17 = smov [#allocation6]   ;;  %s3189_s19 = smov [#allocation9]  }
   0x5   :  { %s38_s18 = sshll.u32 %s3188_s17, 4  ;;  %s64_s20 = sshll.u32 %s3189_s19, 4  ;;  %s39_s18 = int_to_ptr.vmem [resolvable:$true] %s38_s18  ;;  %s3264_s20 = int_to_ptr.vmem [resolvable:$true] %s64_s20 }
   0x6   :  { %s3002_s23 = scalar_lea.hbm %s3696_s1, 512 }
   0x7   :  { %p3003_p0 = scmp.ne.s32.totalorder %s3696_s1, %s3002_s23  ;;  %p3006_p1 = scmp.lt.u32.totalorder %s3002_s23, %s3696_s1 }
   0x9   :  { %p3008_p2 = pnand %p3006_p1, %p3003_p0 }
   0xb   :  { %3011 = shalt.err (!%p3008_p2)
}
   0xc   :  { %s3012_s28 = scalar_lea.vmem %s39_s18, 512  ;;  %p3017_p4 = scmp.lt.s32.totalorder %s39_s18, %s39_s18 }
   0xd   :  { %p3013_p3 = scmp.ne.s32.totalorder %s39_s18, %s3012_s28  ;;  %p3018_p5 = scmp.lt.s32.totalorder %s3012_s28, %s3012_s28 }
   0xf   :  { %p3019_p6 = por %p3018_p5, %p3017_p4 }
  0x11   :  { %p3020_p7 = pnand %p3019_p6, %p3013_p3 }
  0x13   :  { %3023 = shalt.err (!%p3020_p7)
}
  0x14   :  { %s3190_s29 = smov 128   ;;  %s3191_s30 = smov 8  }
  0x15   :  { %44 = dma.hbm_to_vmem [thread:$0]  %s3696_s1, 512, %s39_s18, [#allocation7], %s3190_s29, %s3190_s29, %s3191_s30  }
  0x16   :  { %s3024_s16 = scalar_lea.hbm %s3699_s4, 512 }
  0x17   :  { %p3025_p8 = scmp.ne.s32.totalorder %s3699_s4, %s3024_s16  ;;  %p3028_p9 = scmp.lt.u32.totalorder %s3024_s16, %s3699_s4 }
  0x19   :  { %p3030_p10 = pnand %p3028_p9, %p3025_p8 }
  0x1b   :  { %3033 = shalt.err (!%p3030_p10)
}
  0x1c   :  { %s3034_s23 = scalar_lea.vmem %s3264_s20, 512  ;;  %p3039_p12 = scmp.lt.s32.totalorder %s3264_s20, %s3264_s20 }
  0x1d   :  { %p3035_p11 = scmp.ne.s32.totalorder %s3264_s20, %s3034_s23  ;;  %p3040_p13 = scmp.lt.s32.totalorder %s3034_s23, %s3034_s23 }
  0x1f   :  { %p3041_p0 = por %p3040_p13, %p3039_p12 }
  0x21   :  { %p3042_p1 = pnand %p3041_p0, %p3035_p11 }
  0x23   :  { %3045 = shalt.err (!%p3042_p1)
}
  0x24   :  { %70 = dma.hbm_to_vmem [thread:$0]  %s3699_s4, 512, %s3264_s20, [#allocation10], %s3190_s29, %s3190_s29, %s3191_s30  }
  0x25   :  { %s3192_s24 = smov [#allocation12]   ;;  %s3193_s26 = smov [#allocation3]  }
  0x26   :  { %s90_s25 = sshll.u32 %s3192_s24, 4  ;;  %s26_s27 = sshll.u32 %s3193_s26, 4  ;;  %s91_s25 = int_to_ptr.vmem [resolvable:$true] %s90_s25  ;;  %s3301_s27 = int_to_ptr.vmem [resolvable:$true] %s26_s27 }
  0x27   :  { %s3046_s13 = scalar_lea.hbm %s3702_s7, 1024 }
  0x28   :  { %p3047_p2 = scmp.ne.s32.totalorder %s3702_s7, %s3046_s13  ;;  %p3050_p3 = scmp.lt.u32.totalorder %s3046_s13, %s3702_s7 }
  0x2a   :  { %p3052_p4 = pnand %p3050_p3, %p3047_p2 }
  0x2c   :  { %3055 = shalt.err (!%p3052_p4)
}
  0x2d   :  { %s3056_s4 = scalar_lea.vmem %s91_s25, 1024  ;;  %p3061_p6 = scmp.lt.s32.totalorder %s91_s25, %s91_s25 }
  0x2e   :  { %p3057_p5 = scmp.ne.s32.totalorder %s91_s25, %s3056_s4  ;;  %p3062_p7 = scmp.lt.s32.totalorder %s3056_s4, %s3056_s4 }
  0x30   :  { %p3063_p8 = por %p3062_p7, %p3061_p6 }
  0x32   :  { %p3064_p9 = pnand %p3063_p8, %p3057_p5 }
  0x34   :  { %3067 = shalt.err (!%p3064_p9)
}
  0x35   :  { %96 = dma.hbm_to_vmem [thread:$0]  %s3702_s7, 1024, %s91_s25, [#allocation13], %s3190_s29, %s3190_s29, %s3191_s30  }
  0x36   :  { %s3068_s23 = scalar_lea.hbm %s3695_s0, 1024 }
  0x37   :  { %p3069_p10 = scmp.ne.s32.totalorder %s3695_s0, %s3068_s23  ;;  %p3072_p11 = scmp.lt.u32.totalorder %s3068_s23, %s3695_s0 }
  0x39   :  { %p3074_p12 = pnand %p3072_p11, %p3069_p10 }
  0x3b   :  { %3077 = shalt.err (!%p3074_p12)
}
  0x3c   :  { %s3078_s28 = scalar_lea.vmem %s3301_s27, 1024  ;;  %p3083_p0 = scmp.lt.s32.totalorder %s3301_s27, %s3301_s27 }
  0x3d   :  { %p3079_p13 = scmp.ne.s32.totalorder %s3301_s27, %s3078_s28  ;;  %p3084_p1 = scmp.lt.s32.totalorder %s3078_s28, %s3078_s28 }
  0x3f   :  { %p3085_p2 = por %p3084_p1, %p3083_p0 }
  0x41   :  { %p3086_p3 = pnand %p3085_p2, %p3079_p13 }
  0x43   :  { %3089 = shalt.err (!%p3086_p3)
}
  0x44   :  { %32 = dma.hbm_to_vmem [thread:$0]  %s3695_s0, 1024, %s3301_s27, [#allocation4], %s3190_s29, %s3190_s29, %s3191_s30  }
  0x45   :  { %s3194_s12 = smov [#allocation8]   ;;  %s3195_s14 = smov [#allocation11]  }
  0x46   :  { %s50_s13 = sshll.u32 %s3194_s12, 4  ;;  %s76_s15 = sshll.u32 %s3195_s14, 4  ;;  %s51_s13 = int_to_ptr.vmem [resolvable:$true] %s50_s13  ;;  %s3338_s15 = int_to_ptr.vmem [resolvable:$true] %s76_s15 }
  0x47   :  { %s3090_s4 = scalar_lea.hbm %s3697_s2, 512 }
  0x48   :  { %p3091_p4 = scmp.ne.s32.totalorder %s3697_s2, %s3090_s4  ;;  %p3094_p5 = scmp.lt.u32.totalorder %s3090_s4, %s3697_s2 }
  0x4a   :  { %p3096_p6 = pnand %p3094_p5, %p3091_p4 }
  0x4c   :  { %3099 = shalt.err (!%p3096_p6)
}
  0x4d   :  { %s3100_s0 = scalar_lea.vmem %s51_s13, 512  ;;  %p3105_p8 = scmp.lt.s32.totalorder %s51_s13, %s51_s13 }
  0x4e   :  { %p3101_p7 = scmp.ne.s32.totalorder %s51_s13, %s3100_s0  ;;  %p3106_p9 = scmp.lt.s32.totalorder %s3100_s0, %s3100_s0 }
  0x50   :  { %p3107_p10 = por %p3106_p9, %p3105_p8 }
  0x52   :  { %p3108_p11 = pnand %p3107_p10, %p3101_p7 }
  0x54   :  { %3111 = shalt.err (!%p3108_p11)
}
  0x55   :  { %56 = dma.hbm_to_vmem [thread:$0]  %s3697_s2, 512, %s51_s13, [#allocation7], %s3190_s29, %s3190_s29, %s3191_s30  }
  0x56   :  { %s3112_s24 = scalar_lea.hbm %s3700_s5, 512 }
  0x57   :  { %p3113_p12 = scmp.ne.s32.totalorder %s3700_s5, %s3112_s24  ;;  %p3116_p13 = scmp.lt.u32.totalorder %s3112_s24, %s3700_s5 }
  0x59   :  { %p3118_p0 = pnand %p3116_p13, %p3113_p12 }
  0x5b   :  { %3121 = shalt.err (!%p3118_p0)
}
  0x5c   :  { %s3122_s12 = scalar_lea.vmem %s3338_s15, 512  ;;  %p3127_p2 = scmp.lt.s32.totalorder %s3338_s15, %s3338_s15 }
  0x5d   :  { %p3123_p1 = scmp.ne.s32.totalorder %s3338_s15, %s3122_s12  ;;  %p3128_p3 = scmp.lt.s32.totalorder %s3122_s12, %s3122_s12 }
  0x5f   :  { %p3129_p4 = por %p3128_p3, %p3127_p2 }
  0x61   :  { %p3130_p5 = pnand %p3129_p4, %p3123_p1 }
  0x63   :  { %3133 = shalt.err (!%p3130_p5)
}
  0x64   :  { %82 = dma.hbm_to_vmem [thread:$0]  %s3700_s5, 512, %s3338_s15, [#allocation10], %s3190_s29, %s3190_s29, %s3191_s30  }
  0x65   :  { %s3196_s14 = smov [#allocation14]   ;;  %s3134_s20 = scalar_lea.hbm %s3704_s9, 2048 }
  0x66   :  { %s104_s16 = sshll.u32 %s3196_s14, 4  ;;  %p3135_p6 = scmp.ne.s32.totalorder %s3704_s9, %s3134_s20  ;;  %s105_s16 = int_to_ptr.vmem [resolvable:$true] %s104_s16 }
  0x67   :  { %p3138_p7 = scmp.lt.u32.totalorder %s3134_s20, %s3704_s9 }
  0x69   :  { %p3140_p8 = pnand %p3138_p7, %p3135_p6 }
  0x6b   :  { %3143 = shalt.err (!%p3140_p8)
}
  0x6c   :  { %s3144_s27 = scalar_lea.vmem %s105_s16, 2048  ;;  %p3149_p10 = scmp.lt.s32.totalorder %s105_s16, %s105_s16 }
  0x6d   :  { %p3145_p9 = scmp.ne.s32.totalorder %s105_s16, %s3144_s27  ;;  %p3150_p11 = scmp.lt.s32.totalorder %s3144_s27, %s3144_s27 }
  0x6f   :  { %p3151_p12 = por %p3150_p11, %p3149_p10 }
  0x71   :  { %p3152_p13 = pnand %p3151_p12, %p3145_p9 }
  0x73   :  { %3155 = shalt.err (!%p3152_p13)
}
  0x74   :  { %110 = dma.hbm_to_vmem [thread:$0]  %s3704_s9, 2048, %s105_s16, [#allocation13], %s3190_s29, %s3190_s29, %s3191_s30  }
  0x75   :  { %3178 = dma.done.wait [#allocation4], 1024  }
  0x76   :  { %3179 = vsyncadd [#allocation4], 4294966272 }
  0x77   :  { %3180 = dma.done.wait [#allocation7], 1024  }
  0x78   :  { %3181 = vsyncadd [#allocation7], 4294966272 }
  0x79   :  { %3182 = dma.done.wait [#allocation10], 1024  }
  0x7a   :  { %3183 = vsyncadd [#allocation10], 4294966272 }
  0x7b   :  { %3184 = dma.done.wait [#allocation13], 3072  }
  0x7c   :  { %3185 = vsyncadd [#allocation13], 4294964224  ;;  %v3197_v0 = vmov 0.0|0.0   ;;  %vm3198_vm0 = vmmov 0   ;;  %v3199_v1 = vmov 0.0   ;;  %vm153_vm1 = vcmask 261120  }
  0x7d   :  { %2724 = vmatprep.subr.bf16.mxu1 %v3197_v0  ;;  %2479 = vmatprep.mubr.msk.f32.mxu1 %vm3198_vm0, %v3199_v1  ;;  %v142_v2 = vld [vmem:[#allocation6] sm:$0xff]  ;;  %v143_v3 = vld [vmem:[#allocation6 + $0x8] sm:$0xff]  ;;  %v144_v4 = vld [vmem:[#allocation6 + $0x10] sm:$0xff]  ;;  %s3201_s30 = smov 64   ;;  %vm2072_vm2 = vcmask 523264   ;;  %s3203_s7 = smov [#allocation15]  }
  0x7e   :  { %v2710_v5 = vpack.c.bf16 %v143_v3, %v142_v2  ;;  %v145_v6 = vld [vmem:[#allocation6 + $0x18] sm:$0xff]  ;;  %v134_v7 = vld [vmem:[#allocation3] sm:$0xff]  ;;  %v284_v10 = vld [vmem:[#allocation8 + $0x8] sm:$0xff]  ;;  %s2247_s25 = sshll.u32 %s3203_s7, 4  ;;  %s2248_s25 = int_to_ptr.vmem [resolvable:$true] %s2247_s25 }
  0x7f   :  { %v2714_v8 = vpack.c.bf16 %v145_v6, %v144_v4  ;;  %2448 = vmatprep.mubr.msk.f32.mxu0 %vm153_vm1, %v134_v7  ;;  %v283_v9 = vld [vmem:[#allocation8] sm:$0xff]  ;;  %v285_v12 = vld [vmem:[#allocation8 + $0x10] sm:$0xff]  ;;  %v286_v13 = vld [vmem:[#allocation8 + $0x18] sm:$0xff]  ;;  %s3156_s12 = scalar_lea.vmem %s2248_s25, 128  ;;  %p3161_p1 = scmp.lt.s32.totalorder %s2248_s25, %s2248_s25 }
  0x80   :  { %2711 = vmatprep.subr.bf16.mxu0 %v2710_v5  ;;  %v3394_v11 = vpack.c.bf16 %v284_v10, %v283_v9  ;;  %v3398_v14 = vpack.c.bf16 %v286_v13, %v285_v12  ;;  %v135_v15 = vld [vmem:[#allocation3 + $0x8] sm:$0xff]  ;;  %v136_v16 = vld [vmem:[#allocation3 + $0x10] sm:$0xff]  ;;  %v137_v17 = vld [vmem:[#allocation3 + $0x18] sm:$0xff]  ;;  %p3157_p0 = scmp.ne.s32.totalorder %s2248_s25, %s3156_s12  ;;  %p3162_p2 = scmp.lt.s32.totalorder %s3156_s12, %s3156_s12 }
  0x81   :  { %2713 = vmatpush3.bf16.msra.mxu0 %v2710_v5  ;;  %v138_v18 = vld [vmem:[#allocation3 + $0x20] sm:$0xff]  ;;  %v139_v19 = vld [vmem:[#allocation3 + $0x28] sm:$0xff]  ;;  %v140_v20 = vld [vmem:[#allocation3 + $0x30] sm:$0xff] }
  0x82   :  { %2715 = vmatprep.subr.bf16.mxu0 %v2714_v8  ;;  %2726 = vmatpush3.bf16.msra.mxu1 %v3394_v11  ;;  %v141_v21 = vld [vmem:[#allocation3 + $0x38] sm:$0xff]  ;;  %v2259_v22 = vld [vmem:[%s3698_s3] ss:$0 sm:$0xff]  ;;  %s3200_s3 = smov 32   ;;  %p3163_p3 = por %p3162_p2, %p3161_p1 }
  0x83   :  { %2727 = vmatprep.subr.bf16.mxu1 %v3197_v0 }
  0x84   :  { %p3164_p4 = pnand %p3163_p3, %p3157_p0 }
  0x85   :  { %2717 = vmatpush3.bf16.msra.mxu0 %v2714_v8 }
  0x86   :  { %2718 = vmatprep.subr.bf16.mxu0 %v3197_v0  ;;  %2729 = vmatpush3.bf16.msra.mxu1 %v3398_v14 }
  0x87   :  { %2736 = vmatprep.subr.bf16.mxu1 %v3197_v0 }
  0x88   :  { %2449 = vmatmul.mubr.msk.f32.vlgmr.msra.gmra.mrb[0].mxu0 %vm153_vm1, %v135_v15 }
  0x89   :  { %2720 = vmatpush3.bf16.msra.mxu0 %v3394_v11  ;;  %2451 = vmatprep.mubr.msk.f32.mxu0 %vm153_vm1, %v136_v16 }
  0x8a   :  { %2721 = vmatprep.subr.bf16.mxu0 %v3197_v0 }
  0x8c   :  { %2452 = vmatmul.mubr.msk.f32.gmra.mrb[2].mxu0 %vm153_vm1, %v137_v17 }
  0x8d   :  { %2454 = vmatprep.mubr.msk.f32.mxu0 %vm153_vm1, %v138_v18  ;;  %2723 = vmatpush3.bf16.msra.mxu0 %v3398_v14 }
  0x8e   :  { %2730 = vmatprep.subr.bf16.mxu0 %v3197_v0 }
  0x90   :  { %2455 = vmatmul.mubr.msk.f32.gmra.mrb[4].mxu0 %vm153_vm1, %v139_v19 }
  0x91   :  { %2457 = vmatprep.mubr.msk.f32.mxu0 %vm153_vm1, %v140_v20 }
  0x94   :  { %2458 = vmatmul.mubr.msk.f32.gmra.mrb[6].mxu0 %vm153_vm1, %v141_v21 }
  0x95   :  { %2468 = vmatprep.mubr.msk.f32.mxu0 %vm3198_vm0, %v3199_v1 }
  0x98   :  { %2469 = vmatmul.mubr.f32.vlgmr.msra.gmra.mrb[8].mxu0 %v3199_v1 }
  0x99   :  { %2732 = vmatpush3.bf16.msra.mxu0 %v3394_v11  ;;  %2490 = vmatprep.mubr.msk.f32.mxu0 %vm3198_vm0, %v3199_v1 }
  0x9a   :  { %2733 = vmatprep.subr.bf16.mxu0 %v3197_v0 }
  0x9d   :  { %2735 = vmatpush3.bf16.msra.mxu0 %v3398_v14 }
  0x9e   :  { %2742 = vmatprep.subr.bf16.mxu0 %v3197_v0 }
 0x15b   :  { %v2450_v23 = vpop.f32.mrb[0].mxu0 }
 0x15c   :  { %v250_v24 = vadd.f32 %v2450_v23, %v2259_v22  ;;  %v244_v25 = vpop.f32.mrb[1].mxu0 }
 0x15d   :  { %v245_v38 = vadd.f32 %v2259_v22, %v244_v25 }
 0x15f   :  { %v2453_v26 = vpop.f32.mrb[2].mxu0 }
 0x160   :  { %v3426_v27 = vadd.f32 %v2453_v26, %v2259_v22  ;;  %v254_v28 = vpop.f32.mrb[3].mxu0 }
 0x161   :  { %v3428_v29 = vadd.f32 %v2259_v22, %v254_v28 }
 0x163   :  { %v2456_v30 = vpop.f32.mrb[4].mxu0 }
 0x164   :  { %v3430_v31 = vadd.f32 %v2456_v30, %v2259_v22  ;;  %v264_v32 = vpop.f32.mrb[5].mxu0 }
 0x165   :  { %v3432_v33 = vadd.f32 %v2259_v22, %v264_v32 }
 0x167   :  { %v2459_v34 = vpop.f32.mrb[6].mxu0 }
 0x168   :  { %v3434_v35 = vadd.f32 %v2459_v34, %v2259_v22  ;;  %v274_v36 = vpop.f32.mrb[7].mxu0 }
 0x169   :  { %v3436_v37 = vadd.f32 %v2259_v22, %v274_v36 }
 0x16b   :  { %v356_v39 = vpop.f32.mrb[8].mxu0 }
 0x16c   :  { %v360_v40 = vadd.f32 %v356_v39, %v245_v38  ;;  %v2470_v41 = vpop.f32.mrb[9].mxu0 }
 0x16e   :  { %2874 = vtanh.f32 %v360_v40  ;;  %v2268_v43 = vmul.f32 -1.442695, %v360_v40 }
 0x170   :  { %2876 = vpow2.f32 %v2268_v43 }
 0x178   :  { %v2875_v42 = vpop.eup %2874 }
 0x179   :  { %370 = vrot.lane.b32.xlu0 %v2875_v42, %s3200_s3 }
 0x17a   :  { %v2877_v44 = vpop.eup %2876 }
 0x17b   :  { %v364_v45 = vadd.f32 1.0, %v2877_v44 }
 0x17d   :  { %2878 = vrcp.f32 %v364_v45 }
 0x187   :  { %v2879_v46 = vpop.eup %2878 }
 0x188   :  { %v368_v49 = vmul.f32 0.0, %v2879_v46 }
 0x1eb   :  { %v371_v47 = vpop.permute.xlu0 %370 }
 0x1ec   :  { %v373_v48 = vmul.f32 %v2879_v46, %v371_v47 }
 0x1ee   :  { %375 = vrot.lane.b32.xlu0 %v373_v48, %s3200_s3 }
 0x260   :  { %v376_v50 = vpop.permute.xlu0 %375 }
 0x261   :  { %v378_v51 = vadd.f32 %v376_v50, %v368_v49 }
 0x263   :  { %2880 = vtanh.f32 %v378_v51 }
 0x26d   :  { %v2881_v52 = vpop.eup %2880 }
 0x26e   :  { %381 = vrot.lane.b32.xlu1 %v2881_v52, %s3200_s3 }
 0x2e0   :  { %v382_v53 = vpop.permute.xlu1 %381 }
 0x2e1   :  { %v384_v54 = vmul.f32 %v2879_v46, %v382_v53 }
 0x2e3   :  { %386 = vrot.lane.b32.xlu1 %v384_v54, %s3201_s30 }
 0x355   :  { %v387_v55 = vpop.permute.xlu1 %386 }
 0x356   :  { %389 = vst.msk [vmem:[#allocation2] sm:$0xff] %vm153_vm1, %v387_v55  ;;  %2480 = vmatmul.mubr.msk.f32.vlgmr.msra.gmra.mrb[0].mxu1 %vm153_vm1, %v387_v55 }
 0x357   :  { %2738 = vmatpush3.bf16.msra.mxu1 %v3394_v11  ;;  %2501 = vmatprep.mubr.msk.f32.mxu1 %vm3198_vm0, %v3199_v1 }
 0x358   :  { %2739 = vmatprep.subr.bf16.mxu1 %v3197_v0 }
 0x35b   :  { %2741 = vmatpush3.bf16.msra.mxu1 %v3398_v14 }
 0x35c   :  { %2748 = vmatprep.subr.bf16.mxu1 %v3197_v0 }
 0x429   :  { %v458_v56 = vpop.f32.mrb[0].mxu1 }
 0x42a   :  { %v462_v57 = vadd.f32 %v458_v56, %v250_v24  ;;  %v2481_v58 = vpop.f32.mrb[1].mxu1 }
 0x42c   :  { %2882 = vtanh.f32 %v462_v57  ;;  %v2270_v60 = vmul.f32 -1.442695, %v462_v57 }
 0x42e   :  { %2884 = vpow2.f32 %v2270_v60 }
 0x436   :  { %v2883_v59 = vpop.eup %2882 }
 0x437   :  { %472 = vrot.lane.b32.xlu0 %v2883_v59, %s3200_s3 }
 0x438   :  { %v2885_v61 = vpop.eup %2884 }
 0x439   :  { %v466_v62 = vadd.f32 1.0, %v2885_v61 }
 0x43b   :  { %2886 = vrcp.f32 %v466_v62 }
 0x445   :  { %v2887_v63 = vpop.eup %2886 }
 0x446   :  { %v470_v4 = vmul.f32 %v2887_v63, %v378_v51 }
 0x4a9   :  { %v473_v2 = vpop.permute.xlu0 %472 }
 0x4aa   :  { %v475_v3 = vmul.f32 %v2887_v63, %v473_v2 }
 0x4ac   :  { %477 = vrot.lane.b32.xlu1 %v475_v3, %s3200_s3 }
 0x51e   :  { %v478_v5 = vpop.permute.xlu1 %477 }
 0x51f   :  { %v480_v6 = vadd.f32 %v478_v5, %v470_v4 }
 0x521   :  { %2888 = vtanh.f32 %v480_v6 }
 0x52b   :  { %v2889_v7 = vpop.eup %2888 }
 0x52c   :  { %483 = vrot.lane.b32.xlu0 %v2889_v7, %s3200_s3 }
 0x59e   :  { %v484_v8 = vpop.permute.xlu0 %483 }
 0x59f   :  { %v486_v9 = vmul.f32 %v2887_v63, %v484_v8 }
 0x5a1   :  { %488 = vrot.lane.b32.xlu1 %v486_v9, %s3201_s30 }
 0x613   :  { %v489_v10 = vpop.permute.xlu1 %488 }
 0x614   :  { %491 = vst.msk [vmem:[#allocation2 + $0x8] sm:$0xff] %vm153_vm1, %v489_v10  ;;  %2491 = vmatmul.mubr.msk.f32.vlgmr.msra.gmra.mrb[10].mxu0 %vm153_vm1, %v489_v10 }
 0x615   :  { %2744 = vmatpush3.bf16.msra.mxu0 %v3394_v11  ;;  %2512 = vmatprep.mubr.msk.f32.mxu0 %vm3198_vm0, %v3199_v1 }
 0x616   :  { %2745 = vmatprep.subr.bf16.mxu0 %v3197_v0 }
 0x619   :  { %2747 = vmatpush3.bf16.msra.mxu0 %v3398_v14 }
 0x61a   :  { %2754 = vmatprep.subr.bf16.mxu0 %v3197_v0 }
 0x6e7   :  { %v560_v12 = vpop.f32.mrb[10].mxu0 }
 0x6e8   :  { %v564_v13 = vadd.f32 %v560_v12, %v3428_v29  ;;  %v2492_v15 = vpop.f32.mrb[11].mxu0 }
 0x6ea   :  { %2890 = vtanh.f32 %v564_v13  ;;  %v2272_v17 = vmul.f32 -1.442695, %v564_v13 }
 0x6ec   :  { %2892 = vpow2.f32 %v2272_v17 }
 0x6f4   :  { %v2891_v16 = vpop.eup %2890 }
 0x6f5   :  { %574 = vrot.lane.b32.xlu0 %v2891_v16, %s3200_s3 }
 0x6f6   :  { %v2893_v18 = vpop.eup %2892 }
 0x6f7   :  { %v568_v19 = vadd.f32 1.0, %v2893_v18  ;;  %v1113_v18 = vld [vmem:[#allocation9 + $0x8] sm:$0xff] }
 0x6f9   :  { %2894 = vrcp.f32 %v568_v19 }
 0x703   :  { %v2895_v20 = vpop.eup %2894 }
 0x704   :  { %v572_v23 = vmul.f32 %v2895_v20, %v480_v6 }
 0x767   :  { %v575_v21 = vpop.permute.xlu0 %574 }
 0x768   :  { %v577_v22 = vmul.f32 %v2895_v20, %v575_v21 }
 0x76a   :  { %579 = vrot.lane.b32.xlu1 %v577_v22, %s3200_s3 }
 0x7dc   :  { %v580_v24 = vpop.permute.xlu1 %579 }
 0x7dd   :  { %v582_v25 = vadd.f32 %v580_v24, %v572_v23  ;;  %v1114_v23 = vld [vmem:[#allocation9 + $0x10] sm:$0xff]  ;;  %v1115_v24 = vld [vmem:[#allocation9 + $0x18] sm:$0xff] }
 0x7df   :  { %2896 = vtanh.f32 %v582_v25 }
 0x7e9   :  { %v2897_v26 = vpop.eup %2896 }
 0x7ea   :  { %585 = vrot.lane.b32.xlu0 %v2897_v26, %s3200_s3 }
 0x85c   :  { %v586_v28 = vpop.permute.xlu0 %585 }
 0x85d   :  { %v588_v29 = vmul.f32 %v2895_v20, %v586_v28  ;;  %v1104_v28 = vld [vmem:[#allocation2] sm:$0xff] }
 0x85f   :  { %590 = vrot.lane.b32.xlu1 %v588_v29, %s3201_s30  ;;  %v1105_v29 = vld [vmem:[#allocation2 + $0x8] sm:$0xff] }
 0x8d1   :  { %v591_v30 = vpop.permute.xlu1 %590 }
 0x8d2   :  { %593 = vst.msk [vmem:[#allocation2 + $0x10] sm:$0xff] %vm153_vm1, %v591_v30  ;;  %2502 = vmatmul.mubr.msk.f32.vlgmr.msra.gmra.mrb[2].mxu1 %vm153_vm1, %v591_v30 }
 0x8d3   :  { %2750 = vmatpush3.bf16.msra.mxu1 %v3394_v11  ;;  %2523 = vmatprep.mubr.msk.f32.mxu1 %vm3198_vm0, %v3199_v1 }
 0x8d4   :  { %2751 = vmatprep.subr.bf16.mxu1 %v3197_v0 }
 0x8d7   :  { %2753 = vmatpush3.bf16.msra.mxu1 %v3398_v14 }
 0x8d8   :  { %2760 = vmatprep.subr.bf16.mxu1 %v3197_v0 }
 0x8d9   :  { %v1106_v30 = vld [vmem:[#allocation2 + $0x10] sm:$0xff] }
 0x9a5   :  { %v662_v32 = vpop.f32.mrb[2].mxu1 }
 0x9a6   :  { %v666_v34 = vadd.f32 %v662_v32, %v3426_v27  ;;  %v2503_v36 = vpop.f32.mrb[3].mxu1 }
 0x9a8   :  { %2898 = vtanh.f32 %v666_v34  ;;  %v2274_v39 = vmul.f32 -1.442695, %v666_v34 }
 0x9aa   :  { %2900 = vpow2.f32 %v2274_v39 }
 0x9b2   :  { %v2899_v38 = vpop.eup %2898 }
 0x9b3   :  { %676 = vrot.lane.b32.xlu0 %v2899_v38, %s3200_s3 }
 0x9b4   :  { %v2901_v40 = vpop.eup %2900 }
 0x9b5   :  { %v670_v41 = vadd.f32 1.0, %v2901_v40 }
 0x9b7   :  { %2902 = vrcp.f32 %v670_v41 }
 0x9c1   :  { %v2903_v42 = vpop.eup %2902 }
 0x9c2   :  { %v674_v45 = vmul.f32 %v2903_v42, %v582_v25  ;;  %v2770_v25 = vpack.c.bf16 %v1115_v24, %v1114_v23 }
 0xa25   :  { %v677_v43 = vpop.permute.xlu0 %676 }
 0xa26   :  { %v679_v44 = vmul.f32 %v2903_v42, %v677_v43 }
 0xa28   :  { %681 = vrot.lane.b32.xlu1 %v679_v44, %s3200_s3 }
 0xa9a   :  { %v682_v46 = vpop.permute.xlu1 %681 }
 0xa9b   :  { %v684_v47 = vadd.f32 %v682_v46, %v674_v45 }
 0xa9d   :  { %2904 = vtanh.f32 %v684_v47 }
 0xaa7   :  { %v2905_v27 = vpop.eup %2904 }
 0xaa8   :  { %687 = vrot.lane.b32.xlu0 %v2905_v27, %s3200_s3 }
 0xb1a   :  { %v688_v48 = vpop.permute.xlu0 %687 }
 0xb1b   :  { %v690_v49 = vmul.f32 %v2903_v42, %v688_v48 }
 0xb1d   :  { %692 = vrot.lane.b32.xlu1 %v690_v49, %s3201_s30 }
 0xb8f   :  { %v693_v50 = vpop.permute.xlu1 %692 }
 0xb90   :  { %695 = vst.msk [vmem:[#allocation2 + $0x18] sm:$0xff] %vm153_vm1, %v693_v50  ;;  %2513 = vmatmul.mubr.msk.f32.vlgmr.msra.gmra.mrb[12].mxu0 %vm153_vm1, %v693_v50 }
 0xb91   :  { %2756 = vmatpush3.bf16.msra.mxu0 %v3394_v11  ;;  %2534 = vmatprep.mubr.msk.f32.mxu0 %vm3198_vm0, %v3199_v1 }
 0xb92   :  { %2757 = vmatprep.subr.bf16.mxu0 %v3197_v0 }
 0xb95   :  { %2759 = vmatpush3.bf16.msra.mxu0 %v3398_v14 }
 0xb97   :  { %v1107_v32 = vld [vmem:[#allocation2 + $0x18] sm:$0xff] }
 0xc63   :  { %v764_v51 = vpop.f32.mrb[12].mxu0 }
 0xc64   :  { %v768_v52 = vadd.f32 %v764_v51, %v3432_v33  ;;  %v2514_v53 = vpop.f32.mrb[13].mxu0 }
 0xc66   :  { %2906 = vtanh.f32 %v768_v52  ;;  %v2276_v55 = vmul.f32 -1.442695, %v768_v52 }
 0xc68   :  { %2908 = vpow2.f32 %v2276_v55 }
 0xc70   :  { %v2907_v54 = vpop.eup %2906 }
 0xc71   :  { %778 = vrot.lane.b32.xlu0 %v2907_v54, %s3200_s3 }
 0xc72   :  { %v2909_v56 = vpop.eup %2908 }
 0xc73   :  { %v772_v57 = vadd.f32 1.0, %v2909_v56  ;;  %v1252_v56 = vld [vmem:[#allocation11] sm:$0xff] }
 0xc75   :  { %2910 = vrcp.f32 %v772_v57  ;;  %v1253_v57 = vld [vmem:[#allocation11 + $0x8] sm:$0xff] }
 0xc7f   :  { %v2911_v58 = vpop.eup %2910 }
 0xc80   :  { %v776_v61 = vmul.f32 %v2911_v58, %v684_v47 }
 0xce3   :  { %v779_v59 = vpop.permute.xlu0 %778 }
 0xce4   :  { %v781_v60 = vmul.f32 %v2911_v58, %v779_v59  ;;  %v1254_v59 = vld [vmem:[#allocation11 + $0x10] sm:$0xff] }
 0xce6   :  { %783 = vrot.lane.b32.xlu1 %v781_v60, %s3200_s3  ;;  %v1255_v60 = vld [vmem:[#allocation11 + $0x18] sm:$0xff] }
 0xd58   :  { %v784_v62 = vpop.permute.xlu1 %783 }
 0xd59   :  { %v786_v63 = vadd.f32 %v784_v62, %v776_v61  ;;  %v3535_v61 = vpack.c.bf16 %v1255_v60, %v1254_v59 }
 0xd5b   :  { %2912 = vtanh.f32 %v786_v63 }
 0xd65   :  { %v2913_v33 = vpop.eup %2912 }
 0xd66   :  { %789 = vrot.lane.b32.xlu0 %v2913_v33, %s3200_s3 }
 0xdd8   :  { %v790_v2 = vpop.permute.xlu0 %789 }
 0xdd9   :  { %v792_v3 = vmul.f32 %v2911_v58, %v790_v2  ;;  %v3531_v58 = vpack.c.bf16 %v1253_v57, %v1252_v56 }
 0xddb   :  { %794 = vrot.lane.b32.xlu1 %v792_v3, %s3201_s30 }
 0xe4d   :  { %v795_v4 = vpop.permute.xlu1 %794 }
 0xe4e   :  { %797 = vst.msk [vmem:[#allocation2 + $0x20] sm:$0xff] %vm153_vm1, %v795_v4  ;;  %2524 = vmatmul.mubr.msk.f32.vlgmr.msra.gmra.mrb[4].mxu1 %vm153_vm1, %v795_v4 }
 0xe4f   :  { %2762 = vmatpush3.bf16.msra.mxu1 %v3394_v11  ;;  %2545 = vmatprep.mubr.msk.f32.mxu1 %vm3198_vm0, %v3199_v1 }
 0xe50   :  { %2763 = vmatprep.subr.bf16.mxu1 %v3197_v0 }
 0xe53   :  { %2765 = vmatpush3.bf16.msra.mxu1 %v3398_v14 }
 0xe54   :  { %2774 = vmatprep.subr.bf16.mxu1 %v3197_v0 }
 0xe55   :  { %v1108_v34 = vld [vmem:[#allocation2 + $0x20] sm:$0xff] }
 0xf21   :  { %v866_v5 = vpop.f32.mrb[4].mxu1 }
 0xf22   :  { %v870_v6 = vadd.f32 %v866_v5, %v3430_v31  ;;  %v2525_v7 = vpop.f32.mrb[5].mxu1  ;;  %v1112_v31 = vld [vmem:[#allocation9] sm:$0xff] }
 0xf23   :  { %v2766_v19 = vpack.c.bf16 %v1113_v18, %v1112_v31 }
 0xf24   :  { %2914 = vtanh.f32 %v870_v6  ;;  %v2278_v9 = vmul.f32 -1.442695, %v870_v6  ;;  %v3560_v6 = vld [vmem:[%s3701_s6] ss:$0 sm:$0xff]  ;;  %s3202_s6 = smov 96  }
 0xf25   :  { %2767 = vmatprep.subr.bf16.mxu0 %v2766_v19 }
 0xf26   :  { %2916 = vpow2.f32 %v2278_v9 }
 0xf2e   :  { %v2915_v8 = vpop.eup %2914 }
 0xf2f   :  { %880 = vrot.lane.b32.xlu0 %v2915_v8, %s3200_s3 }
 0xf30   :  { %v2917_v11 = vpop.eup %2916 }
 0xf31   :  { %v874_v10 = vadd.f32 1.0, %v2917_v11 }
 0xf33   :  { %2918 = vrcp.f32 %v874_v10 }
 0xf3d   :  { %v2919_v12 = vpop.eup %2918 }
 0xf3e   :  { %v878_v14 = vmul.f32 %v2919_v12, %v786_v63 }
 0xfa1   :  { %v881_v13 = vpop.permute.xlu0 %880 }
 0xfa2   :  { %v883_v15 = vmul.f32 %v2919_v12, %v881_v13 }
 0xfa4   :  { %885 = vrot.lane.b32.xlu1 %v883_v15, %s3200_s3 }
0x1016   :  { %v886_v16 = vpop.permute.xlu1 %885 }
0x1017   :  { %v888_v17 = vadd.f32 %v886_v16, %v878_v14 }
0x1019   :  { %2920 = vtanh.f32 %v888_v17 }
0x1023   :  { %v2921_v20 = vpop.eup %2920 }
0x1024   :  { %891 = vrot.lane.b32.xlu0 %v2921_v20, %s3200_s3 }
0x1096   :  { %v892_v21 = vpop.permute.xlu0 %891 }
0x1097   :  { %v894_v22 = vmul.f32 %v2919_v12, %v892_v21 }
0x1099   :  { %896 = vrot.lane.b32.xlu1 %v894_v22, %s3201_s30 }
0x110b   :  { %v897_v26 = vpop.permute.xlu1 %896 }
0x110c   :  { %899 = vst.msk [vmem:[#allocation2 + $0x28] sm:$0xff] %vm153_vm1, %v897_v26  ;;  %2535 = vmatmul.mubr.msk.f32.vlgmr.msra.gmra.mrb[14].mxu0 %vm153_vm1, %v897_v26 }
0x110d   :  { %2769 = vmatpush3.bf16.msra.mxu0 %v2766_v19  ;;  %2556 = vmatprep.mubr.msk.f32.mxu0 %vm153_vm1, %v1104_v28 }
0x110e   :  { %2771 = vmatprep.subr.bf16.mxu0 %v2770_v25 }
0x1111   :  { %2773 = vmatpush3.bf16.msra.mxu0 %v2770_v25 }
0x1112   :  { %2786 = vmatprep.subr.bf16.mxu0 %v3197_v0 }
0x1113   :  { %v1109_v36 = vld [vmem:[#allocation2 + $0x28] sm:$0xff] }
0x1114   :  { %2557 = vmatmul.mubr.msk.f32.vlgmr.msra.gmra.mrb[16].mxu0 %vm153_vm1, %v1105_v29 }
0x1115   :  { %2559 = vmatprep.mubr.msk.f32.mxu0 %vm153_vm1, %v1106_v30  ;;  %2788 = vmatpush3.bf16.msra.mxu0 %v3531_v58 }
0x1116   :  { %2789 = vmatprep.subr.bf16.mxu0 %v3197_v0 }
0x1118   :  { %2560 = vmatmul.mubr.msk.f32.gmra.mrb[18].mxu0 %vm153_vm1, %v1107_v32 }
0x1119   :  { %2562 = vmatprep.mubr.msk.f32.mxu0 %vm153_vm1, %v1108_v34  ;;  %2791 = vmatpush3.bf16.msra.mxu0 %v3535_v61 }
0x111a   :  { %2798 = vmatprep.subr.bf16.mxu0 %v3197_v0 }
0x111c   :  { %2563 = vmatmul.mubr.msk.f32.gmra.mrb[20].mxu0 %vm153_vm1, %v1109_v36 }
0x11df   :  { %v968_v38 = vpop.f32.mrb[14].mxu0 }
0x11e0   :  { %v972_v39 = vadd.f32 %v968_v38, %v3436_v37  ;;  %v2536_v40 = vpop.f32.mrb[15].mxu0 }
0x11e2   :  { %2922 = vtanh.f32 %v972_v39  ;;  %v2280_v27 = vmul.f32 -1.442695, %v972_v39 }
0x11e4   :  { %2924 = vpow2.f32 %v2280_v27 }
0x11e7   :  { %v3515_v41 = vpop.f32.mrb[16].mxu0 }
0x11e8   :  { %v1213_v42 = vpop.f32.mrb[17].mxu0 }
0x11e9   :  { %v1214_v7 = vadd.f32 %v3560_v6, %v1213_v42  ;;  %v1219_v42 = vadd.f32 %v3515_v41, %v3560_v6 }
0x11eb   :  { %v3517_v43 = vpop.f32.mrb[18].mxu0 }
0x11ec   :  { %v2923_v44 = vpop.eup %2922  ;;  %v3519_v45 = vpop.f32.mrb[19].mxu0 }
0x11ed   :  { %982 = vrot.lane.b32.xlu0 %v2923_v44, %s3200_s3 }
0x11ee   :  { %v2925_v48 = vpop.eup %2924 }
0x11ef   :  { %v3522_v46 = vpop.f32.mrb[20].mxu0  ;;  %v976_v37 = vadd.f32 1.0, %v2925_v48 }
0x11f0   :  { %v3524_v47 = vpop.f32.mrb[21].mxu0 }
0x11f1   :  { %2926 = vrcp.f32 %v976_v37 }
0x11fb   :  { %v2927_v49 = vpop.eup %2926 }
0x11fc   :  { %v980_v52 = vmul.f32 %v2927_v49, %v888_v17 }
0x125f   :  { %v983_v50 = vpop.permute.xlu0 %982 }
0x1260   :  { %v985_v51 = vmul.f32 %v2927_v49, %v983_v50 }
0x1262   :  { %987 = vrot.lane.b32.xlu1 %v985_v51, %s3200_s3 }
0x12d4   :  { %v988_v53 = vpop.permute.xlu1 %987 }
0x12d5   :  { %v3527_v54 = vadd.f32 %v988_v53, %v980_v52 }
0x12d7   :  { %2928 = vtanh.f32 %v3527_v54 }
0x12e1   :  { %v2929_v55 = vpop.eup %2928 }
0x12e2   :  { %993 = vrot.lane.b32.xlu0 %v2929_v55, %s3200_s3 }
0x1354   :  { %v994_v62 = vpop.permute.xlu0 %993 }
0x1355   :  { %v996_v63 = vmul.f32 %v2927_v49, %v994_v62 }
0x1357   :  { %998 = vrot.lane.b32.xlu1 %v996_v63, %s3201_s30 }
0x13c9   :  { %v999_v33 = vpop.permute.xlu1 %998 }
0x13ca   :  { %1001 = vst.msk [vmem:[#allocation2 + $0x30] sm:$0xff] %vm153_vm1, %v999_v33  ;;  %2546 = vmatmul.mubr.msk.f32.vlgmr.msra.gmra.mrb[6].mxu1 %vm153_vm1, %v999_v33 }
0x13cb   :  { %2776 = vmatpush3.bf16.msra.mxu1 %v3531_v58  ;;  %2576 = vmatprep.mubr.msk.f32.mxu1 %vm3198_vm0, %v3199_v1 }
0x13cc   :  { %2777 = vmatprep.subr.bf16.mxu1 %v3197_v0 }
0x13cf   :  { %2779 = vmatpush3.bf16.msra.mxu1 %v3535_v61 }
0x13d0   :  { %2780 = vmatprep.subr.bf16.mxu1 %v3197_v0 }
0x13d1   :  { %v1110_v2 = vld [vmem:[#allocation2 + $0x30] sm:$0xff] }
0x13d2   :  { %2577 = vmatmul.mubr.f32.vlgmr.msra.gmra.mrb[8].mxu1 %v3199_v1  ;;  %2565 = vmatprep.mubr.msk.f32.mxu0 %vm153_vm1, %v1110_v2 }
0x13d3   :  { %2782 = vmatpush3.bf16.msra.mxu1 %v3531_v58  ;;  %2587 = vmatprep.mubr.msk.f32.mxu1 %vm3198_vm0, %v3199_v1 }
0x13d4   :  { %2783 = vmatprep.subr.bf16.mxu1 %v3197_v0 }
0x13d7   :  { %2785 = vmatpush3.bf16.msra.mxu1 %v3535_v61 }
0x13d8   :  { %2792 = vmatprep.subr.bf16.mxu1 %v3197_v0 }
0x149d   :  { %v1070_v3 = vpop.f32.mrb[6].mxu1 }
0x149e   :  { %v1074_v4 = vadd.f32 %v1070_v3, %v3434_v35  ;;  %v2547_v5 = vpop.f32.mrb[7].mxu1 }
0x14a0   :  { %v2282_v21 = vmul.f32 -1.442695, %v1074_v4 }
0x14a5   :  { %v1322_v8 = vpop.f32.mrb[8].mxu1 }
0x14a6   :  { %v1326_v9 = vadd.f32 %v1322_v8, %v1214_v7  ;;  %v2578_v11 = vpop.f32.mrb[9].mxu1 }
0x14a8   :  { %2930 = vtanh.f32 %v1326_v9  ;;  %v2292_v12 = vmul.f32 -1.442695, %v1326_v9 }
0x14aa   :  { %2932 = vpow2.f32 %v2292_v12 }
0x14b2   :  { %v2931_v10 = vpop.eup %2930 }
0x14b3   :  { %1336 = vrot.lane.b32.xlu0 %v2931_v10, %s3200_s3 }
0x14b4   :  { %v2933_v13 = vpop.eup %2932 }
0x14b5   :  { %v1330_v15 = vadd.f32 1.0, %v2933_v13 }
0x14b7   :  { %2934 = vrcp.f32 %v1330_v15 }
0x14c1   :  { %v2935_v35 = vpop.eup %2934 }
0x14c2   :  { %v1334_v17 = vmul.f32 0.0, %v2935_v35 }
0x1525   :  { %v1337_v14 = vpop.permute.xlu0 %1336 }
0x1526   :  { %v1339_v16 = vmul.f32 %v2935_v35, %v1337_v14 }
0x1528   :  { %1341 = vrot.lane.b32.xlu1 %v1339_v16, %s3200_s3 }
0x159a   :  { %v1342_v31 = vpop.permute.xlu1 %1341 }
0x159b   :  { %v1344_v18 = vadd.f32 %v1342_v31, %v1334_v17 }
0x159d   :  { %2936 = vtanh.f32 %v1344_v18 }
0x159e   :  { %2938 = vtanh.f32 %v1074_v4  ;;  %v1224_v4 = vadd.f32 %v3560_v6, %v3519_v45 }
0x159f   :  { %2940 = vpow2.f32 %v2282_v21 }
0x15a7   :  { %v2937_v19 = vpop.eup %2936 }
0x15a8   :  { %1347 = vrot.lane.b32.xlu0 %v2937_v19, %s3200_s3  ;;  %v2939_v20 = vpop.eup %2938 }
0x15a9   :  { %v2941_v22 = vpop.eup %2940 }
0x15aa   :  { %v1078_v23 = vadd.f32 1.0, %v2941_v22 }
0x15ac   :  { %1084 = vrot.lane.b32.xlu0 %v2939_v20, %s3200_s3  ;;  %2942 = vrcp.f32 %v1078_v23  ;;  %v1229_v20 = vadd.f32 %v3517_v43, %v3560_v6 }
0x15b6   :  { %v2943_v26 = vpop.eup %2942 }
0x15b7   :  { %v1082_v32 = vmul.f32 %v2943_v26, %v3527_v54 }
0x161a   :  { %v1348_v24 = vpop.permute.xlu0 %1347 }
0x161b   :  { %v1350_v25 = vmul.f32 %v2935_v35, %v1348_v24 }
0x161d   :  { %1352 = vrot.lane.b32.xlu1 %v1350_v25, %s3201_s30 }
0x161e   :  { %v1085_v28 = vpop.permute.xlu0 %1084 }
0x161f   :  { %v1087_v29 = vmul.f32 %v2943_v26, %v1085_v28 }
0x1621   :  { %1089 = vrot.lane.b32.xlu0 %v1087_v29, %s3200_s3 }
0x168f   :  { %v1353_v30 = vpop.permute.xlu1 %1352 }
0x1690   :  { %2588 = vmatmul.mubr.msk.f32.vlgmr.msra.gmra.mrb[10].mxu1 %vm153_vm1, %v1353_v30 }
0x1691   :  { %2794 = vmatpush3.bf16.msra.mxu1 %v3531_v58  ;;  %2609 = vmatprep.mubr.msk.f32.mxu1 %vm3198_vm0, %v3199_v1 }
0x1692   :  { %2795 = vmatprep.subr.bf16.mxu1 %v3197_v0 }
0x1693   :  { %v1090_v34 = vpop.permute.xlu0 %1089 }
0x1694   :  { %v1092_v36 = vadd.f32 %v1090_v34, %v1082_v32 }
0x1695   :  { %2797 = vmatpush3.bf16.msra.mxu1 %v3535_v61 }
0x1696   :  { %2944 = vtanh.f32 %v1092_v36  ;;  %2804 = vmatprep.subr.bf16.mxu1 %v3197_v0 }
0x16a0   :  { %v2945_v38 = vpop.eup %2944 }
0x16a1   :  { %1095 = vrot.lane.b32.xlu0 %v2945_v38, %s3200_s3 }
0x1713   :  { %v1096_v39 = vpop.permute.xlu0 %1095 }
0x1714   :  { %v1098_v40 = vmul.f32 %v2943_v26, %v1096_v39 }
0x1716   :  { %1100 = vrot.lane.b32.xlu0 %v1098_v40, %s3201_s30 }
0x1763   :  { %v1422_v44 = vpop.f32.mrb[10].mxu1 }
0x1764   :  { %v1426_v27 = vadd.f32 %v1422_v44, %v1219_v42  ;;  %v2589_v48 = vpop.f32.mrb[11].mxu1  ;;  %v1234_v44 = vadd.f32 %v3560_v6, %v3524_v47 }
0x1766   :  { %2946 = vtanh.f32 %v1426_v27  ;;  %v2294_v51 = vmul.f32 -1.442695, %v1426_v27 }
0x1768   :  { %2948 = vpow2.f32 %v2294_v51 }
0x1770   :  { %v2947_v37 = vpop.eup %2946 }
0x1771   :  { %1436 = vrot.lane.b32.xlu1 %v2947_v37, %s3200_s3 }
0x1772   :  { %v2949_v41 = vpop.eup %2948 }
0x1773   :  { %v1430_v52 = vadd.f32 1.0, %v2949_v41 }
0x1775   :  { %2950 = vrcp.f32 %v1430_v52 }
0x177f   :  { %v2951_v53 = vpop.eup %2950 }
0x1780   :  { %v1434_v56 = vmul.f32 %v2951_v53, %v1344_v18 }
0x1788   :  { %v3582_v49 = vpop.permute.xlu0 %1100 }
0x1789   :  { %1103 = vst.msk [vmem:[#allocation2 + $0x38] sm:$0xff] %vm153_vm1, %v3582_v49 }
0x1790   :  { %v1111_v50 = vld [vmem:[#allocation2 + $0x38] sm:$0xff] }
0x1791   :  { %2566 = vmatmul.mubr.msk.f32.gmra.mrb[22].mxu0 %vm153_vm1, %v1111_v50 }
0x1792   :  { %2598 = vmatprep.mubr.msk.f32.mxu0 %vm3198_vm0, %v3199_v1 }
0x17e3   :  { %v1437_v54 = vpop.permute.xlu1 %1436 }
0x17e4   :  { %v1439_v55 = vmul.f32 %v2951_v53, %v1437_v54 }
0x17e6   :  { %1441 = vrot.lane.b32.xlu1 %v1439_v55, %s3200_s3 }
0x1858   :  { %v1442_v57 = vpop.permute.xlu1 %1441 }
0x1859   :  { %v1444_v59 = vadd.f32 %v1442_v57, %v1434_v56 }
0x185b   :  { %2952 = vtanh.f32 %v1444_v59 }
0x1864   :  { %v3590_v60 = vpop.f32.mrb[22].mxu0 }
0x1865   :  { %v2953_v62 = vpop.eup %2952  ;;  %v3592_v63 = vpop.f32.mrb[23].mxu0 }
0x1866   :  { %1447 = vrot.lane.b32.xlu1 %v2953_v62, %s3200_s3 }
0x18d8   :  { %v1448_v33 = vpop.permute.xlu1 %1447 }
0x18d9   :  { %v1450_v2 = vmul.f32 %v2951_v53, %v1448_v33 }
0x18db   :  { %1452 = vrot.lane.b32.xlu1 %v1450_v2, %s3201_s30 }
0x194d   :  { %v1453_v3 = vpop.permute.xlu1 %1452 }
0x194e   :  { %2599 = vmatmul.mubr.msk.f32.vlgmr.msra.gmra.mrb[24].mxu0 %vm153_vm1, %v1453_v3  ;;  %v1239_v3 = vadd.f32 %v3522_v46, %v3560_v6 }
0x194f   :  { %2800 = vmatpush3.bf16.msra.mxu0 %v3531_v58  ;;  %2620 = vmatprep.mubr.msk.f32.mxu0 %vm3198_vm0, %v3199_v1 }
0x1950   :  { %2801 = vmatprep.subr.bf16.mxu0 %v3197_v0 }
0x1953   :  { %2803 = vmatpush3.bf16.msra.mxu0 %v3535_v61 }
0x1954   :  { %2810 = vmatprep.subr.bf16.mxu0 %v3197_v0 }
0x1a21   :  { %v1522_v5 = vpop.f32.mrb[24].mxu0 }
0x1a22   :  { %v1526_v7 = vadd.f32 %v1522_v5, %v1224_v4  ;;  %v2600_v8 = vpop.f32.mrb[25].mxu0 }
0x1a24   :  { %2954 = vtanh.f32 %v1526_v7  ;;  %v2296_v11 = vmul.f32 -1.442695, %v1526_v7 }
0x1a26   :  { %2956 = vpow2.f32 %v2296_v11 }
0x1a2e   :  { %v2955_v9 = vpop.eup %2954 }
0x1a2f   :  { %1536 = vrot.lane.b32.xlu0 %v2955_v9, %s3200_s3 }
0x1a30   :  { %v2957_v10 = vpop.eup %2956 }
0x1a31   :  { %v1530_v12 = vadd.f32 1.0, %v2957_v10 }
0x1a33   :  { %2958 = vrcp.f32 %v1530_v12 }
0x1a3d   :  { %v2959_v13 = vpop.eup %2958 }
0x1a3e   :  { %v1534_v14 = vmul.f32 %v2959_v13, %v1444_v59 }
0x1aa1   :  { %v1537_v15 = vpop.permute.xlu0 %1536 }
0x1aa2   :  { %v1539_v35 = vmul.f32 %v2959_v13, %v1537_v15 }
0x1aa4   :  { %1541 = vrot.lane.b32.xlu1 %v1539_v35, %s3200_s3 }
0x1b16   :  { %v1542_v16 = vpop.permute.xlu1 %1541 }
0x1b17   :  { %v1544_v45 = vadd.f32 %v1542_v16, %v1534_v14 }
0x1b19   :  { %2960 = vtanh.f32 %v1544_v45 }
0x1b23   :  { %v2961_v17 = vpop.eup %2960 }
0x1b24   :  { %1547 = vrot.lane.b32.xlu0 %v2961_v17, %s3200_s3  ;;  %v1244_v17 = vadd.f32 %v3560_v6, %v3592_v63 }
0x1b96   :  { %v1548_v31 = vpop.permute.xlu0 %1547 }
0x1b97   :  { %v1550_v18 = vmul.f32 %v2959_v13, %v1548_v31 }
0x1b99   :  { %1552 = vrot.lane.b32.xlu1 %v1550_v18, %s3201_s30 }
0x1c0b   :  { %v1553_v19 = vpop.permute.xlu1 %1552 }
0x1c0c   :  { %2610 = vmatmul.mubr.msk.f32.vlgmr.msra.gmra.mrb[12].mxu1 %vm153_vm1, %v1553_v19 }
0x1c0d   :  { %2806 = vmatpush3.bf16.msra.mxu1 %v3531_v58  ;;  %2631 = vmatprep.mubr.msk.f32.mxu1 %vm3198_vm0, %v3199_v1 }
0x1c0e   :  { %2807 = vmatprep.subr.bf16.mxu1 %v3197_v0 }
0x1c11   :  { %2809 = vmatpush3.bf16.msra.mxu1 %v3535_v61 }
0x1c12   :  { %2816 = vmatprep.subr.bf16.mxu1 %v3197_v0 }
0x1cdf   :  { %v1622_v21 = vpop.f32.mrb[12].mxu1 }
0x1ce0   :  { %v1626_v22 = vadd.f32 %v1622_v21, %v1229_v20  ;;  %v2611_v23 = vpop.f32.mrb[13].mxu1 }
0x1ce2   :  { %2962 = vtanh.f32 %v1626_v22  ;;  %v2298_v25 = vmul.f32 -1.442695, %v1626_v22 }
0x1ce4   :  { %2964 = vpow2.f32 %v2298_v25 }
0x1cec   :  { %v2963_v24 = vpop.eup %2962 }
0x1ced   :  { %1636 = vrot.lane.b32.xlu0 %v2963_v24, %s3200_s3 }
0x1cee   :  { %v2965_v26 = vpop.eup %2964 }
0x1cef   :  { %v1630_v28 = vadd.f32 1.0, %v2965_v26 }
0x1cf1   :  { %2966 = vrcp.f32 %v1630_v28 }
0x1cfb   :  { %v2967_v29 = vpop.eup %2966 }
0x1cfc   :  { %v1634_v34 = vmul.f32 %v2967_v29, %v1544_v45 }
0x1d5f   :  { %v1637_v30 = vpop.permute.xlu0 %1636 }
0x1d60   :  { %v1639_v32 = vmul.f32 %v2967_v29, %v1637_v30 }
0x1d62   :  { %1641 = vrot.lane.b32.xlu1 %v1639_v32, %s3200_s3 }
0x1dd4   :  { %v1642_v36 = vpop.permute.xlu1 %1641 }
0x1dd5   :  { %v1644_v43 = vadd.f32 %v1642_v36, %v1634_v34 }
0x1dd7   :  { %2968 = vtanh.f32 %v1644_v43 }
0x1de1   :  { %v2969_v38 = vpop.eup %2968 }
0x1de2   :  { %1647 = vrot.lane.b32.xlu0 %v2969_v38, %s3200_s3 }
0x1e54   :  { %v1648_v39 = vpop.permute.xlu0 %1647 }
0x1e55   :  { %v1650_v40 = vmul.f32 %v2967_v29, %v1648_v39 }
0x1e57   :  { %1652 = vrot.lane.b32.xlu1 %v1650_v40, %s3201_s30 }
0x1ec9   :  { %v1653_v42 = vpop.permute.xlu1 %1652 }
0x1eca   :  { %2621 = vmatmul.mubr.msk.f32.vlgmr.msra.gmra.mrb[26].mxu0 %vm153_vm1, %v1653_v42 }
0x1ecb   :  { %2812 = vmatpush3.bf16.msra.mxu0 %v3531_v58  ;;  %2642 = vmatprep.mubr.msk.f32.mxu0 %vm3198_vm0, %v3199_v1 }
0x1ecc   :  { %2813 = vmatprep.subr.bf16.mxu0 %v3197_v0 }
0x1ecf   :  { %2815 = vmatpush3.bf16.msra.mxu0 %v3535_v61 }
0x1ed0   :  { %2822 = vmatprep.subr.bf16.mxu0 %v3197_v0 }
0x1f9d   :  { %v1722_v27 = vpop.f32.mrb[26].mxu0 }
0x1f9e   :  { %v1726_v48 = vadd.f32 %v1722_v27, %v1234_v44  ;;  %v2622_v37 = vpop.f32.mrb[27].mxu0 }
0x1fa0   :  { %2970 = vtanh.f32 %v1726_v48  ;;  %v2300_v51 = vmul.f32 -1.442695, %v1726_v48 }
0x1fa2   :  { %2972 = vpow2.f32 %v2300_v51 }
0x1faa   :  { %v2971_v50 = vpop.eup %2970 }
0x1fab   :  { %1736 = vrot.lane.b32.xlu0 %v2971_v50, %s3200_s3 }
0x1fac   :  { %v2973_v41 = vpop.eup %2972 }
0x1fad   :  { %v1730_v52 = vadd.f32 1.0, %v2973_v41 }
0x1faf   :  { %2974 = vrcp.f32 %v1730_v52  ;;  %v2058_v52 = vld [vmem:[#allocation12 + $0x8] sm:$0xff] }
0x1fb9   :  { %v2975_v53 = vpop.eup %2974 }
0x1fba   :  { %v1734_v56 = vmul.f32 %v2975_v53, %v1644_v43  ;;  %v1249_v43 = vadd.f32 %v3590_v60, %v3560_v6  ;;  %v2057_v60 = vld [vmem:[#allocation12] sm:$0xff] }
0x201d   :  { %v1737_v54 = vpop.permute.xlu0 %1736 }
0x201e   :  { %v1739_v55 = vmul.f32 %v2975_v53, %v1737_v54  ;;  %v2823_v54 = vpack.c.bf16 %v2058_v52, %v2057_v60 }
0x2020   :  { %1741 = vrot.lane.b32.xlu1 %v1739_v55, %s3200_s3  ;;  %v2060_v55 = vld [vmem:[#allocation12 + $0x18] sm:$0xff] }
0x2092   :  { %v1742_v57 = vpop.permute.xlu1 %1741 }
0x2093   :  { %v1744_v47 = vadd.f32 %v1742_v57, %v1734_v56  ;;  %v2061_v57 = vld [vmem:[#allocation12 + $0x20] sm:$0xff] }
0x2095   :  { %2976 = vtanh.f32 %v1744_v47 }
0x209f   :  { %v2977_v59 = vpop.eup %2976 }
0x20a0   :  { %1747 = vrot.lane.b32.xlu0 %v2977_v59, %s3200_s3 }
0x2112   :  { %v1748_v62 = vpop.permute.xlu0 %1747 }
0x2113   :  { %v1750_v33 = vmul.f32 %v2975_v53, %v1748_v62  ;;  %v2059_v53 = vld [vmem:[#allocation12 + $0x10] sm:$0xff] }
0x2114   :  { %v2826_v56 = vpack.c.bf16 %v2060_v55, %v2059_v53 }
0x2115   :  { %1752 = vrot.lane.b32.xlu1 %v1750_v33, %s3201_s30  ;;  %v2063_v33 = vld [vmem:[#allocation12 + $0x30] sm:$0xff] }
0x2187   :  { %v1753_v2 = vpop.permute.xlu1 %1752 }
0x2188   :  { %2632 = vmatmul.mubr.msk.f32.vlgmr.msra.gmra.mrb[14].mxu1 %vm153_vm1, %v1753_v2  ;;  %v2064_v2 = vld [vmem:[#allocation12 + $0x38] sm:$0xff] }
0x2189   :  { %2818 = vmatpush3.bf16.msra.mxu1 %v3531_v58  ;;  %2653 = vmatprep.mubr.msk.f32.mxu1 %vm3198_vm0, %v3199_v1 }
0x218a   :  { %2819 = vmatprep.subr.bf16.mxu1 %v3197_v0 }
0x218d   :  { %2821 = vmatpush3.bf16.msra.mxu1 %v3535_v61 }
0x218e   :  { %2834 = vmatprep.subr.bf16.mxu1 %v3197_v0 }
0x225b   :  { %v1822_v4 = vpop.f32.mrb[14].mxu1 }
0x225c   :  { %v1826_v5 = vadd.f32 %v1822_v4, %v1239_v3  ;;  %v2633_v7 = vpop.f32.mrb[15].mxu1  ;;  %v2832_v3 = vpack.c.bf16 %v2064_v2, %v2063_v33  ;;  %v2147_v4 = vld [vmem:[#allocation14] sm:$0xff] }
0x225d   :  { %v2149_v7 = vld [vmem:[#allocation14 + $0x10] sm:$0xff] }
0x225e   :  { %2978 = vtanh.f32 %v1826_v5  ;;  %v2302_v58 = vmul.f32 -1.442695, %v1826_v5  ;;  %v2148_v5 = vld [vmem:[#allocation14 + $0x8] sm:$0xff] }
0x2260   :  { %2980 = vpow2.f32 %v2302_v58  ;;  %v2150_v58 = vld [vmem:[#allocation14 + $0x18] sm:$0xff] }
0x2268   :  { %v2979_v8 = vpop.eup %2978 }
0x2269   :  { %1836 = vrot.lane.b32.xlu0 %v2979_v8, %s3200_s3  ;;  %v2835_v8 = vpack.c.bf16 %v2148_v5, %v2147_v4 }
0x226a   :  { %v2981_v9 = vpop.eup %2980 }
0x226b   :  { %v1830_v11 = vadd.f32 1.0, %v2981_v9  ;;  %v2838_v9 = vpack.c.bf16 %v2150_v58, %v2149_v7 }
0x226d   :  { %2982 = vrcp.f32 %v1830_v11  ;;  %v2151_v11 = vld [vmem:[#allocation14 + $0x20] sm:$0xff] }
0x2277   :  { %v2983_v10 = vpop.eup %2982 }
0x2278   :  { %v1834_v13 = vmul.f32 %v2983_v10, %v1744_v47  ;;  %v2062_v47 = vld [vmem:[#allocation12 + $0x28] sm:$0xff] }
0x2279   :  { %v2829_v59 = vpack.c.bf16 %v2062_v47, %v2061_v57 }
0x22db   :  { %v1837_v12 = vpop.permute.xlu0 %1836 }
0x22dc   :  { %v1839_v61 = vmul.f32 %v2983_v10, %v1837_v12 }
0x22de   :  { %1841 = vrot.lane.b32.xlu1 %v1839_v61, %s3200_s3 }
0x2350   :  { %v1842_v15 = vpop.permute.xlu1 %1841 }
0x2351   :  { %v1844_v46 = vadd.f32 %v1842_v15, %v1834_v13  ;;  %v2153_v15 = vld [vmem:[#allocation14 + $0x30] sm:$0xff] }
0x2353   :  { %2984 = vtanh.f32 %v1844_v46 }
0x235d   :  { %v2985_v35 = vpop.eup %2984 }
0x235e   :  { %1847 = vrot.lane.b32.xlu0 %v2985_v35, %s3200_s3 }
0x23d0   :  { %v1848_v14 = vpop.permute.xlu0 %1847 }
0x23d1   :  { %v1850_v16 = vmul.f32 %v2983_v10, %v1848_v14  ;;  %v2152_v10 = vld [vmem:[#allocation14 + $0x28] sm:$0xff]  ;;  %v2155_v14 = vld [vmem:[#allocation14 + $0x40] sm:$0xff] }
0x23d2   :  { %v2841_v61 = vpack.c.bf16 %v2152_v10, %v2151_v11 }
0x23d3   :  { %1852 = vrot.lane.b32.xlu1 %v1850_v16, %s3201_s30  ;;  %v2156_v16 = vld [vmem:[#allocation14 + $0x48] sm:$0xff] }
0x2445   :  { %v1853_v45 = vpop.permute.xlu1 %1852 }
0x2446   :  { %2643 = vmatmul.mubr.msk.f32.vlgmr.msra.gmra.mrb[28].mxu0 %vm153_vm1, %v1853_v45  ;;  %v2847_v45 = vpack.c.bf16 %v2156_v16, %v2155_v14 }
0x2447   :  { %2672 = vmatprep.mubr.msk.f32.mxu0 %vm3198_vm0, %v3199_v1  ;;  %2824 = vmatpush3.bf16.msra.mxu0 %v2823_v54 }
0x2448   :  { %2825 = vmatprep.subr.bf16.mxu0 %v3197_v0 }
0x244b   :  { %2827 = vmatpush3.bf16.msra.mxu0 %v2826_v56 }
0x244c   :  { %2828 = vmatprep.subr.bf16.mxu0 %v3197_v0 }
0x244f   :  { %2830 = vmatpush3.bf16.msra.mxu0 %v2829_v59 }
0x2450   :  { %2831 = vmatprep.subr.bf16.mxu0 %v3197_v0 }
0x2453   :  { %2833 = vmatpush3.bf16.msra.mxu0 %v2832_v3 }
0x2519   :  { %v1922_v31 = vpop.f32.mrb[28].mxu0 }
0x251a   :  { %v1926_v18 = vadd.f32 %v1922_v31, %v1244_v17  ;;  %v2644_v19 = vpop.f32.mrb[29].mxu0  ;;  %v2157_v17 = vld [vmem:[#allocation14 + $0x50] sm:$0xff]  ;;  %v2158_v31 = vld [vmem:[#allocation14 + $0x58] sm:$0xff] }
0x251b   :  { %v2159_v19 = vld [vmem:[#allocation14 + $0x60] sm:$0xff] }
0x251c   :  { %2986 = vtanh.f32 %v1926_v18  ;;  %v2304_v21 = vmul.f32 -1.442695, %v1926_v18  ;;  %v2850_v18 = vpack.c.bf16 %v2158_v31, %v2157_v17 }
0x251e   :  { %2988 = vpow2.f32 %v2304_v21 }
0x2526   :  { %v2987_v20 = vpop.eup %2986 }
0x2527   :  { %1936 = vrot.lane.b32.xlu0 %v2987_v20, %s3200_s3  ;;  %v2160_v20 = vld [vmem:[#allocation14 + $0x68] sm:$0xff] }
0x2528   :  { %v2989_v22 = vpop.eup %2988  ;;  %v2853_v21 = vpack.c.bf16 %v2160_v20, %v2159_v19 }
0x2529   :  { %v1930_v23 = vadd.f32 1.0, %v2989_v22 }
0x252b   :  { %2990 = vrcp.f32 %v1930_v23 }
0x2535   :  { %v2991_v24 = vpop.eup %2990 }
0x2536   :  { %v1934_v28 = vmul.f32 %v2991_v24, %v1844_v46  ;;  %v2154_v46 = vld [vmem:[#allocation14 + $0x38] sm:$0xff] }
0x2537   :  { %v2844_v35 = vpack.c.bf16 %v2154_v46, %v2153_v15 }
0x2599   :  { %v1937_v25 = vpop.permute.xlu0 %1936 }
0x259a   :  { %v1939_v26 = vmul.f32 %v2991_v24, %v1937_v25  ;;  %v2161_v25 = vld [vmem:[#allocation14 + $0x70] sm:$0xff] }
0x259c   :  { %1941 = vrot.lane.b32.xlu1 %v1939_v26, %s3200_s3  ;;  %v2162_v26 = vld [vmem:[#allocation14 + $0x78] sm:$0xff] }
0x260e   :  { %v1942_v29 = vpop.permute.xlu1 %1941 }
0x260f   :  { %v1944_v63 = vadd.f32 %v1942_v29, %v1934_v28  ;;  %v2856_v28 = vpack.c.bf16 %v2162_v26, %v2161_v25  ;;  %v2307_v29 = vld [vmem:[%s3703_s8] ss:$0 sm:$0xff] }
0x2611   :  { %2992 = vtanh.f32 %v1944_v63 }
0x261b   :  { %v2993_v30 = vpop.eup %2992 }
0x261c   :  { %1947 = vrot.lane.b32.xlu0 %v2993_v30, %s3200_s3 }
0x268e   :  { %v1948_v32 = vpop.permute.xlu0 %1947 }
0x268f   :  { %v1950_v34 = vmul.f32 %v2991_v24, %v1948_v32 }
0x2691   :  { %1952 = vrot.lane.b32.xlu1 %v1950_v34, %s3201_s30 }
0x2703   :  { %v1953_v36 = vpop.permute.xlu1 %1952 }
0x2704   :  { %2654 = vmatmul.mubr.msk.f32.vlgmr.msra.gmra.mrb[16].mxu1 %vm153_vm1, %v1953_v36 }
0x2705   :  { %2707 = vmatprep.mubr.msk.f32.mxu1 %vm3198_vm0, %v3199_v1  ;;  %2836 = vmatpush3.bf16.msra.mxu1 %v2835_v8 }
0x2706   :  { %2837 = vmatprep.subr.bf16.mxu1 %v3197_v0 }
0x2709   :  { %2839 = vmatpush3.bf16.msra.mxu1 %v2838_v9 }
0x270a   :  { %2840 = vmatprep.subr.bf16.mxu1 %v3197_v0 }
0x270d   :  { %2842 = vmatpush3.bf16.msra.mxu1 %v2841_v61 }
0x270e   :  { %2843 = vmatprep.subr.bf16.mxu1 %v3197_v0 }
0x2711   :  { %2845 = vmatpush3.bf16.msra.mxu1 %v2844_v35 }
0x2712   :  { %2846 = vmatprep.subr.bf16.mxu1 %v3197_v0 }
0x2715   :  { %2848 = vmatpush3.bf16.msra.mxu1 %v2847_v45 }
0x2716   :  { %2849 = vmatprep.subr.bf16.mxu1 %v3197_v0 }
0x2719   :  { %2851 = vmatpush3.bf16.msra.mxu1 %v2850_v18 }
0x271a   :  { %2852 = vmatprep.subr.bf16.mxu1 %v3197_v0 }
0x271d   :  { %2854 = vmatpush3.bf16.msra.mxu1 %v2853_v21 }
0x271e   :  { %2855 = vmatprep.subr.bf16.mxu1 %v3197_v0  ;;  %v2309_v0 = vld [vmem:[%s3705_s10] ss:$0 sm:$0xff] }
0x2721   :  { %2857 = vmatpush3.bf16.msra.mxu1 %v2856_v28 }
0x27d7   :  { %v2022_v38 = vpop.f32.mrb[16].mxu1 }
0x27d8   :  { %v2026_v39 = vadd.f32 %v2022_v38, %v1249_v43  ;;  %v2655_v40 = vpop.f32.mrb[17].mxu1 }
0x27da   :  { %2994 = vtanh.f32 %v2026_v39  ;;  %v2306_v44 = vmul.f32 -1.442695, %v2026_v39 }
0x27dc   :  { %2996 = vpow2.f32 %v2306_v44 }
0x27e4   :  { %v2995_v42 = vpop.eup %2994 }
0x27e5   :  { %2036 = vrot.lane.b32.xlu0 %v2995_v42, %s3200_s3 }
0x27e6   :  { %v2997_v27 = vpop.eup %2996 }
0x27e7   :  { %v2030_v48 = vadd.f32 1.0, %v2997_v27 }
0x27e9   :  { %2998 = vrcp.f32 %v2030_v48 }
0x27f3   :  { %v2999_v37 = vpop.eup %2998 }
0x27f4   :  { %v2034_v1 = vmul.f32 %v2999_v37, %v1944_v63 }
0x2857   :  { %v2037_v50 = vpop.permute.xlu0 %2036 }
0x2858   :  { %v2039_v51 = vmul.f32 %v2999_v37, %v2037_v50 }
0x285a   :  { %2041 = vrot.lane.b32.xlu1 %v2039_v51, %s3200_s3 }
0x28cc   :  { %v2042_v41 = vpop.permute.xlu1 %2041 }
0x28cd   :  { %v2044_v6 = vadd.f32 %v2042_v41, %v2034_v1 }
0x28cf   :  { %3000 = vtanh.f32 %v2044_v6 }
0x28d9   :  { %v3001_v62 = vpop.eup %3000 }
0x28da   :  { %2047 = vrot.lane.b32.xlu0 %v3001_v62, %s3200_s3 }
0x294c   :  { %v2048_v12 = vpop.permute.xlu0 %2047 }
0x294d   :  { %v2050_v13 = vmul.f32 %v2999_v37, %v2048_v12 }
0x294f   :  { %2052 = vrot.lane.b32.xlu1 %v2050_v13, %s3202_s6 }
0x29c1   :  { %v2053_v22 = vpop.permute.xlu1 %2052 }
0x29c2   :  { %v2055_v23 = vsel %vm153_vm1, %v3582_v49, %v2053_v22 }
0x29c3   :  { %v2056_v24 = vmax.f32 %v2055_v23, 0.0 }
0x29c5   :  { %2673 = vmatmul.mubr.msk.f32.vlgmr.msra.gmra.mrb[30].mxu0 %vm2072_vm2, %v2056_v24 }
0x2a98   :  { %v2142_v63 = vpop.f32.mrb[30].mxu0 }
0x2a99   :  { %v2143_v30 = vadd.f32 %v2307_v29, %v2142_v63  ;;  %v2674_v32 = vpop.f32.mrb[31].mxu0 }
0x2a9b   :  { %v2146_v34 = vmax.f32 %v2143_v30, 0.0 }
0x2a9d   :  { %2708 = vmatmul.mubr.f32.vlgmr.msra.gmra.mrb[18].mxu1 %v2146_v34 }
0x2b70   :  { %v2236_v49 = vpop.f32.mrb[18].mxu1 }
0x2b71   :  { %v2237_v36 = vadd.f32 %v2309_v0, %v2236_v49  ;;  %v2709_v43 = vpop.f32.mrb[19].mxu1 }
0x2b73   :  { %2240 = vst [vmem:[#allocation15] sm:$0xff] %v2237_v36 }
0x2b74   :  { %3167 = shalt.err (!%p3164_p4)
}
0x2b75   :  { %s3168_s13 = scalar_lea.hbm %s3706_s11, 128 }
0x2b76   :  { %p3169_p5 = scmp.ne.s32.totalorder %s3706_s11, %s3168_s13  ;;  %p3172_p6 = scmp.lt.u32.totalorder %s3168_s13, %s3706_s11 }
0x2b78   :  { %p3174_p7 = pnand %p3172_p6, %p3169_p5 }
0x2b7a   :  { %3177 = shalt.err (!%p3174_p7)
}
0x2b7b   :  { %2250 = dma.vmem_to_hbm [thread:$0]  %s2248_s25, 128, %s3706_s11, [#allocation5]  }
0x2b7c   :  { %3186 = dma.done.wait [#allocation5], 128  }
0x2b7d   :  { %3187 = vsyncadd [#allocation5], 4294967168 }
0x2b7e   :  { %2254 = vsyncpa [#allocation4], 1 }
0x2b7f   :  { %2255 = vsyncpa [#allocation7], 1 }
0x2b80   :  { %2256 = vsyncpa [#allocation10], 1 }
0x2b81   :  { %2257 = vsyncpa [#allocation13], 1 }
0x2b82   :  { %2258 = vsyncpa [#allocation5], 1 }

// kernel: tpu_custom_call.1
= control target key start
LH: loop header
LB: loop body
LE: loop exit
PB: predicated region body
PF: predicated region fallthrough
CT: control target
= control target key end

     0   :  { %16 = vsyncpa [#allocation4], 0  ;;  %s3695_s0 = inlined_call_operand.hbm [shape: f32[8,8,32], index: 0, kind: input, shape index: {}]   ;;  %s3696_s1 = inlined_call_operand.hbm [shape: f32[32,128], index: 1, kind: input, shape index: {}]   ;;  %s3697_s2 = inlined_call_operand.hbm [shape: f32[32,128], index: 2, kind: input, shape index: {}]   ;;  %s3698_s3 = inlined_call_operand.vmem [shape: f32[1,128], index: 3, kind: input, shape index: {}]   ;;  %s3699_s4 = inlined_call_operand.hbm [shape: f32[32,128], index: 4, kind: input, shape index: {}]   ;;  %s3700_s5 = inlined_call_operand.hbm [shape: f32[32,128], index: 5, kind: input, shape index: {}]   ;;  %s3701_s6 = inlined_call_operand.vmem [shape: f32[1,128], index: 6, kind: input, shape index: {}]   ;;  %s3702_s7 = inlined_call_operand.hbm [shape: f32[64,128], index: 7, kind: input, shape index: {}]   ;;  %s3703_s8 = inlined_call_operand.vmem [shape: f32[1,128], index: 8, kind: input, shape index: {}]   ;;  %s3704_s9 = inlined_call_operand.hbm [shape: f32[128,128], index: 9, kind: input, shape index: {}]   ;;  %s3705_s10 = inlined_call_operand.vmem [shape: f32[1,128], index: 10, kind: input, shape index: {}]   ;;  %s3706_s11 = inlined_call_operand.hbm [shape: f32[8,128], index: 11, kind: output, shape index: {}]  }
   0x1   :  { %17 = vsyncpa [#allocation7], 0 }
   0x2   :  { %18 = vsyncpa [#allocation10], 0 }
   0x3   :  { %19 = vsyncpa [#allocation13], 0 }
   0x4   :  { %20 = vsyncpa [#allocation5], 0  ;;  %s3188_s17 = smov [#allocation6]   ;;  %s3189_s19 = smov [#allocation9]  }
   0x5   :  { %s38_s18 = sshll.u32 %s3188_s17, 4  ;;  %s64_s20 = sshll.u32 %s3189_s19, 4  ;;  %s39_s18 = int_to_ptr.vmem [resolvable:$true] %s38_s18  ;;  %s3264_s20 = int_to_ptr.vmem [resolvable:$true] %s64_s20 }
   0x6   :  { %s3002_s23 = scalar_lea.hbm %s3696_s1, 512 }
   0x7   :  { %p3003_p0 = scmp.ne.s32.totalorder %s3696_s1, %s3002_s23  ;;  %p3006_p1 = scmp.lt.u32.totalorder %s3002_s23, %s3696_s1 }
   0x9   :  { %p3008_p2 = pnand %p3006_p1, %p3003_p0 }
   0xb   :  { %3011 = shalt.err (!%p3008_p2)
}
   0xc   :  { %s3012_s28 = scalar_lea.vmem %s39_s18, 512  ;;  %p3017_p4 = scmp.lt.s32.totalorder %s39_s18, %s39_s18 }
   0xd   :  { %p3013_p3 = scmp.ne.s32.totalorder %s39_s18, %s3012_s28  ;;  %p3018_p5 = scmp.lt.s32.totalorder %s3012_s28, %s3012_s28 }
   0xf   :  { %p3019_p6 = por %p3018_p5, %p3017_p4 }
  0x11   :  { %p3020_p7 = pnand %p3019_p6, %p3013_p3 }
  0x13   :  { %3023 = shalt.err (!%p3020_p7)
}
  0x14   :  { %s3190_s29 = smov 128   ;;  %s3191_s30 = smov 8  }
  0x15   :  { %44 = dma.hbm_to_vmem [thread:$0]  %s3696_s1, 512, %s39_s18, [#allocation7], %s3190_s29, %s3190_s29, %s3191_s30  }
  0x16   :  { %s3024_s16 = scalar_lea.hbm %s3699_s4, 512 }
  0x17   :  { %p3025_p8 = scmp.ne.s32.totalorder %s3699_s4, %s3024_s16  ;;  %p3028_p9 = scmp.lt.u32.totalorder %s3024_s16, %s3699_s4 }
  0x19   :  { %p3030_p10 = pnand %p3028_p9, %p3025_p8 }
  0x1b   :  { %3033 = shalt.err (!%p3030_p10)
}
  0x1c   :  { %s3034_s23 = scalar_lea.vmem %s3264_s20, 512  ;;  %p3039_p12 = scmp.lt.s32.totalorder %s3264_s20, %s3264_s20 }
  0x1d   :  { %p3035_p11 = scmp.ne.s32.totalorder %s3264_s20, %s3034_s23  ;;  %p3040_p13 = scmp.lt.s32.totalorder %s3034_s23, %s3034_s23 }
  0x1f   :  { %p3041_p0 = por %p3040_p13, %p3039_p12 }
  0x21   :  { %p3042_p1 = pnand %p3041_p0, %p3035_p11 }
  0x23   :  { %3045 = shalt.err (!%p3042_p1)
}
  0x24   :  { %70 = dma.hbm_to_vmem [thread:$0]  %s3699_s4, 512, %s3264_s20, [#allocation10], %s3190_s29, %s3190_s29, %s3191_s30  }
  0x25   :  { %s3192_s24 = smov [#allocation12]   ;;  %s3193_s26 = smov [#allocation3]  }
  0x26   :  { %s90_s25 = sshll.u32 %s3192_s24, 4  ;;  %s26_s27 = sshll.u32 %s3193_s26, 4  ;;  %s91_s25 = int_to_ptr.vmem [resolvable:$true] %s90_s25  ;;  %s3301_s27 = int_to_ptr.vmem [resolvable:$true] %s26_s27 }
  0x27   :  { %s3046_s13 = scalar_lea.hbm %s3702_s7, 1024 }
  0x28   :  { %p3047_p2 = scmp.ne.s32.totalorder %s3702_s7, %s3046_s13  ;;  %p3050_p3 = scmp.lt.u32.totalorder %s3046_s13, %s3702_s7 }
  0x2a   :  { %p3052_p4 = pnand %p3050_p3, %p3047_p2 }
  0x2c   :  { %3055 = shalt.err (!%p3052_p4)
}
  0x2d   :  { %s3056_s4 = scalar_lea.vmem %s91_s25, 1024  ;;  %p3061_p6 = scmp.lt.s32.totalorder %s91_s25, %s91_s25 }
  0x2e   :  { %p3057_p5 = scmp.ne.s32.totalorder %s91_s25, %s3056_s4  ;;  %p3062_p7 = scmp.lt.s32.totalorder %s3056_s4, %s3056_s4 }
  0x30   :  { %p3063_p8 = por %p3062_p7, %p3061_p6 }
  0x32   :  { %p3064_p9 = pnand %p3063_p8, %p3057_p5 }
  0x34   :  { %3067 = shalt.err (!%p3064_p9)
}
  0x35   :  { %96 = dma.hbm_to_vmem [thread:$0]  %s3702_s7, 1024, %s91_s25, [#allocation13], %s3190_s29, %s3190_s29, %s3191_s30  }
  0x36   :  { %s3068_s23 = scalar_lea.hbm %s3695_s0, 1024 }
  0x37   :  { %p3069_p10 = scmp.ne.s32.totalorder %s3695_s0, %s3068_s23  ;;  %p3072_p11 = scmp.lt.u32.totalorder %s3068_s23, %s3695_s0 }
  0x39   :  { %p3074_p12 = pnand %p3072_p11, %p3069_p10 }
  0x3b   :  { %3077 = shalt.err (!%p3074_p12)
}
  0x3c   :  { %s3078_s28 = scalar_lea.vmem %s3301_s27, 1024  ;;  %p3083_p0 = scmp.lt.s32.totalorder %s3301_s27, %s3301_s27 }
  0x3d   :  { %p3079_p13 = scmp.ne.s32.totalorder %s3301_s27, %s3078_s28  ;;  %p3084_p1 = scmp.lt.s32.totalorder %s3078_s28, %s3078_s28 }
  0x3f   :  { %p3085_p2 = por %p3084_p1, %p3083_p0 }
  0x41   :  { %p3086_p3 = pnand %p3085_p2, %p3079_p13 }
  0x43   :  { %3089 = shalt.err (!%p3086_p3)
}
  0x44   :  { %32 = dma.hbm_to_vmem [thread:$0]  %s3695_s0, 1024, %s3301_s27, [#allocation4], %s3190_s29, %s3190_s29, %s3191_s30  }
  0x45   :  { %s3194_s12 = smov [#allocation8]   ;;  %s3195_s14 = smov [#allocation11]  }
  0x46   :  { %s50_s13 = sshll.u32 %s3194_s12, 4  ;;  %s76_s15 = sshll.u32 %s3195_s14, 4  ;;  %s51_s13 = int_to_ptr.vmem [resolvable:$true] %s50_s13  ;;  %s3338_s15 = int_to_ptr.vmem [resolvable:$true] %s76_s15 }
  0x47   :  { %s3090_s4 = scalar_lea.hbm %s3697_s2, 512 }
  0x48   :  { %p3091_p4 = scmp.ne.s32.totalorder %s3697_s2, %s3090_s4  ;;  %p3094_p5 = scmp.lt.u32.totalorder %s3090_s4, %s3697_s2 }
  0x4a   :  { %p3096_p6 = pnand %p3094_p5, %p3091_p4 }
  0x4c   :  { %3099 = shalt.err (!%p3096_p6)
}
  0x4d   :  { %s3100_s0 = scalar_lea.vmem %s51_s13, 512  ;;  %p3105_p8 = scmp.lt.s32.totalorder %s51_s13, %s51_s13 }
  0x4e   :  { %p3101_p7 = scmp.ne.s32.totalorder %s51_s13, %s3100_s0  ;;  %p3106_p9 = scmp.lt.s32.totalorder %s3100_s0, %s3100_s0 }
  0x50   :  { %p3107_p10 = por %p3106_p9, %p3105_p8 }
  0x52   :  { %p3108_p11 = pnand %p3107_p10, %p3101_p7 }
  0x54   :  { %3111 = shalt.err (!%p3108_p11)
}
  0x55   :  { %56 = dma.hbm_to_vmem [thread:$0]  %s3697_s2, 512, %s51_s13, [#allocation7], %s3190_s29, %s3190_s29, %s3191_s30  }
  0x56   :  { %s3112_s24 = scalar_lea.hbm %s3700_s5, 512 }
  0x57   :  { %p3113_p12 = scmp.ne.s32.totalorder %s3700_s5, %s3112_s24  ;;  %p3116_p13 = scmp.lt.u32.totalorder %s3112_s24, %s3700_s5 }
  0x59   :  { %p3118_p0 = pnand %p3116_p13, %p3113_p12 }
  0x5b   :  { %3121 = shalt.err (!%p3118_p0)
}
  0x5c   :  { %s3122_s12 = scalar_lea.vmem %s3338_s15, 512  ;;  %p3127_p2 = scmp.lt.s32.totalorder %s3338_s15, %s3338_s15 }
  0x5d   :  { %p3123_p1 = scmp.ne.s32.totalorder %s3338_s15, %s3122_s12  ;;  %p3128_p3 = scmp.lt.s32.totalorder %s3122_s12, %s3122_s12 }
  0x5f   :  { %p3129_p4 = por %p3128_p3, %p3127_p2 }
  0x61   :  { %p3130_p5 = pnand %p3129_p4, %p3123_p1 }
  0x63   :  { %3133 = shalt.err (!%p3130_p5)
}
  0x64   :  { %82 = dma.hbm_to_vmem [thread:$0]  %s3700_s5, 512, %s3338_s15, [#allocation10], %s3190_s29, %s3190_s29, %s3191_s30  }
  0x65   :  { %s3196_s14 = smov [#allocation14]   ;;  %s3134_s20 = scalar_lea.hbm %s3704_s9, 2048 }
  0x66   :  { %s104_s16 = sshll.u32 %s3196_s14, 4  ;;  %p3135_p6 = scmp.ne.s32.totalorder %s3704_s9, %s3134_s20  ;;  %s105_s16 = int_to_ptr.vmem [resolvable:$true] %s104_s16 }
  0x67   :  { %p3138_p7 = scmp.lt.u32.totalorder %s3134_s20, %s3704_s9 }
  0x69   :  { %p3140_p8 = pnand %p3138_p7, %p3135_p6 }
  0x6b   :  { %3143 = shalt.err (!%p3140_p8)
}
  0x6c   :  { %s3144_s27 = scalar_lea.vmem %s105_s16, 2048  ;;  %p3149_p10 = scmp.lt.s32.totalorder %s105_s16, %s105_s16 }
  0x6d   :  { %p3145_p9 = scmp.ne.s32.totalorder %s105_s16, %s3144_s27  ;;  %p3150_p11 = scmp.lt.s32.totalorder %s3144_s27, %s3144_s27 }
  0x6f   :  { %p3151_p12 = por %p3150_p11, %p3149_p10 }
  0x71   :  { %p3152_p13 = pnand %p3151_p12, %p3145_p9 }
  0x73   :  { %3155 = shalt.err (!%p3152_p13)
}
  0x74   :  { %110 = dma.hbm_to_vmem [thread:$0]  %s3704_s9, 2048, %s105_s16, [#allocation13], %s3190_s29, %s3190_s29, %s3191_s30  }
  0x75   :  { %3178 = dma.done.wait [#allocation4], 1024  }
  0x76   :  { %3179 = vsyncadd [#allocation4], 4294966272 }
  0x77   :  { %3180 = dma.done.wait [#allocation7], 1024  }
  0x78   :  { %3181 = vsyncadd [#allocation7], 4294966272 }
  0x79   :  { %3182 = dma.done.wait [#allocation10], 1024  }
  0x7a   :  { %3183 = vsyncadd [#allocation10], 4294966272 }
  0x7b   :  { %3184 = dma.done.wait [#allocation13], 3072  }
  0x7c   :  { %3185 = vsyncadd [#allocation13], 4294964224  ;;  %v3197_v0 = vmov 0.0|0.0   ;;  %vm3198_vm0 = vmmov 0   ;;  %v3199_v1 = vmov 0.0   ;;  %vm153_vm1 = vcmask 261120  }
  0x7d   :  { %2724 = vmatprep.subr.bf16.mxu1 %v3197_v0  ;;  %2479 = vmatprep.mubr.msk.f32.mxu1 %vm3198_vm0, %v3199_v1  ;;  %v142_v2 = vld [vmem:[#allocation6] sm:$0xff]  ;;  %v143_v3 = vld [vmem:[#allocation6 + $0x8] sm:$0xff]  ;;  %v144_v4 = vld [vmem:[#allocation6 + $0x10] sm:$0xff]  ;;  %s3201_s30 = smov 64   ;;  %vm2072_vm2 = vcmask 523264   ;;  %s3203_s7 = smov [#allocation15]  }
  0x7e   :  { %v2710_v5 = vpack.c.bf16 %v143_v3, %v142_v2  ;;  %v145_v6 = vld [vmem:[#allocation6 + $0x18] sm:$0xff]  ;;  %v134_v7 = vld [vmem:[#allocation3] sm:$0xff]  ;;  %v284_v10 = vld [vmem:[#allocation8 + $0x8] sm:$0xff]  ;;  %s2247_s25 = sshll.u32 %s3203_s7, 4  ;;  %s2248_s25 = int_to_ptr.vmem [resolvable:$true] %s2247_s25 }
  0x7f   :  { %v2714_v8 = vpack.c.bf16 %v145_v6, %v144_v4  ;;  %2448 = vmatprep.mubr.msk.f32.mxu0 %vm153_vm1, %v134_v7  ;;  %v283_v9 = vld [vmem:[#allocation8] sm:$0xff]  ;;  %v285_v12 = vld [vmem:[#allocation8 + $0x10] sm:$0xff]  ;;  %v286_v13 = vld [vmem:[#allocation8 + $0x18] sm:$0xff]  ;;  %s3156_s12 = scalar_lea.vmem %s2248_s25, 128  ;;  %p3161_p1 = scmp.lt.s32.totalorder %s2248_s25, %s2248_s25 }
  0x80   :  { %2711 = vmatprep.subr.bf16.mxu0 %v2710_v5  ;;  %v3394_v11 = vpack.c.bf16 %v284_v10, %v283_v9  ;;  %v3398_v14 = vpack.c.bf16 %v286_v13, %v285_v12  ;;  %v135_v15 = vld [vmem:[#allocation3 + $0x8] sm:$0xff]  ;;  %v136_v16 = vld [vmem:[#allocation3 + $0x10] sm:$0xff]  ;;  %v137_v17 = vld [vmem:[#allocation3 + $0x18] sm:$0xff]  ;;  %p3157_p0 = scmp.ne.s32.totalorder %s2248_s25, %s3156_s12  ;;  %p3162_p2 = scmp.lt.s32.totalorder %s3156_s12, %s3156_s12 }
  0x81   :  { %2713 = vmatpush3.bf16.msra.mxu0 %v2710_v5  ;;  %v138_v18 = vld [vmem:[#allocation3 + $0x20] sm:$0xff]  ;;  %v139_v19 = vld [vmem:[#allocation3 + $0x28] sm:$0xff]  ;;  %v140_v20 = vld [vmem:[#allocation3 + $0x30] sm:$0xff] }
  0x82   :  { %2715 = vmatprep.subr.bf16.mxu0 %v2714_v8  ;;  %2726 = vmatpush3.bf16.msra.mxu1 %v3394_v11  ;;  %v141_v21 = vld [vmem:[#allocation3 + $0x38] sm:$0xff]  ;;  %v2259_v22 = vld [vmem:[%s3698_s3] ss:$0 sm:$0xff]  ;;  %s3200_s3 = smov 32   ;;  %p3163_p3 = por %p3162_p2, %p3161_p1 }
  0x83   :  { %2727 = vmatprep.subr.bf16.mxu1 %v3197_v0 }
  0x84   :  { %p3164_p4 = pnand %p3163_p3, %p3157_p0 }
  0x85   :  { %2717 = vmatpush3.bf16.msra.mxu0 %v2714_v8 }
  0x86   :  { %2718 = vmatprep.subr.bf16.mxu0 %v3197_v0  ;;  %2729 = vmatpush3.bf16.msra.mxu1 %v3398_v14 }
  0x87   :  { %2736 = vmatprep.subr.bf16.mxu1 %v3197_v0 }
  0x88   :  { %2449 = vmatmul.mubr.msk.f32.vlgmr.msra.gmra.mrb[0].mxu0 %vm153_vm1, %v135_v15 }
  0x89   :  { %2720 = vmatpush3.bf16.msra.mxu0 %v3394_v11  ;;  %2451 = vmatprep.mubr.msk.f32.mxu0 %vm153_vm1, %v136_v16 }
  0x8a   :  { %2721 = vmatprep.subr.bf16.mxu0 %v3197_v0 }
  0x8c   :  { %2452 = vmatmul.mubr.msk.f32.gmra.mrb[2].mxu0 %vm153_vm1, %v137_v17 }
  0x8d   :  { %2454 = vmatprep.mubr.msk.f32.mxu0 %vm153_vm1, %v138_v18  ;;  %2723 = vmatpush3.bf16.msra.mxu0 %v3398_v14 }
  0x8e   :  { %2730 = vmatprep.subr.bf16.mxu0 %v3197_v0 }
  0x90   :  { %2455 = vmatmul.mubr.msk.f32.gmra.mrb[4].mxu0 %vm153_vm1, %v139_v19 }
  0x91   :  { %2457 = vmatprep.mubr.msk.f32.mxu0 %vm153_vm1, %v140_v20 }
  0x94   :  { %2458 = vmatmul.mubr.msk.f32.gmra.mrb[6].mxu0 %vm153_vm1, %v141_v21 }
  0x95   :  { %2468 = vmatprep.mubr.msk.f32.mxu0 %vm3198_vm0, %v3199_v1 }
  0x98   :  { %2469 = vmatmul.mubr.f32.vlgmr.msra.gmra.mrb[8].mxu0 %v3199_v1 }
  0x99   :  { %2732 = vmatpush3.bf16.msra.mxu0 %v3394_v11  ;;  %2490 = vmatprep.mubr.msk.f32.mxu0 %vm3198_vm0, %v3199_v1 }
  0x9a   :  { %2733 = vmatprep.subr.bf16.mxu0 %v3197_v0 }
  0x9d   :  { %2735 = vmatpush3.bf16.msra.mxu0 %v3398_v14 }
  0x9e   :  { %2742 = vmatprep.subr.bf16.mxu0 %v3197_v0 }
 0x15b   :  { %v2450_v23 = vpop.f32.mrb[0].mxu0 }
 0x15c   :  { %v250_v24 = vadd.f32 %v2450_v23, %v2259_v22  ;;  %v244_v25 = vpop.f32.mrb[1].mxu0 }
 0x15d   :  { %v245_v38 = vadd.f32 %v2259_v22, %v244_v25 }
 0x15f   :  { %v2453_v26 = vpop.f32.mrb[2].mxu0 }
 0x160   :  { %v3426_v27 = vadd.f32 %v2453_v26, %v2259_v22  ;;  %v254_v28 = vpop.f32.mrb[3].mxu0 }
 0x161   :  { %v3428_v29 = vadd.f32 %v2259_v22, %v254_v28 }
 0x163   :  { %v2456_v30 = vpop.f32.mrb[4].mxu0 }
 0x164   :  { %v3430_v31 = vadd.f32 %v2456_v30, %v2259_v22  ;;  %v264_v32 = vpop.f32.mrb[5].mxu0 }
 0x165   :  { %v3432_v33 = vadd.f32 %v2259_v22, %v264_v32 }
 0x167   :  { %v2459_v34 = vpop.f32.mrb[6].mxu0 }
 0x168   :  { %v3434_v35 = vadd.f32 %v2459_v34, %v2259_v22  ;;  %v274_v36 = vpop.f32.mrb[7].mxu0 }
 0x169   :  { %v3436_v37 = vadd.f32 %v2259_v22, %v274_v36 }
 0x16b   :  { %v356_v39 = vpop.f32.mrb[8].mxu0 }
 0x16c   :  { %v360_v40 = vadd.f32 %v356_v39, %v245_v38  ;;  %v2470_v41 = vpop.f32.mrb[9].mxu0 }
 0x16e   :  { %2874 = vtanh.f32 %v360_v40  ;;  %v2268_v43 = vmul.f32 -1.442695, %v360_v40 }
 0x170   :  { %2876 = vpow2.f32 %v2268_v43 }
 0x178   :  { %v2875_v42 = vpop.eup %2874 }
 0x179   :  { %370 = vrot.lane.b32.xlu0 %v2875_v42, %s3200_s3 }
 0x17a   :  { %v2877_v44 = vpop.eup %2876 }
 0x17b   :  { %v364_v45 = vadd.f32 1.0, %v2877_v44 }
 0x17d   :  { %2878 = vrcp.f32 %v364_v45 }
 0x187   :  { %v2879_v46 = vpop.eup %2878 }
 0x188   :  { %v368_v49 = vmul.f32 0.0, %v2879_v46 }
 0x1eb   :  { %v371_v47 = vpop.permute.xlu0 %370 }
 0x1ec   :  { %v373_v48 = vmul.f32 %v2879_v46, %v371_v47 }
 0x1ee   :  { %375 = vrot.lane.b32.xlu0 %v373_v48, %s3200_s3 }
 0x260   :  { %v376_v50 = vpop.permute.xlu0 %375 }
 0x261   :  { %v378_v51 = vadd.f32 %v376_v50, %v368_v49 }
 0x263   :  { %2880 = vtanh.f32 %v378_v51 }
 0x26d   :  { %v2881_v52 = vpop.eup %2880 }
 0x26e   :  { %381 = vrot.lane.b32.xlu1 %v2881_v52, %s3200_s3 }
 0x2e0   :  { %v382_v53 = vpop.permute.xlu1 %381 }
 0x2e1   :  { %v384_v54 = vmul.f32 %v2879_v46, %v382_v53 }
 0x2e3   :  { %386 = vrot.lane.b32.xlu1 %v384_v54, %s3201_s30 }
 0x355   :  { %v387_v55 = vpop.permute.xlu1 %386 }
 0x356   :  { %389 = vst.msk [vmem:[#allocation2] sm:$0xff] %vm153_vm1, %v387_v55  ;;  %2480 = vmatmul.mubr.msk.f32.vlgmr.msra.gmra.mrb[0].mxu1 %vm153_vm1, %v387_v55 }
 0x357   :  { %2738 = vmatpush3.bf16.msra.mxu1 %v3394_v11  ;;  %2501 = vmatprep.mubr.msk.f32.mxu1 %vm3198_vm0, %v3199_v1 }
 0x358   :  { %2739 = vmatprep.subr.bf16.mxu1 %v3197_v0 }
 0x35b   :  { %2741 = vmatpush3.bf16.msra.mxu1 %v3398_v14 }
 0x35c   :  { %2748 = vmatprep.subr.bf16.mxu1 %v3197_v0 }
 0x429   :  { %v458_v56 = vpop.f32.mrb[0].mxu1 }
 0x42a   :  { %v462_v57 = vadd.f32 %v458_v56, %v250_v24  ;;  %v2481_v58 = vpop.f32.mrb[1].mxu1 }
 0x42c   :  { %2882 = vtanh.f32 %v462_v57  ;;  %v2270_v60 = vmul.f32 -1.442695, %v462_v57 }
 0x42e   :  { %2884 = vpow2.f32 %v2270_v60 }
 0x436   :  { %v2883_v59 = vpop.eup %2882 }
 0x437   :  { %472 = vrot.lane.b32.xlu0 %v2883_v59, %s3200_s3 }
 0x438   :  { %v2885_v61 = vpop.eup %2884 }
 0x439   :  { %v466_v62 = vadd.f32 1.0, %v2885_v61 }
 0x43b   :  { %2886 = vrcp.f32 %v466_v62 }
 0x445   :  { %v2887_v63 = vpop.eup %2886 }
 0x446   :  { %v470_v4 = vmul.f32 %v2887_v63, %v378_v51 }
 0x4a9   :  { %v473_v2 = vpop.permute.xlu0 %472 }
 0x4aa   :  { %v475_v3 = vmul.f32 %v2887_v63, %v473_v2 }
 0x4ac   :  { %477 = vrot.lane.b32.xlu1 %v475_v3, %s3200_s3 }
 0x51e   :  { %v478_v5 = vpop.permute.xlu1 %477 }
 0x51f   :  { %v480_v6 = vadd.f32 %v478_v5, %v470_v4 }
 0x521   :  { %2888 = vtanh.f32 %v480_v6 }
 0x52b   :  { %v2889_v7 = vpop.eup %2888 }
 0x52c   :  { %483 = vrot.lane.b32.xlu0 %v2889_v7, %s3200_s3 }
 0x59e   :  { %v484_v8 = vpop.permute.xlu0 %483 }
 0x59f   :  { %v486_v9 = vmul.f32 %v2887_v63, %v484_v8 }
 0x5a1   :  { %488 = vrot.lane.b32.xlu1 %v486_v9, %s3201_s30 }
 0x613   :  { %v489_v10 = vpop.permute.xlu1 %488 }
 0x614   :  { %491 = vst.msk [vmem:[#allocation2 + $0x8] sm:$0xff] %vm153_vm1, %v489_v10  ;;  %2491 = vmatmul.mubr.msk.f32.vlgmr.msra.gmra.mrb[10].mxu0 %vm153_vm1, %v489_v10 }
 0x615   :  { %2744 = vmatpush3.bf16.msra.mxu0 %v3394_v11  ;;  %2512 = vmatprep.mubr.msk.f32.mxu0 %vm3198_vm0, %v3199_v1 }
 0x616   :  { %2745 = vmatprep.subr.bf16.mxu0 %v3197_v0 }
 0x619   :  { %2747 = vmatpush3.bf16.msra.mxu0 %v3398_v14 }
 0x61a   :  { %2754 = vmatprep.subr.bf16.mxu0 %v3197_v0 }
 0x6e7   :  { %v560_v12 = vpop.f32.mrb[10].mxu0 }
 0x6e8   :  { %v564_v13 = vadd.f32 %v560_v12, %v3428_v29  ;;  %v2492_v15 = vpop.f32.mrb[11].mxu0 }
 0x6ea   :  { %2890 = vtanh.f32 %v564_v13  ;;  %v2272_v17 = vmul.f32 -1.442695, %v564_v13 }
 0x6ec   :  { %2892 = vpow2.f32 %v2272_v17 }
 0x6f4   :  { %v2891_v16 = vpop.eup %2890 }
 0x6f5   :  { %574 = vrot.lane.b32.xlu0 %v2891_v16, %s3200_s3 }
 0x6f6   :  { %v2893_v18 = vpop.eup %2892 }
 0x6f7   :  { %v568_v19 = vadd.f32 1.0, %v2893_v18  ;;  %v1113_v18 = vld [vmem:[#allocation9 + $0x8] sm:$0xff] }
 0x6f9   :  { %2894 = vrcp.f32 %v568_v19 }
 0x703   :  { %v2895_v20 = vpop.eup %2894 }
 0x704   :  { %v572_v23 = vmul.f32 %v2895_v20, %v480_v6 }
 0x767   :  { %v575_v21 = vpop.permute.xlu0 %574 }
 0x768   :  { %v577_v22 = vmul.f32 %v2895_v20, %v575_v21 }
 0x76a   :  { %579 = vrot.lane.b32.xlu1 %v577_v22, %s3200_s3 }
 0x7dc   :  { %v580_v24 = vpop.permute.xlu1 %579 }
 0x7dd   :  { %v582_v25 = vadd.f32 %v580_v24, %v572_v23  ;;  %v1114_v23 = vld [vmem:[#allocation9 + $0x10] sm:$0xff]  ;;  %v1115_v24 = vld [vmem:[#allocation9 + $0x18] sm:$0xff] }
 0x7df   :  { %2896 = vtanh.f32 %v582_v25 }
 0x7e9   :  { %v2897_v26 = vpop.eup %2896 }
 0x7ea   :  { %585 = vrot.lane.b32.xlu0 %v2897_v26, %s3200_s3 }
 0x85c   :  { %v586_v28 = vpop.permute.xlu0 %585 }
 0x85d   :  { %v588_v29 = vmul.f32 %v2895_v20, %v586_v28  ;;  %v1104_v28 = vld [vmem:[#allocation2] sm:$0xff] }
 0x85f   :  { %590 = vrot.lane.b32.xlu1 %v588_v29, %s3201_s30  ;;  %v1105_v29 = vld [vmem:[#allocation2 + $0x8] sm:$0xff] }
 0x8d1   :  { %v591_v30 = vpop.permute.xlu1 %590 }
 0x8d2   :  { %593 = vst.msk [vmem:[#allocation2 + $0x10] sm:$0xff] %vm153_vm1, %v591_v30  ;;  %2502 = vmatmul.mubr.msk.f32.vlgmr.msra.gmra.mrb[2].mxu1 %vm153_vm1, %v591_v30 }
 0x8d3   :  { %2750 = vmatpush3.bf16.msra.mxu1 %v3394_v11  ;;  %2523 = vmatprep.mubr.msk.f32.mxu1 %vm3198_vm0, %v3199_v1 }
 0x8d4   :  { %2751 = vmatprep.subr.bf16.mxu1 %v3197_v0 }
 0x8d7   :  { %2753 = vmatpush3.bf16.msra.mxu1 %v3398_v14 }
 0x8d8   :  { %2760 = vmatprep.subr.bf16.mxu1 %v3197_v0 }
 0x8d9   :  { %v1106_v30 = vld [vmem:[#allocation2 + $0x10] sm:$0xff] }
 0x9a5   :  { %v662_v32 = vpop.f32.mrb[2].mxu1 }
 0x9a6   :  { %v666_v34 = vadd.f32 %v662_v32, %v3426_v27  ;;  %v2503_v36 = vpop.f32.mrb[3].mxu1 }
 0x9a8   :  { %2898 = vtanh.f32 %v666_v34  ;;  %v2274_v39 = vmul.f32 -1.442695, %v666_v34 }
 0x9aa   :  { %2900 = vpow2.f32 %v2274_v39 }
 0x9b2   :  { %v2899_v38 = vpop.eup %2898 }
 0x9b3   :  { %676 = vrot.lane.b32.xlu0 %v2899_v38, %s3200_s3 }
 0x9b4   :  { %v2901_v40 = vpop.eup %2900 }
 0x9b5   :  { %v670_v41 = vadd.f32 1.0, %v2901_v40 }
 0x9b7   :  { %2902 = vrcp.f32 %v670_v41 }
 0x9c1   :  { %v2903_v42 = vpop.eup %2902 }
 0x9c2   :  { %v674_v45 = vmul.f32 %v2903_v42, %v582_v25  ;;  %v2770_v25 = vpack.c.bf16 %v1115_v24, %v1114_v23 }
 0xa25   :  { %v677_v43 = vpop.permute.xlu0 %676 }
 0xa26   :  { %v679_v44 = vmul.f32 %v2903_v42, %v677_v43 }
 0xa28   :  { %681 = vrot.lane.b32.xlu1 %v679_v44, %s3200_s3 }
 0xa9a   :  { %v682_v46 = vpop.permute.xlu1 %681 }
 0xa9b   :  { %v684_v47 = vadd.f32 %v682_v46, %v674_v45 }
 0xa9d   :  { %2904 = vtanh.f32 %v684_v47 }
 0xaa7   :  { %v2905_v27 = vpop.eup %2904 }
 0xaa8   :  { %687 = vrot.lane.b32.xlu0 %v2905_v27, %s3200_s3 }
 0xb1a   :  { %v688_v48 = vpop.permute.xlu0 %687 }
 0xb1b   :  { %v690_v49 = vmul.f32 %v2903_v42, %v688_v48 }
 0xb1d   :  { %692 = vrot.lane.b32.xlu1 %v690_v49, %s3201_s30 }
 0xb8f   :  { %v693_v50 = vpop.permute.xlu1 %692 }
 0xb90   :  { %695 = vst.msk [vmem:[#allocation2 + $0x18] sm:$0xff] %vm153_vm1, %v693_v50  ;;  %2513 = vmatmul.mubr.msk.f32.vlgmr.msra.gmra.mrb[12].mxu0 %vm153_vm1, %v693_v50 }
 0xb91   :  { %2756 = vmatpush3.bf16.msra.mxu0 %v3394_v11  ;;  %2534 = vmatprep.mubr.msk.f32.mxu0 %vm3198_vm0, %v3199_v1 }
 0xb92   :  { %2757 = vmatprep.subr.bf16.mxu0 %v3197_v0 }
 0xb95   :  { %2759 = vmatpush3.bf16.msra.mxu0 %v3398_v14 }
 0xb97   :  { %v1107_v32 = vld [vmem:[#allocation2 + $0x18] sm:$0xff] }
 0xc63   :  { %v764_v51 = vpop.f32.mrb[12].mxu0 }
 0xc64   :  { %v768_v52 = vadd.f32 %v764_v51, %v3432_v33  ;;  %v2514_v53 = vpop.f32.mrb[13].mxu0 }
 0xc66   :  { %2906 = vtanh.f32 %v768_v52  ;;  %v2276_v55 = vmul.f32 -1.442695, %v768_v52 }
 0xc68   :  { %2908 = vpow2.f32 %v2276_v55 }
 0xc70   :  { %v2907_v54 = vpop.eup %2906 }
 0xc71   :  { %778 = vrot.lane.b32.xlu0 %v2907_v54, %s3200_s3 }
 0xc72   :  { %v2909_v56 = vpop.eup %2908 }
 0xc73   :  { %v772_v57 = vadd.f32 1.0, %v2909_v56  ;;  %v1252_v56 = vld [vmem:[#allocation11] sm:$0xff] }
 0xc75   :  { %2910 = vrcp.f32 %v772_v57  ;;  %v1253_v57 = vld [vmem:[#allocation11 + $0x8] sm:$0xff] }
 0xc7f   :  { %v2911_v58 = vpop.eup %2910 }
 0xc80   :  { %v776_v61 = vmul.f32 %v2911_v58, %v684_v47 }
 0xce3   :  { %v779_v59 = vpop.permute.xlu0 %778 }
 0xce4   :  { %v781_v60 = vmul.f32 %v2911_v58, %v779_v59  ;;  %v1254_v59 = vld [vmem:[#allocation11 + $0x10] sm:$0xff] }
 0xce6   :  { %783 = vrot.lane.b32.xlu1 %v781_v60, %s3200_s3  ;;  %v1255_v60 = vld [vmem:[#allocation11 + $0x18] sm:$0xff] }
 0xd58   :  { %v784_v62 = vpop.permute.xlu1 %783 }
 0xd59   :  { %v786_v63 = vadd.f32 %v784_v62, %v776_v61  ;;  %v3535_v61 = vpack.c.bf16 %v1255_v60, %v1254_v59 }
 0xd5b   :  { %2912 = vtanh.f32 %v786_v63 }
 0xd65   :  { %v2913_v33 = vpop.eup %2912 }
 0xd66   :  { %789 = vrot.lane.b32.xlu0 %v2913_v33, %s3200_s3 }
 0xdd8   :  { %v790_v2 = vpop.permute.xlu0 %789 }
 0xdd9   :  { %v792_v3 = vmul.f32 %v2911_v58, %v790_v2  ;;  %v3531_v58 = vpack.c.bf16 %v1253_v57, %v1252_v56 }
 0xddb   :  { %794 = vrot.lane.b32.xlu1 %v792_v3, %s3201_s30 }
 0xe4d   :  { %v795_v4 = vpop.permute.xlu1 %794 }
 0xe4e   :  { %797 = vst.msk [vmem:[#allocation2 + $0x20] sm:$0xff] %vm153_vm1, %v795_v4  ;;  %2524 = vmatmul.mubr.msk.f32.vlgmr.msra.gmra.mrb[4].mxu1 %vm153_vm1, %v795_v4 }
 0xe4f   :  { %2762 = vmatpush3.bf16.msra.mxu1 %v3394_v11  ;;  %2545 = vmatprep.mubr.msk.f32.mxu1 %vm3198_vm0, %v3199_v1 }
 0xe50   :  { %2763 = vmatprep.subr.bf16.mxu1 %v3197_v0 }
 0xe53   :  { %2765 = vmatpush3.bf16.msra.mxu1 %v3398_v14 }
 0xe54   :  { %2774 = vmatprep.subr.bf16.mxu1 %v3197_v0 }
 0xe55   :  { %v1108_v34 = vld [vmem:[#allocation2 + $0x20] sm:$0xff] }
 0xf21   :  { %v866_v5 = vpop.f32.mrb[4].mxu1 }
 0xf22   :  { %v870_v6 = vadd.f32 %v866_v5, %v3430_v31  ;;  %v2525_v7 = vpop.f32.mrb[5].mxu1  ;;  %v1112_v31 = vld [vmem:[#allocation9] sm:$0xff] }
 0xf23   :  { %v2766_v19 = vpack.c.bf16 %v1113_v18, %v1112_v31 }
 0xf24   :  { %2914 = vtanh.f32 %v870_v6  ;;  %v2278_v9 = vmul.f32 -1.442695, %v870_v6  ;;  %v3560_v6 = vld [vmem:[%s3701_s6] ss:$0 sm:$0xff]  ;;  %s3202_s6 = smov 96  }
 0xf25   :  { %2767 = vmatprep.subr.bf16.mxu0 %v2766_v19 }
 0xf26   :  { %2916 = vpow2.f32 %v2278_v9 }
 0xf2e   :  { %v2915_v8 = vpop.eup %2914 }
 0xf2f   :  { %880 = vrot.lane.b32.xlu0 %v2915_v8, %s3200_s3 }
 0xf30   :  { %v2917_v11 = vpop.eup %2916 }
 0xf31   :  { %v874_v10 = vadd.f32 1.0, %v2917_v11 }
 0xf33   :  { %2918 = vrcp.f32 %v874_v10 }
 0xf3d   :  { %v2919_v12 = vpop.eup %2918 }
 0xf3e   :  { %v878_v14 = vmul.f32 %v2919_v12, %v786_v63 }
 0xfa1   :  { %v881_v13 = vpop.permute.xlu0 %880 }
 0xfa2   :  { %v883_v15 = vmul.f32 %v2919_v12, %v881_v13 }
 0xfa4   :  { %885 = vrot.lane.b32.xlu1 %v883_v15, %s3200_s3 }
0x1016   :  { %v886_v16 = vpop.permute.xlu1 %885 }
0x1017   :  { %v888_v17 = vadd.f32 %v886_v16, %v878_v14 }
0x1019   :  { %2920 = vtanh.f32 %v888_v17 }
0x1023   :  { %v2921_v20 = vpop.eup %2920 }
0x1024   :  { %891 = vrot.lane.b32.xlu0 %v2921_v20, %s3200_s3 }
0x1096   :  { %v892_v21 = vpop.permute.xlu0 %891 }
0x1097   :  { %v894_v22 = vmul.f32 %v2919_v12, %v892_v21 }
0x1099   :  { %896 = vrot.lane.b32.xlu1 %v894_v22, %s3201_s30 }
0x110b   :  { %v897_v26 = vpop.permute.xlu1 %896 }
0x110c   :  { %899 = vst.msk [vmem:[#allocation2 + $0x28] sm:$0xff] %vm153_vm1, %v897_v26  ;;  %2535 = vmatmul.mubr.msk.f32.vlgmr.msra.gmra.mrb[14].mxu0 %vm153_vm1, %v897_v26 }
0x110d   :  { %2769 = vmatpush3.bf16.msra.mxu0 %v2766_v19  ;;  %2556 = vmatprep.mubr.msk.f32.mxu0 %vm153_vm1, %v1104_v28 }
0x110e   :  { %2771 = vmatprep.subr.bf16.mxu0 %v2770_v25 }
0x1111   :  { %2773 = vmatpush3.bf16.msra.mxu0 %v2770_v25 }
0x1112   :  { %2786 = vmatprep.subr.bf16.mxu0 %v3197_v0 }
0x1113   :  { %v1109_v36 = vld [vmem:[#allocation2 + $0x28] sm:$0xff] }
0x1114   :  { %2557 = vmatmul.mubr.msk.f32.vlgmr.msra.gmra.mrb[16].mxu0 %vm153_vm1, %v1105_v29 }
0x1115   :  { %2559 = vmatprep.mubr.msk.f32.mxu0 %vm153_vm1, %v1106_v30  ;;  %2788 = vmatpush3.bf16.msra.mxu0 %v3531_v58 }
0x1116   :  { %2789 = vmatprep.subr.bf16.mxu0 %v3197_v0 }
0x1118   :  { %2560 = vmatmul.mubr.msk.f32.gmra.mrb[18].mxu0 %vm153_vm1, %v1107_v32 }
0x1119   :  { %2562 = vmatprep.mubr.msk.f32.mxu0 %vm153_vm1, %v1108_v34  ;;  %2791 = vmatpush3.bf16.msra.mxu0 %v3535_v61 }
0x111a   :  { %2798 = vmatprep.subr.bf16.mxu0 %v3197_v0 }
0x111c   :  { %2563 = vmatmul.mubr.msk.f32.gmra.mrb[20].mxu0 %vm153_vm1, %v1109_v36 }
0x11df   :  { %v968_v38 = vpop.f32.mrb[14].mxu0 }
0x11e0   :  { %v972_v39 = vadd.f32 %v968_v38, %v3436_v37  ;;  %v2536_v40 = vpop.f32.mrb[15].mxu0 }
0x11e2   :  { %2922 = vtanh.f32 %v972_v39  ;;  %v2280_v27 = vmul.f32 -1.442695, %v972_v39 }
0x11e4   :  { %2924 = vpow2.f32 %v2280_v27 }
0x11e7   :  { %v3515_v41 = vpop.f32.mrb[16].mxu0 }
0x11e8   :  { %v1213_v42 = vpop.f32.mrb[17].mxu0 }
0x11e9   :  { %v1214_v7 = vadd.f32 %v3560_v6, %v1213_v42  ;;  %v1219_v42 = vadd.f32 %v3515_v41, %v3560_v6 }
0x11eb   :  { %v3517_v43 = vpop.f32.mrb[18].mxu0 }
0x11ec   :  { %v2923_v44 = vpop.eup %2922  ;;  %v3519_v45 = vpop.f32.mrb[19].mxu0 }
0x11ed   :  { %982 = vrot.lane.b32.xlu0 %v2923_v44, %s3200_s3 }
0x11ee   :  { %v2925_v48 = vpop.eup %2924 }
0x11ef   :  { %v3522_v46 = vpop.f32.mrb[20].mxu0  ;;  %v976_v37 = vadd.f32 1.0, %v2925_v48 }
0x11f0   :  { %v3524_v47 = vpop.f32.mrb[21].mxu0 }
0x11f1   :  { %2926 = vrcp.f32 %v976_v37 }
0x11fb   :  { %v2927_v49 = vpop.eup %2926 }
0x11fc   :  { %v980_v52 = vmul.f32 %v2927_v49, %v888_v17 }
0x125f   :  { %v983_v50 = vpop.permute.xlu0 %982 }
0x1260   :  { %v985_v51 = vmul.f32 %v2927_v49, %v983_v50 }
0x1262   :  { %987 = vrot.lane.b32.xlu1 %v985_v51, %s3200_s3 }
0x12d4   :  { %v988_v53 = vpop.permute.xlu1 %987 }
0x12d5   :  { %v3527_v54 = vadd.f32 %v988_v53, %v980_v52 }
0x12d7   :  { %2928 = vtanh.f32 %v3527_v54 }
0x12e1   :  { %v2929_v55 = vpop.eup %2928 }
0x12e2   :  { %993 = vrot.lane.b32.xlu0 %v2929_v55, %s3200_s3 }
0x1354   :  { %v994_v62 = vpop.permute.xlu0 %993 }
0x1355   :  { %v996_v63 = vmul.f32 %v2927_v49, %v994_v62 }
0x1357   :  { %998 = vrot.lane.b32.xlu1 %v996_v63, %s3201_s30 }
0x13c9   :  { %v999_v33 = vpop.permute.xlu1 %998 }
0x13ca   :  { %1001 = vst.msk [vmem:[#allocation2 + $0x30] sm:$0xff] %vm153_vm1, %v999_v33  ;;  %2546 = vmatmul.mubr.msk.f32.vlgmr.msra.gmra.mrb[6].mxu1 %vm153_vm1, %v999_v33 }
0x13cb   :  { %2776 = vmatpush3.bf16.msra.mxu1 %v3531_v58  ;;  %2576 = vmatprep.mubr.msk.f32.mxu1 %vm3198_vm0, %v3199_v1 }
0x13cc   :  { %2777 = vmatprep.subr.bf16.mxu1 %v3197_v0 }
0x13cf   :  { %2779 = vmatpush3.bf16.msra.mxu1 %v3535_v61 }
0x13d0   :  { %2780 = vmatprep.subr.bf16.mxu1 %v3197_v0 }
0x13d1   :  { %v1110_v2 = vld [vmem:[#allocation2 + $0x30] sm:$0xff] }
0x13d2   :  { %2577 = vmatmul.mubr.f32.vlgmr.msra.gmra.mrb[8].mxu1 %v3199_v1  ;;  %2565 = vmatprep.mubr.msk.f32.mxu0 %vm153_vm1, %v1110_v2 }
0x13d3   :  { %2782 = vmatpush3.bf16.msra.mxu1 %v3531_v58  ;;  %2587 = vmatprep.mubr.msk.f32.mxu1 %vm3198_vm0, %v3199_v1 }
0x13d4   :  { %2783 = vmatprep.subr.bf16.mxu1 %v3197_v0 }
0x13d7   :  { %2785 = vmatpush3.bf16.msra.mxu1 %v3535_v61 }
0x13d8   :  { %2792 = vmatprep.subr.bf16.mxu1 %v3197_v0 }
0x149d   :  { %v1070_v3 = vpop.f32.mrb[6].mxu1 }
0x149e   :  { %v1074_v4 = vadd.f32 %v1070_v3, %v3434_v35  ;;  %v2547_v5 = vpop.f32.mrb[7].mxu1 }
0x14a0   :  { %v2282_v21 = vmul.f32 -1.442695, %v1074_v4 }
0x14a5   :  { %v1322_v8 = vpop.f32.mrb[8].mxu1 }
0x14a6   :  { %v1326_v9 = vadd.f32 %v1322_v8, %v1214_v7  ;;  %v2578_v11 = vpop.f32.mrb[9].mxu1 }
0x14a8   :  { %2930 = vtanh.f32 %v1326_v9  ;;  %v2292_v12 = vmul.f32 -1.442695, %v1326_v9 }
0x14aa   :  { %2932 = vpow2.f32 %v2292_v12 }
0x14b2   :  { %v2931_v10 = vpop.eup %2930 }
0x14b3   :  { %1336 = vrot.lane.b32.xlu0 %v2931_v10, %s3200_s3 }
0x14b4   :  { %v2933_v13 = vpop.eup %2932 }
0x14b5   :  { %v1330_v15 = vadd.f32 1.0, %v2933_v13 }
0x14b7   :  { %2934 = vrcp.f32 %v1330_v15 }
0x14c1   :  { %v2935_v35 = vpop.eup %2934 }
0x14c2   :  { %v1334_v17 = vmul.f32 0.0, %v2935_v35 }
0x1525   :  { %v1337_v14 = vpop.permute.xlu0 %1336 }
0x1526   :  { %v1339_v16 = vmul.f32 %v2935_v35, %v1337_v14 }
0x1528   :  { %1341 = vrot.lane.b32.xlu1 %v1339_v16, %s3200_s3 }
0x159a   :  { %v1342_v31 = vpop.permute.xlu1 %1341 }
0x159b   :  { %v1344_v18 = vadd.f32 %v1342_v31, %v1334_v17 }
0x159d   :  { %2936 = vtanh.f32 %v1344_v18 }
0x159e   :  { %2938 = vtanh.f32 %v1074_v4  ;;  %v1224_v4 = vadd.f32 %v3560_v6, %v3519_v45 }
0x159f   :  { %2940 = vpow2.f32 %v2282_v21 }
0x15a7   :  { %v2937_v19 = vpop.eup %2936 }
0x15a8   :  { %1347 = vrot.lane.b32.xlu0 %v2937_v19, %s3200_s3  ;;  %v2939_v20 = vpop.eup %2938 }
0x15a9   :  { %v2941_v22 = vpop.eup %2940 }
0x15aa   :  { %v1078_v23 = vadd.f32 1.0, %v2941_v22 }
0x15ac   :  { %1084 = vrot.lane.b32.xlu0 %v2939_v20, %s3200_s3  ;;  %2942 = vrcp.f32 %v1078_v23  ;;  %v1229_v20 = vadd.f32 %v3517_v43, %v3560_v6 }
0x15b6   :  { %v2943_v26 = vpop.eup %2942 }
0x15b7   :  { %v1082_v32 = vmul.f32 %v2943_v26, %v3527_v54 }
0x161a   :  { %v1348_v24 = vpop.permute.xlu0 %1347 }
0x161b   :  { %v1350_v25 = vmul.f32 %v2935_v35, %v1348_v24 }
0x161d   :  { %1352 = vrot.lane.b32.xlu1 %v1350_v25, %s3201_s30 }
0x161e   :  { %v1085_v28 = vpop.permute.xlu0 %1084 }
0x161f   :  { %v1087_v29 = vmul.f32 %v2943_v26, %v1085_v28 }
0x1621   :  { %1089 = vrot.lane.b32.xlu0 %v1087_v29, %s3200_s3 }
0x168f   :  { %v1353_v30 = vpop.permute.xlu1 %1352 }
0x1690   :  { %2588 = vmatmul.mubr.msk.f32.vlgmr.msra.gmra.mrb[10].mxu1 %vm153_vm1, %v1353_v30 }
0x1691   :  { %2794 = vmatpush3.bf16.msra.mxu1 %v3531_v58  ;;  %2609 = vmatprep.mubr.msk.f32.mxu1 %vm3198_vm0, %v3199_v1 }
0x1692   :  { %2795 = vmatprep.subr.bf16.mxu1 %v3197_v0 }
0x1693   :  { %v1090_v34 = vpop.permute.xlu0 %1089 }
0x1694   :  { %v1092_v36 = vadd.f32 %v1090_v34, %v1082_v32 }
0x1695   :  { %2797 = vmatpush3.bf16.msra.mxu1 %v3535_v61 }
0x1696   :  { %2944 = vtanh.f32 %v1092_v36  ;;  %2804 = vmatprep.subr.bf16.mxu1 %v3197_v0 }
0x16a0   :  { %v2945_v38 = vpop.eup %2944 }
0x16a1   :  { %1095 = vrot.lane.b32.xlu0 %v2945_v38, %s3200_s3 }
0x1713   :  { %v1096_v39 = vpop.permute.xlu0 %1095 }
0x1714   :  { %v1098_v40 = vmul.f32 %v2943_v26, %v1096_v39 }
0x1716   :  { %1100 = vrot.lane.b32.xlu0 %v1098_v40, %s3201_s30 }
0x1763   :  { %v1422_v44 = vpop.f32.mrb[10].mxu1 }
0x1764   :  { %v1426_v27 = vadd.f32 %v1422_v44, %v1219_v42  ;;  %v2589_v48 = vpop.f32.mrb[11].mxu1  ;;  %v1234_v44 = vadd.f32 %v3560_v6, %v3524_v47 }
0x1766   :  { %2946 = vtanh.f32 %v1426_v27  ;;  %v2294_v51 = vmul.f32 -1.442695, %v1426_v27 }
0x1768   :  { %2948 = vpow2.f32 %v2294_v51 }
0x1770   :  { %v2947_v37 = vpop.eup %2946 }
0x1771   :  { %1436 = vrot.lane.b32.xlu1 %v2947_v37, %s3200_s3 }
0x1772   :  { %v2949_v41 = vpop.eup %2948 }
0x1773   :  { %v1430_v52 = vadd.f32 1.0, %v2949_v41 }
0x1775   :  { %2950 = vrcp.f32 %v1430_v52 }
0x177f   :  { %v2951_v53 = vpop.eup %2950 }
0x1780   :  { %v1434_v56 = vmul.f32 %v2951_v53, %v1344_v18 }
0x1788   :  { %v3582_v49 = vpop.permute.xlu0 %1100 }
0x1789   :  { %1103 = vst.msk [vmem:[#allocation2 + $0x38] sm:$0xff] %vm153_vm1, %v3582_v49 }
0x1790   :  { %v1111_v50 = vld [vmem:[#allocation2 + $0x38] sm:$0xff] }
0x1791   :  { %2566 = vmatmul.mubr.msk.f32.gmra.mrb[22].mxu0 %vm153_vm1, %v1111_v50 }
0x1792   :  { %2598 = vmatprep.mubr.msk.f32.mxu0 %vm3198_vm0, %v3199_v1 }
0x17e3   :  { %v1437_v54 = vpop.permute.xlu1 %1436 }
0x17e4   :  { %v1439_v55 = vmul.f32 %v2951_v53, %v1437_v54 }
0x17e6   :  { %1441 = vrot.lane.b32.xlu1 %v1439_v55, %s3200_s3 }
0x1858   :  { %v1442_v57 = vpop.permute.xlu1 %1441 }
0x1859   :  { %v1444_v59 = vadd.f32 %v1442_v57, %v1434_v56 }
0x185b   :  { %2952 = vtanh.f32 %v1444_v59 }
0x1864   :  { %v3590_v60 = vpop.f32.mrb[22].mxu0 }
0x1865   :  { %v2953_v62 = vpop.eup %2952  ;;  %v3592_v63 = vpop.f32.mrb[23].mxu0 }
0x1866   :  { %1447 = vrot.lane.b32.xlu1 %v2953_v62, %s3200_s3 }
0x18d8   :  { %v1448_v33 = vpop.permute.xlu1 %1447 }
0x18d9   :  { %v1450_v2 = vmul.f32 %v2951_v53, %v1448_v33 }
0x18db   :  { %1452 = vrot.lane.b32.xlu1 %v1450_v2, %s3201_s30 }
0x194d   :  { %v1453_v3 = vpop.permute.xlu1 %1452 }
0x194e   :  { %2599 = vmatmul.mubr.msk.f32.vlgmr.msra.gmra.mrb[24].mxu0 %vm153_vm1, %v1453_v3  ;;  %v1239_v3 = vadd.f32 %v3522_v46, %v3560_v6 }
0x194f   :  { %2800 = vmatpush3.bf16.msra.mxu0 %v3531_v58  ;;  %2620 = vmatprep.mubr.msk.f32.mxu0 %vm3198_vm0, %v3199_v1 }
0x1950   :  { %2801 = vmatprep.subr.bf16.mxu0 %v3197_v0 }
0x1953   :  { %2803 = vmatpush3.bf16.msra.mxu0 %v3535_v61 }
0x1954   :  { %2810 = vmatprep.subr.bf16.mxu0 %v3197_v0 }
0x1a21   :  { %v1522_v5 = vpop.f32.mrb[24].mxu0 }
0x1a22   :  { %v1526_v7 = vadd.f32 %v1522_v5, %v1224_v4  ;;  %v2600_v8 = vpop.f32.mrb[25].mxu0 }
0x1a24   :  { %2954 = vtanh.f32 %v1526_v7  ;;  %v2296_v11 = vmul.f32 -1.442695, %v1526_v7 }
0x1a26   :  { %2956 = vpow2.f32 %v2296_v11 }
0x1a2e   :  { %v2955_v9 = vpop.eup %2954 }
0x1a2f   :  { %1536 = vrot.lane.b32.xlu0 %v2955_v9, %s3200_s3 }
0x1a30   :  { %v2957_v10 = vpop.eup %2956 }
0x1a31   :  { %v1530_v12 = vadd.f32 1.0, %v2957_v10 }
0x1a33   :  { %2958 = vrcp.f32 %v1530_v12 }
0x1a3d   :  { %v2959_v13 = vpop.eup %2958 }
0x1a3e   :  { %v1534_v14 = vmul.f32 %v2959_v13, %v1444_v59 }
0x1aa1   :  { %v1537_v15 = vpop.permute.xlu0 %1536 }
0x1aa2   :  { %v1539_v35 = vmul.f32 %v2959_v13, %v1537_v15 }
0x1aa4   :  { %1541 = vrot.lane.b32.xlu1 %v1539_v35, %s3200_s3 }
0x1b16   :  { %v1542_v16 = vpop.permute.xlu1 %1541 }
0x1b17   :  { %v1544_v45 = vadd.f32 %v1542_v16, %v1534_v14 }
0x1b19   :  { %2960 = vtanh.f32 %v1544_v45 }
0x1b23   :  { %v2961_v17 = vpop.eup %2960 }
0x1b24   :  { %1547 = vrot.lane.b32.xlu0 %v2961_v17, %s3200_s3  ;;  %v1244_v17 = vadd.f32 %v3560_v6, %v3592_v63 }
0x1b96   :  { %v1548_v31 = vpop.permute.xlu0 %1547 }
0x1b97   :  { %v1550_v18 = vmul.f32 %v2959_v13, %v1548_v31 }
0x1b99   :  { %1552 = vrot.lane.b32.xlu1 %v1550_v18, %s3201_s30 }
0x1c0b   :  { %v1553_v19 = vpop.permute.xlu1 %1552 }
0x1c0c   :  { %2610 = vmatmul.mubr.msk.f32.vlgmr.msra.gmra.mrb[12].mxu1 %vm153_vm1, %v1553_v19 }
0x1c0d   :  { %2806 = vmatpush3.bf16.msra.mxu1 %v3531_v58  ;;  %2631 = vmatprep.mubr.msk.f32.mxu1 %vm3198_vm0, %v3199_v1 }
0x1c0e   :  { %2807 = vmatprep.subr.bf16.mxu1 %v3197_v0 }
0x1c11   :  { %2809 = vmatpush3.bf16.msra.mxu1 %v3535_v61 }
0x1c12   :  { %2816 = vmatprep.subr.bf16.mxu1 %v3197_v0 }
0x1cdf   :  { %v1622_v21 = vpop.f32.mrb[12].mxu1 }
0x1ce0   :  { %v1626_v22 = vadd.f32 %v1622_v21, %v1229_v20  ;;  %v2611_v23 = vpop.f32.mrb[13].mxu1 }
0x1ce2   :  { %2962 = vtanh.f32 %v1626_v22  ;;  %v2298_v25 = vmul.f32 -1.442695, %v1626_v22 }
0x1ce4   :  { %2964 = vpow2.f32 %v2298_v25 }
0x1cec   :  { %v2963_v24 = vpop.eup %2962 }
0x1ced   :  { %1636 = vrot.lane.b32.xlu0 %v2963_v24, %s3200_s3 }
0x1cee   :  { %v2965_v26 = vpop.eup %2964 }
0x1cef   :  { %v1630_v28 = vadd.f32 1.0, %v2965_v26 }
0x1cf1   :  { %2966 = vrcp.f32 %v1630_v28 }
0x1cfb   :  { %v2967_v29 = vpop.eup %2966 }
0x1cfc   :  { %v1634_v34 = vmul.f32 %v2967_v29, %v1544_v45 }
0x1d5f   :  { %v1637_v30 = vpop.permute.xlu0 %1636 }
0x1d60   :  { %v1639_v32 = vmul.f32 %v2967_v29, %v1637_v30 }
0x1d62   :  { %1641 = vrot.lane.b32.xlu1 %v1639_v32, %s3200_s3 }
0x1dd4   :  { %v1642_v36 = vpop.permute.xlu1 %1641 }
0x1dd5   :  { %v1644_v43 = vadd.f32 %v1642_v36, %v1634_v34 }
0x1dd7   :  { %2968 = vtanh.f32 %v1644_v43 }
0x1de1   :  { %v2969_v38 = vpop.eup %2968 }
0x1de2   :  { %1647 = vrot.lane.b32.xlu0 %v2969_v38, %s3200_s3 }
0x1e54   :  { %v1648_v39 = vpop.permute.xlu0 %1647 }
0x1e55   :  { %v1650_v40 = vmul.f32 %v2967_v29, %v1648_v39 }
0x1e57   :  { %1652 = vrot.lane.b32.xlu1 %v1650_v40, %s3201_s30 }
0x1ec9   :  { %v1653_v42 = vpop.permute.xlu1 %1652 }
0x1eca   :  { %2621 = vmatmul.mubr.msk.f32.vlgmr.msra.gmra.mrb[26].mxu0 %vm153_vm1, %v1653_v42 }
0x1ecb   :  { %2812 = vmatpush3.bf16.msra.mxu0 %v3531_v58  ;;  %2642 = vmatprep.mubr.msk.f32.mxu0 %vm3198_vm0, %v3199_v1 }
0x1ecc   :  { %2813 = vmatprep.subr.bf16.mxu0 %v3197_v0 }
0x1ecf   :  { %2815 = vmatpush3.bf16.msra.mxu0 %v3535_v61 }
0x1ed0   :  { %2822 = vmatprep.subr.bf16.mxu0 %v3197_v0 }
0x1f9d   :  { %v1722_v27 = vpop.f32.mrb[26].mxu0 }
0x1f9e   :  { %v1726_v48 = vadd.f32 %v1722_v27, %v1234_v44  ;;  %v2622_v37 = vpop.f32.mrb[27].mxu0 }
0x1fa0   :  { %2970 = vtanh.f32 %v1726_v48  ;;  %v2300_v51 = vmul.f32 -1.442695, %v1726_v48 }
0x1fa2   :  { %2972 = vpow2.f32 %v2300_v51 }
0x1faa   :  { %v2971_v50 = vpop.eup %2970 }
0x1fab   :  { %1736 = vrot.lane.b32.xlu0 %v2971_v50, %s3200_s3 }
0x1fac   :  { %v2973_v41 = vpop.eup %2972 }
0x1fad   :  { %v1730_v52 = vadd.f32 1.0, %v2973_v41 }
0x1faf   :  { %2974 = vrcp.f32 %v1730_v52  ;;  %v2058_v52 = vld [vmem:[#allocation12 + $0x8] sm:$0xff] }
0x1fb9   :  { %v2975_v53 = vpop.eup %2974 }
0x1fba   :  { %v1734_v56 = vmul.f32 %v2975_v53, %v1644_v43  ;;  %v1249_v43 = vadd.f32 %v3590_v60, %v3560_v6  ;;  %v2057_v60 = vld [vmem:[#allocation12] sm:$0xff] }
0x201d   :  { %v1737_v54 = vpop.permute.xlu0 %1736 }
0x201e   :  { %v1739_v55 = vmul.f32 %v2975_v53, %v1737_v54  ;;  %v2823_v54 = vpack.c.bf16 %v2058_v52, %v2057_v60 }
0x2020   :  { %1741 = vrot.lane.b32.xlu1 %v1739_v55, %s3200_s3  ;;  %v2060_v55 = vld [vmem:[#allocation12 + $0x18] sm:$0xff] }
0x2092   :  { %v1742_v57 = vpop.permute.xlu1 %1741 }
0x2093   :  { %v1744_v47 = vadd.f32 %v1742_v57, %v1734_v56  ;;  %v2061_v57 = vld [vmem:[#allocation12 + $0x20] sm:$0xff] }
0x2095   :  { %2976 = vtanh.f32 %v1744_v47 }
0x209f   :  { %v2977_v59 = vpop.eup %2976 }
0x20a0   :  { %1747 = vrot.lane.b32.xlu0 %v2977_v59, %s3200_s3 }
0x2112   :  { %v1748_v62 = vpop.permute.xlu0 %1747 }
0x2113   :  { %v1750_v33 = vmul.f32 %v2975_v53, %v1748_v62  ;;  %v2059_v53 = vld [vmem:[#allocation12 + $0x10] sm:$0xff] }
0x2114   :  { %v2826_v56 = vpack.c.bf16 %v2060_v55, %v2059_v53 }
0x2115   :  { %1752 = vrot.lane.b32.xlu1 %v1750_v33, %s3201_s30  ;;  %v2063_v33 = vld [vmem:[#allocation12 + $0x30] sm:$0xff] }
0x2187   :  { %v1753_v2 = vpop.permute.xlu1 %1752 }
0x2188   :  { %2632 = vmatmul.mubr.msk.f32.vlgmr.msra.gmra.mrb[14].mxu1 %vm153_vm1, %v1753_v2  ;;  %v2064_v2 = vld [vmem:[#allocation12 + $0x38] sm:$0xff] }
0x2189   :  { %2818 = vmatpush3.bf16.msra.mxu1 %v3531_v58  ;;  %2653 = vmatprep.mubr.msk.f32.mxu1 %vm3198_vm0, %v3199_v1 }
0x218a   :  { %2819 = vmatprep.subr.bf16.mxu1 %v3197_v0 }
0x218d   :  { %2821 = vmatpush3.bf16.msra.mxu1 %v3535_v61 }
0x218e   :  { %2834 = vmatprep.subr.bf16.mxu1 %v3197_v0 }
0x225b   :  { %v1822_v4 = vpop.f32.mrb[14].mxu1 }
0x225c   :  { %v1826_v5 = vadd.f32 %v1822_v4, %v1239_v3  ;;  %v2633_v7 = vpop.f32.mrb[15].mxu1  ;;  %v2832_v3 = vpack.c.bf16 %v2064_v2, %v2063_v33  ;;  %v2147_v4 = vld [vmem:[#allocation14] sm:$0xff] }
0x225d   :  { %v2149_v7 = vld [vmem:[#allocation14 + $0x10] sm:$0xff] }
0x225e   :  { %2978 = vtanh.f32 %v1826_v5  ;;  %v2302_v58 = vmul.f32 -1.442695, %v1826_v5  ;;  %v2148_v5 = vld [vmem:[#allocation14 + $0x8] sm:$0xff] }
0x2260   :  { %2980 = vpow2.f32 %v2302_v58  ;;  %v2150_v58 = vld [vmem:[#allocation14 + $0x18] sm:$0xff] }
0x2268   :  { %v2979_v8 = vpop.eup %2978 }
0x2269   :  { %1836 = vrot.lane.b32.xlu0 %v2979_v8, %s3200_s3  ;;  %v2835_v8 = vpack.c.bf16 %v2148_v5, %v2147_v4 }
0x226a   :  { %v2981_v9 = vpop.eup %2980 }
0x226b   :  { %v1830_v11 = vadd.f32 1.0, %v2981_v9  ;;  %v2838_v9 = vpack.c.bf16 %v2150_v58, %v2149_v7 }
0x226d   :  { %2982 = vrcp.f32 %v1830_v11  ;;  %v2151_v11 = vld [vmem:[#allocation14 + $0x20] sm:$0xff] }
0x2277   :  { %v2983_v10 = vpop.eup %2982 }
0x2278   :  { %v1834_v13 = vmul.f32 %v2983_v10, %v1744_v47  ;;  %v2062_v47 = vld [vmem:[#allocation12 + $0x28] sm:$0xff] }
0x2279   :  { %v2829_v59 = vpack.c.bf16 %v2062_v47, %v2061_v57 }
0x22db   :  { %v1837_v12 = vpop.permute.xlu0 %1836 }
0x22dc   :  { %v1839_v61 = vmul.f32 %v2983_v10, %v1837_v12 }
0x22de   :  { %1841 = vrot.lane.b32.xlu1 %v1839_v61, %s3200_s3 }
0x2350   :  { %v1842_v15 = vpop.permute.xlu1 %1841 }
0x2351   :  { %v1844_v46 = vadd.f32 %v1842_v15, %v1834_v13  ;;  %v2153_v15 = vld [vmem:[#allocation14 + $0x30] sm:$0xff] }
0x2353   :  { %2984 = vtanh.f32 %v1844_v46 }
0x235d   :  { %v2985_v35 = vpop.eup %2984 }
0x235e   :  { %1847 = vrot.lane.b32.xlu0 %v2985_v35, %s3200_s3 }
0x23d0   :  { %v1848_v14 = vpop.permute.xlu0 %1847 }
0x23d1   :  { %v1850_v16 = vmul.f32 %v2983_v10, %v1848_v14  ;;  %v2152_v10 = vld [vmem:[#allocation14 + $0x28] sm:$0xff]  ;;  %v2155_v14 = vld [vmem:[#allocation14 + $0x40] sm:$0xff] }
0x23d2   :  { %v2841_v61 = vpack.c.bf16 %v2152_v10, %v2151_v11 }
0x23d3   :  { %1852 = vrot.lane.b32.xlu1 %v1850_v16, %s3201_s30  ;;  %v2156_v16 = vld [vmem:[#allocation14 + $0x48] sm:$0xff] }
0x2445   :  { %v1853_v45 = vpop.permute.xlu1 %1852 }
0x2446   :  { %2643 = vmatmul.mubr.msk.f32.vlgmr.msra.gmra.mrb[28].mxu0 %vm153_vm1, %v1853_v45  ;;  %v2847_v45 = vpack.c.bf16 %v2156_v16, %v2155_v14 }
0x2447   :  { %2672 = vmatprep.mubr.msk.f32.mxu0 %vm3198_vm0, %v3199_v1  ;;  %2824 = vmatpush3.bf16.msra.mxu0 %v2823_v54 }
0x2448   :  { %2825 = vmatprep.subr.bf16.mxu0 %v3197_v0 }
0x244b   :  { %2827 = vmatpush3.bf16.msra.mxu0 %v2826_v56 }
0x244c   :  { %2828 = vmatprep.subr.bf16.mxu0 %v3197_v0 }
0x244f   :  { %2830 = vmatpush3.bf16.msra.mxu0 %v2829_v59 }
0x2450   :  { %2831 = vmatprep.subr.bf16.mxu0 %v3197_v0 }
0x2453   :  { %2833 = vmatpush3.bf16.msra.mxu0 %v2832_v3 }
0x2519   :  { %v1922_v31 = vpop.f32.mrb[28].mxu0 }
0x251a   :  { %v1926_v18 = vadd.f32 %v1922_v31, %v1244_v17  ;;  %v2644_v19 = vpop.f32.mrb[29].mxu0  ;;  %v2157_v17 = vld [vmem:[#allocation14 + $0x50] sm:$0xff]  ;;  %v2158_v31 = vld [vmem:[#allocation14 + $0x58] sm:$0xff] }
0x251b   :  { %v2159_v19 = vld [vmem:[#allocation14 + $0x60] sm:$0xff] }
0x251c   :  { %2986 = vtanh.f32 %v1926_v18  ;;  %v2304_v21 = vmul.f32 -1.442695, %v1926_v18  ;;  %v2850_v18 = vpack.c.bf16 %v2158_v31, %v2157_v17 }
0x251e   :  { %2988 = vpow2.f32 %v2304_v21 }
0x2526   :  { %v2987_v20 = vpop.eup %2986 }
0x2527   :  { %1936 = vrot.lane.b32.xlu0 %v2987_v20, %s3200_s3  ;;  %v2160_v20 = vld [vmem:[#allocation14 + $0x68] sm:$0xff] }
0x2528   :  { %v2989_v22 = vpop.eup %2988  ;;  %v2853_v21 = vpack.c.bf16 %v2160_v20, %v2159_v19 }
0x2529   :  { %v1930_v23 = vadd.f32 1.0, %v2989_v22 }
0x252b   :  { %2990 = vrcp.f32 %v1930_v23 }
0x2535   :  { %v2991_v24 = vpop.eup %2990 }
0x2536   :  { %v1934_v28 = vmul.f32 %v2991_v24, %v1844_v46  ;;  %v2154_v46 = vld [vmem:[#allocation14 + $0x38] sm:$0xff] }
0x2537   :  { %v2844_v35 = vpack.c.bf16 %v2154_v46, %v2153_v15 }
0x2599   :  { %v1937_v25 = vpop.permute.xlu0 %1936 }
0x259a   :  { %v1939_v26 = vmul.f32 %v2991_v24, %v1937_v25  ;;  %v2161_v25 = vld [vmem:[#allocation14 + $0x70] sm:$0xff] }
0x259c   :  { %1941 = vrot.lane.b32.xlu1 %v1939_v26, %s3200_s3  ;;  %v2162_v26 = vld [vmem:[#allocation14 + $0x78] sm:$0xff] }
0x260e   :  { %v1942_v29 = vpop.permute.xlu1 %1941 }
0x260f   :  { %v1944_v63 = vadd.f32 %v1942_v29, %v1934_v28  ;;  %v2856_v28 = vpack.c.bf16 %v2162_v26, %v2161_v25  ;;  %v2307_v29 = vld [vmem:[%s3703_s8] ss:$0 sm:$0xff] }
0x2611   :  { %2992 = vtanh.f32 %v1944_v63 }
0x261b   :  { %v2993_v30 = vpop.eup %2992 }
0x261c   :  { %1947 = vrot.lane.b32.xlu0 %v2993_v30, %s3200_s3 }
0x268e   :  { %v1948_v32 = vpop.permute.xlu0 %1947 }
0x268f   :  { %v1950_v34 = vmul.f32 %v2991_v24, %v1948_v32 }
0x2691   :  { %1952 = vrot.lane.b32.xlu1 %v1950_v34, %s3201_s30 }
0x2703   :  { %v1953_v36 = vpop.permute.xlu1 %1952 }
0x2704   :  { %2654 = vmatmul.mubr.msk.f32.vlgmr.msra.gmra.mrb[16].mxu1 %vm153_vm1, %v1953_v36 }
0x2705   :  { %2707 = vmatprep.mubr.msk.f32.mxu1 %vm3198_vm0, %v3199_v1  ;;  %2836 = vmatpush3.bf16.msra.mxu1 %v2835_v8 }
0x2706   :  { %2837 = vmatprep.subr.bf16.mxu1 %v3197_v0 }
0x2709   :  { %2839 = vmatpush3.bf16.msra.mxu1 %v2838_v9 }
0x270a   :  { %2840 = vmatprep.subr.bf16.mxu1 %v3197_v0 }
0x270d   :  { %2842 = vmatpush3.bf16.msra.mxu1 %v2841_v61 }
0x270e   :  { %2843 = vmatprep.subr.bf16.mxu1 %v3197_v0 }
0x2711   :  { %2845 = vmatpush3.bf16.msra.mxu1 %v2844_v35 }
0x2712   :  { %2846 = vmatprep.subr.bf16.mxu1 %v3197_v0 }
0x2715   :  { %2848 = vmatpush3.bf16.msra.mxu1 %v2847_v45 }
0x2716   :  { %2849 = vmatprep.subr.bf16.mxu1 %v3197_v0 }
0x2719   :  { %2851 = vmatpush3.bf16.msra.mxu1 %v2850_v18 }
0x271a   :  { %2852 = vmatprep.subr.bf16.mxu1 %v3197_v0 }
0x271d   :  { %2854 = vmatpush3.bf16.msra.mxu1 %v2853_v21 }
0x271e   :  { %2855 = vmatprep.subr.bf16.mxu1 %v3197_v0  ;;  %v2309_v0 = vld [vmem:[%s3705_s10] ss:$0 sm:$0xff] }
0x2721   :  { %2857 = vmatpush3.bf16.msra.mxu1 %v2856_v28 }
0x27d7   :  { %v2022_v38 = vpop.f32.mrb[16].mxu1 }
0x27d8   :  { %v2026_v39 = vadd.f32 %v2022_v38, %v1249_v43  ;;  %v2655_v40 = vpop.f32.mrb[17].mxu1 }
0x27da   :  { %2994 = vtanh.f32 %v2026_v39  ;;  %v2306_v44 = vmul.f32 -1.442695, %v2026_v39 }
0x27dc   :  { %2996 = vpow2.f32 %v2306_v44 }
0x27e4   :  { %v2995_v42 = vpop.eup %2994 }
0x27e5   :  { %2036 = vrot.lane.b32.xlu0 %v2995_v42, %s3200_s3 }
0x27e6   :  { %v2997_v27 = vpop.eup %2996 }
0x27e7   :  { %v2030_v48 = vadd.f32 1.0, %v2997_v27 }
0x27e9   :  { %2998 = vrcp.f32 %v2030_v48 }
0x27f3   :  { %v2999_v37 = vpop.eup %2998 }
0x27f4   :  { %v2034_v1 = vmul.f32 %v2999_v37, %v1944_v63 }
0x2857   :  { %v2037_v50 = vpop.permute.xlu0 %2036 }
0x2858   :  { %v2039_v51 = vmul.f32 %v2999_v37, %v2037_v50 }
0x285a   :  { %2041 = vrot.lane.b32.xlu1 %v2039_v51, %s3200_s3 }
0x28cc   :  { %v2042_v41 = vpop.permute.xlu1 %2041 }
0x28cd   :  { %v2044_v6 = vadd.f32 %v2042_v41, %v2034_v1 }
0x28cf   :  { %3000 = vtanh.f32 %v2044_v6 }
0x28d9   :  { %v3001_v62 = vpop.eup %3000 }
0x28da   :  { %2047 = vrot.lane.b32.xlu0 %v3001_v62, %s3200_s3 }
0x294c   :  { %v2048_v12 = vpop.permute.xlu0 %2047 }
0x294d   :  { %v2050_v13 = vmul.f32 %v2999_v37, %v2048_v12 }
0x294f   :  { %2052 = vrot.lane.b32.xlu1 %v2050_v13, %s3202_s6 }
0x29c1   :  { %v2053_v22 = vpop.permute.xlu1 %2052 }
0x29c2   :  { %v2055_v23 = vsel %vm153_vm1, %v3582_v49, %v2053_v22 }
0x29c3   :  { %v2056_v24 = vmax.f32 %v2055_v23, 0.0 }
0x29c5   :  { %2673 = vmatmul.mubr.msk.f32.vlgmr.msra.gmra.mrb[30].mxu0 %vm2072_vm2, %v2056_v24 }
0x2a98   :  { %v2142_v63 = vpop.f32.mrb[30].mxu0 }
0x2a99   :  { %v2143_v30 = vadd.f32 %v2307_v29, %v2142_v63  ;;  %v2674_v32 = vpop.f32.mrb[31].mxu0 }
0x2a9b   :  { %v2146_v34 = vmax.f32 %v2143_v30, 0.0 }
0x2a9d   :  { %2708 = vmatmul.mubr.f32.vlgmr.msra.gmra.mrb[18].mxu1 %v2146_v34 }
0x2b70   :  { %v2236_v49 = vpop.f32.mrb[18].mxu1 }
0x2b71   :  { %v2237_v36 = vadd.f32 %v2309_v0, %v2236_v49  ;;  %v2709_v43 = vpop.f32.mrb[19].mxu1 }
0x2b73   :  { %2240 = vst [vmem:[#allocation15] sm:$0xff] %v2237_v36 }
0x2b74   :  { %3167 = shalt.err (!%p3164_p4)
}
0x2b75   :  { %s3168_s13 = scalar_lea.hbm %s3706_s11, 128 }
0x2b76   :  { %p3169_p5 = scmp.ne.s32.totalorder %s3706_s11, %s3168_s13  ;;  %p3172_p6 = scmp.lt.u32.totalorder %s3168_s13, %s3706_s11 }
0x2b78   :  { %p3174_p7 = pnand %p3172_p6, %p3169_p5 }
0x2b7a   :  { %3177 = shalt.err (!%p3174_p7)
}
0x2b7b   :  { %2250 = dma.vmem_to_hbm [thread:$0]  %s2248_s25, 128, %s3706_s11, [#allocation5]  }
0x2b7c   :  { %3186 = dma.done.wait [#allocation5], 128  }
0x2b7d   :  { %3187 = vsyncadd [#allocation5], 4294967168 }
0x2b7e   :  { %2254 = vsyncpa [#allocation4], 1 }
0x2b7f   :  { %2255 = vsyncpa [#allocation7], 1 }
0x2b80   :  { %2256 = vsyncpa [#allocation10], 1 }
0x2b81   :  { %2257 = vsyncpa [#allocation13], 1 }
0x2b82   :  { %2258 = vsyncpa [#allocation5], 1 }

</bundles_post_ra>
